<compile_context>
chip_gen: v7x
topology: tpu7x:2x2x1
jax: 0.10.0
libtpu: 0.0.40
codegen_flags: <defaults>
</compile_context>

<pallas_src>
import functools
import math

import jax
import jax.numpy as jnp
from jax import lax
from jax.experimental import pallas as pl
from jax.experimental.pallas import tpu as pltpu

_MXU_DTYPE = jnp.bfloat16   # MXU operand dtype (accumulation stays f32)
_NEG_INF = -1e9


# --------------------------- hardware-aware limits ---------------------------

@functools.lru_cache(maxsize=None)
def _vmem_limit_bytes():
    """Scoped-VMEM budget derived from the actual chip (v7x has 64 MiB only)."""
    try:
        cap = int(pltpu.get_tpu_info().vmem_capacity_bytes)
    except Exception:  # no TPU info available at trace time — be conservative
        cap = 64 * 1024 * 1024
    # keep headroom for the compiler; cap at 100 MiB on 128 MiB parts
    return int(min(cap * 3 // 4, 100 * 1024 * 1024))


# --------------------------- tile-size selection ------------------------------

def _round_up(x, m):
    return ((x + m - 1) // m) * m


def _pick_tile(dim, candidates):
    """Largest candidate dividing `dim`; otherwise the full dim (always legal)."""
    for c in candidates:
        if dim >= c and dim % c == 0:
            return c
    return dim


_M_TILES = (512, 256, 128)
_N_TILES = (512, 256, 128)
_K_TILES = (512, 256, 128)
_Q_TILES = (256, 128, 64, 32, 16, 8)
_KV_TILES = (512, 256, 128, 64, 32, 16, 8)


# ------------------------------ matmul kernels --------------------------------

def _matmul_bias_kernel(x_ref, w_ref, b_ref, o_ref, acc_ref, *, activation):
    # grid = (M//tm, N//tn, K//tk); K is the last ("arbitrary") axis.
    @pl.when(pl.program_id(2) == 0)
    def _():
        acc_ref[...] = jnp.zeros_like(acc_ref)

    acc_ref[...] += jnp.dot(x_ref[...].astype(_MXU_DTYPE),
                            w_ref[...].astype(_MXU_DTYPE),
                            preferred_element_type=jnp.float32)

    @pl.when(pl.program_id(2) == pl.num_programs(2) - 1)
    def _():
        y = acc_ref[...] + b_ref[...].astype(jnp.float32)
        if activation == "relu":
            y = jnp.maximum(y, 0.0)
        o_ref[...] = y.astype(o_ref.dtype)


def _matmul_bias_res_ln_kernel(x_ref, w_ref, b_ref, res_ref, g_ref, beta_ref,
                               o_ref, acc_ref, *, eps):
    # grid = (M//tm, K//tk); the full output row (N = d_model) is kept per tile
    # so the LayerNorm epilogue sees the whole feature dimension.
    @pl.when(pl.program_id(1) == 0)
    def _():
        acc_ref[...] = jnp.zeros_like(acc_ref)

    acc_ref[...] += jnp.dot(x_ref[...].astype(_MXU_DTYPE),
                            w_ref[...].astype(_MXU_DTYPE),
                            preferred_element_type=jnp.float32)

    @pl.when(pl.program_id(1) == pl.num_programs(1) - 1)
    def _():
        y = (acc_ref[...] + b_ref[...].astype(jnp.float32)
             + res_ref[...].astype(jnp.float32))
        mean = jnp.mean(y, axis=-1, keepdims=True)
        var = jnp.mean((y - mean) ** 2, axis=-1, keepdims=True)
        out = (y - mean) * lax.rsqrt(var + eps)
        out = out * g_ref[...].astype(jnp.float32) + beta_ref[...].astype(jnp.float32)
        o_ref[...] = out.astype(o_ref.dtype)


def matmul_bias(x2d, w, b, activation=None):
    """Tiled (x @ w + b) with optional ReLU; bf16 MXU operands, f32 accumulation.

    M is zero-padded to a multiple of 128 (instead of shrinking tm below 128).
    """
    M, K = x2d.shape
    N = w.shape[1]
    Mp = _round_up(M, 128)
    xp = x2d if Mp == M else jnp.pad(x2d, ((0, Mp - M), (0, 0)))

    tm = _pick_tile(Mp, _M_TILES)
    tn = _pick_tile(N, _N_TILES)
    tk = _pick_tile(K, _K_TILES)
    grid = (Mp // tm, N // tn, K // tk)
    cost = pl.CostEstimate(flops=2 * Mp * N * K, transcendentals=0,
                           bytes_accessed=4 * (Mp * K + K * N + Mp * N))
    out = pl.pallas_call(
        functools.partial(_matmul_bias_kernel, activation=activation),
        out_shape=jax.ShapeDtypeStruct((Mp, N), x2d.dtype),
        grid=grid,
        in_specs=[pl.BlockSpec((tm, tk), lambda i, j, k: (i, k)),
                  pl.BlockSpec((tk, tn), lambda i, j, k: (k, j)),
                  pl.BlockSpec((1, tn), lambda i, j, k: (0, j))],
        out_specs=pl.BlockSpec((tm, tn), lambda i, j, k: (i, j)),
        scratch_shapes=[pltpu.VMEM((tm, tn), jnp.float32)],
        compiler_params=pltpu.CompilerParams(
            dimension_semantics=("parallel", "parallel", "arbitrary"),
            vmem_limit_bytes=_vmem_limit_bytes()),
        cost_estimate=cost,
    )(xp, w, b.reshape(1, N))
    return out if Mp == M else out[:M]


def matmul_bias_residual_layernorm(x2d, w, b, residual2d, gamma, beta, eps=1e-5):
    """Tiled LayerNorm(residual + x @ w + b); f32 accumulation + f32 LN stats.

    tm/tk are capped (256) so the (tk, d_model) weight block and (tm, d_model)
    f32 accumulator stay inside v7x's smaller VMEM budget when d_model is large.
    """
    M, K = x2d.shape
    N = w.shape[1]  # d_model — kept whole for the LayerNorm epilogue
    Mp = _round_up(M, 128)
    pad = Mp - M
    xp = jnp.pad(x2d, ((0, pad), (0, 0))) if pad else x2d
    rp = jnp.pad(residual2d, ((0, pad), (0, 0))) if pad else residual2d

    tm = _pick_tile(Mp, (256, 128))
    tk = _pick_tile(K, (256, 128))
    grid = (Mp // tm, K // tk)
    cost = pl.CostEstimate(flops=2 * Mp * N * K, transcendentals=0,
                           bytes_accessed=4 * (Mp * K + K * N + 2 * Mp * N))
    out = pl.pallas_call(
        functools.partial(_matmul_bias_res_ln_kernel, eps=eps),
        out_shape=jax.ShapeDtypeStruct((Mp, N), residual2d.dtype),
        grid=grid,
        in_specs=[pl.BlockSpec((tm, tk), lambda i, k: (i, k)),
                  pl.BlockSpec((tk, N), lambda i, k: (k, 0)),
                  pl.BlockSpec((1, N), lambda i, k: (0, 0)),
                  pl.BlockSpec((tm, N), lambda i, k: (i, 0)),
                  pl.BlockSpec((1, N), lambda i, k: (0, 0)),
                  pl.BlockSpec((1, N), lambda i, k: (0, 0))],
        out_specs=pl.BlockSpec((tm, N), lambda i, k: (i, 0)),
        scratch_shapes=[pltpu.VMEM((tm, N), jnp.float32)],
        compiler_params=pltpu.CompilerParams(
            dimension_semantics=("parallel", "arbitrary"),
            vmem_limit_bytes=_vmem_limit_bytes()),
        cost_estimate=cost,
    )(xp, w, b.reshape(1, N), rp, gamma.reshape(1, N), beta.reshape(1, N))
    return out if pad == 0 else out[:M]


# --------------------------- flash attention kernel ---------------------------

def _flash_attn_body(q_ref, k_ref, v_ref, mask_refs, o_ref, m_sc, l_sc, acc_sc,
                     *, scale, causal):
    """One (b, h, q-tile, kv-tile) step of online-softmax attention.

    q_ref:(tq,hd)  k_ref/v_ref:(tkv,hd)  mask_refs: tuple of (tq,tkv) additive
    masks.  Scratch m/l:(tq,1) f32, acc:(tq,hd) f32 persist over the kv axis.
    """
    kv_idx = pl.program_id(3)

    @pl.when(kv_idx == 0)
    def _():
        m_sc[...] = jnp.full_like(m_sc, -jnp.inf)
        l_sc[...] = jnp.zeros_like(l_sc)
        acc_sc[...] = jnp.zeros_like(acc_sc)

    # Pre-scale q in f32, then feed bf16 to the MXU with f32 accumulation.
    q = (q_ref[...].astype(jnp.float32) * scale).astype(_MXU_DTYPE)
    k = k_ref[...].astype(_MXU_DTYPE)
    s = lax.dot_general(q, k, (((1,), (1,)), ((), ())),
                        preferred_element_type=jnp.float32)          # (tq, tkv)

    for m_ref in mask_refs:                                          # additive masks
        s = s + m_ref[...].astype(jnp.float32)

    if causal:
        tq, tkv = s.shape
        row = pl.program_id(2) * tq + lax.broadcasted_iota(jnp.int32, (tq, tkv), 0)
        col = kv_idx * tkv + lax.broadcasted_iota(jnp.int32, (tq, tkv), 1)
        s = jnp.where(col <= row, s, _NEG_INF)

    m_prev = m_sc[...]
    m_new = jnp.maximum(m_prev, jnp.max(s, axis=-1, keepdims=True))
    alpha = jnp.exp(m_prev - m_new)
    p = jnp.exp(s - m_new)
    l_sc[...] = alpha * l_sc[...] + jnp.sum(p, axis=-1, keepdims=True)
    acc_sc[...] = alpha * acc_sc[...] + jnp.dot(
        p.astype(_MXU_DTYPE), v_ref[...].astype(_MXU_DTYPE),
        preferred_element_type=jnp.float32)
    m_sc[...] = m_new

    @pl.when(kv_idx == pl.num_programs(3) - 1)
    def _():
        # exact division (no approx reciprocal) for reference-grade accuracy
        o_ref[...] = (acc_sc[...] / l_sc[...]).astype(o_ref.dtype)


def _flash_kernel_1mask(q_ref, k_ref, v_ref, m0_ref, o_ref, m_sc, l_sc, acc_sc,
                        *, scale, causal):
    _flash_attn_body(q_ref, k_ref, v_ref, (m0_ref,), o_ref, m_sc, l_sc, acc_sc,
                     scale=scale, causal=causal)


def _flash_kernel_2mask(q_ref, k_ref, v_ref, m0_ref, m1_ref, o_ref, m_sc, l_sc,
                        acc_sc, *, scale, causal):
    _flash_attn_body(q_ref, k_ref, v_ref, (m0_ref, m1_ref), o_ref, m_sc, l_sc,
                     acc_sc, scale=scale, causal=causal)


def flash_attention(q, k, v, masks, scale, causal=False):
    """Flash-style MHA. q:[B,H,T,hd], k/v:[B,H,S,hd], masks: list of [B,T,S]."""
    B, H, T, hd = q.shape
    S = k.shape[2]
    tq = _pick_tile(T, _Q_TILES)
    tkv = _pick_tile(S, _KV_TILES)
    grid = (B, H, T // tq, S // tkv)

    kern = {1: _flash_kernel_1mask, 2: _flash_kernel_2mask}[len(masks)]
    kern = functools.partial(kern, scale=scale, causal=causal)

    q_spec = pl.BlockSpec((None, None, tq, hd), lambda b, h, qi, ki: (b, h, qi, 0))
    kv_spec = pl.BlockSpec((None, None, tkv, hd), lambda b, h, qi, ki: (b, h, ki, 0))
    mask_specs = [pl.BlockSpec((None, tq, tkv), lambda b, h, qi, ki: (b, qi, ki))
                  for _ in masks]

    return pl.pallas_call(
        kern,
        out_shape=jax.ShapeDtypeStruct((B, H, T, hd), q.dtype),
        grid=grid,
        in_specs=[q_spec, kv_spec, kv_spec, *mask_specs],
        out_specs=pl.BlockSpec((None, None, tq, hd),
                               lambda b, h, qi, ki: (b, h, qi, 0)),
        scratch_shapes=[pltpu.VMEM((tq, 1), jnp.float32),   # running max
                        pltpu.VMEM((tq, 1), jnp.float32),   # running denom
                        pltpu.VMEM((tq, hd), jnp.float32)], # running context
        compiler_params=pltpu.CompilerParams(
            dimension_semantics=("parallel", "parallel", "parallel", "arbitrary"),
            vmem_limit_bytes=_vmem_limit_bytes()),
    )(q, k, v, *masks)


# ------------------------------- Decoder block ---------------------------------

def _split_heads(x3d, B, T, H, hd):
    # [B, T, H*hd] -> [B, H, T, hd]   (cheap XLA-side transpose)
    return x3d.reshape(B, T, H, hd).transpose(0, 2, 1, 3)


def _merge_heads(x4d, B, T, D):
    # [B, H, T, hd] -> [B*T, D]
    return x4d.transpose(0, 2, 1, 3).reshape(B * T, D)


def decoder_block_forward(params, x, encoder_output, src_mask, tgt_mask,
                          attn_mask, start_pos, num_heads,
                          assume_causal_tgt_mask=True):
    del start_pos  # TODO(synk): KV-cache / decode-offset semantics undefined.
    B, T, D = x.shape
    S = encoder_output.shape[1]
    H = num_heads
    hd = D // H
    scale = 1.0 / math.sqrt(hd)

    x2d = x.reshape(B * T, D)
    enc2d = encoder_output.reshape(B * S, D)

    # ---------------- masked self-attention ----------------
    qkv = matmul_bias(x2d, params["w_qkv1"], params["b_qkv1"])        # (B*T, 3D)
    qkv = qkv.reshape(B, T, 3, H, hd)
    q = qkv[:, :, 0].transpose(0, 2, 1, 3)                            # (B,H,T,hd)
    k = qkv[:, :, 1].transpose(0, 2, 1, 3)
    v = qkv[:, :, 2].transpose(0, 2, 1, 3)

    if assume_causal_tgt_mask:
        # causal mask regenerated in-kernel via iota; only attn_mask is streamed
        ctx = flash_attention(q, k, v, [attn_mask.astype(jnp.float32)],
                              scale, causal=True)
    else:
        ctx = flash_attention(q, k, v,
                              [tgt_mask.astype(jnp.float32),
                               attn_mask.astype(jnp.float32)],
                              scale, causal=False)
    x1 = matmul_bias_residual_layernorm(_merge_heads(ctx, B, T, D),
                                        params["wo1"], params["bo1"], x2d,
                                        params["ln1_g"], params["ln1_b"])

    # ---------------- cross-attention over the encoder output ----------------
    q2 = matmul_bias(x1, params["wq2"], params["bq2"])                # (B*T, D)
    kv2 = matmul_bias(enc2d, params["w_kv2"], params["b_kv2"])        # (B*S, 2D)
    q2 = _split_heads(q2.reshape(B, T, D), B, T, H, hd)
    kv2 = kv2.reshape(B, S, 2, H, hd)
    k2 = kv2[:, :, 0].transpose(0, 2, 1, 3)                           # (B,H,S,hd)
    v2 = kv2[:, :, 1].transpose(0, 2, 1, 3)

    ctx2 = flash_attention(q2, k2, v2, [src_mask.astype(jnp.float32)],
                           scale, causal=False)
    x2 = matmul_bias_residual_layernorm(_merge_heads(ctx2, B, T, D),
                                        params["wo2"], params["bo2"], x1,
                                        params["ln2_g"], params["ln2_b"])

    # ---------------- feed-forward ----------------
    h_ff = matmul_bias(x2, params["w_ff1"], params["b_ff1"], activation="relu")
    out2d = matmul_bias_residual_layernorm(h_ff, params["w_ff2"], params["b_ff2"],
                                           x2, params["ln3_g"], params["ln3_b"])
    return out2d.reshape(B, T, D)


def decoder_forward(block_params_list, x, encoder_output, src_mask, tgt_mask,
                    attn_mask, start_pos, num_heads,
                    assume_causal_tgt_mask=True):
    # Equivalent of Decoder.forward: sequentially apply each decoder block.
    for params in block_params_list:
        x = decoder_block_forward(params, x, encoder_output, src_mask, tgt_mask,
                                  attn_mask, start_pos, num_heads,
                                  assume_causal_tgt_mask=assume_causal_tgt_mask)
    return x


# ------------------------------ Parameter init ---------------------------------

def init_block_params(key, d_model, d_ff):
    def dense(k, din, dout):
        return (jax.random.normal(k, (din, dout), jnp.float32)
                * (1.0 / math.sqrt(din)))

    keys = jax.random.split(key, 7)
    p = {
        # self-attention: Wq|Wk|Wv concatenated into a single [D, 3D] weight
        "w_qkv1": dense(keys[0], d_model, 3 * d_model),
        "b_qkv1": jnp.zeros((3 * d_model,), jnp.float32),
        "wo1": dense(keys[1], d_model, d_model),
        "bo1": jnp.zeros((d_model,), jnp.float32),
        # cross-attention: separate Q (from x), fused K|V (from encoder output)
        "wq2": dense(keys[2], d_model, d_model),
        "bq2": jnp.zeros((d_model,), jnp.float32),
        "w_kv2": dense(keys[3], d_model, 2 * d_model),
        "b_kv2": jnp.zeros((2 * d_model,), jnp.float32),
        "wo2": dense(keys[4], d_model, d_model),
        "bo2": jnp.zeros((d_model,), jnp.float32),
        # feed-forward
        "w_ff1": dense(keys[5], d_model, d_ff),
        "b_ff1": jnp.zeros((d_ff,), jnp.float32),
        "w_ff2": dense(keys[6], d_ff, d_model),
        "b_ff2": jnp.zeros((d_model,), jnp.float32),
    }
    for name in ("ln1", "ln2", "ln3"):
        p[name + "_g"] = jnp.ones((d_model,), jnp.float32)
        p[name + "_b"] = jnp.zeros((d_model,), jnp.float32)
    return p


# ----------------------------------- main ---------------------------------------

if __name__ == "__main__":
    B, T, S, D, H, F = 2, 8, 8, 32, 4, 64
    n_blocks = 2

    root = jax.random.PRNGKey(0)
    k_x, k_enc, k_blocks = jax.random.split(root, 3)
    x = jax.random.normal(k_x, (B, T, D), jnp.float32)
    encoder_output = jax.random.normal(k_enc, (B, S, D), jnp.float32)

    # Additive masks: causal tgt_mask (also regenerated in-kernel), no-op
    # src/attn masks.
    causal = jnp.where(jnp.tril(jnp.ones((T, T), jnp.bool_)), 0.0, _NEG_INF)
    tgt_mask = jnp.broadcast_to(causal, (B, T, T)).astype(jnp.float32)
    attn_mask = jnp.zeros((B, T, T), jnp.float32)
    src_mask = jnp.zeros((B, T, S), jnp.float32)

    block_params = [init_block_params(k, D, F)
                    for k in jax.random.split(k_blocks, n_blocks)]

    fwd = jax.jit(functools.partial(decoder_forward, num_heads=H),
                  static_argnames=("start_pos",))
    out = fwd(block_params, x, encoder_output, src_mask, tgt_mask,
              attn_mask, start_pos=0)
    jax.block_until_ready(out)

    assert out.shape == (B, T, D), out.shape
    assert jnp.all(jnp.isfinite(out))
    print("KERNEL_OK")
</pallas_src>

<mosaic_0001>
module attributes {stable_mosaic.version = 11 : i64} {
  func.func @_matmul_bias_kernel(%arg0: i32, %arg1: i32, %arg2: i32, %arg3: memref<128x32xf32, #tpu.memory_space<vmem>>, %arg4: memref<32x96xf32, #tpu.memory_space<vmem>>, %arg5: memref<1x96xf32, #tpu.memory_space<vmem>>, %arg6: memref<128x96xf32, #tpu.memory_space<vmem>>, %arg7: memref<128x96xf32, #tpu.memory_space<vmem>>) attributes {dimension_semantics = [#tpu.dimension_semantics<parallel>, #tpu.dimension_semantics<parallel>, #tpu.dimension_semantics<arbitrary>], iteration_bounds = array<i64: 1, 1, 1>, scalar_prefetch = 0 : i64, scratch_operands = 1 : i64, tpu.core_type = #tpu.core_type<tc>, window_params = [{transform_indices = @transform_0, window_bounds = array<i64: 128, 32>}, {transform_indices = @transform_1, window_bounds = array<i64: 32, 96>}, {transform_indices = @transform_2, window_bounds = array<i64: 1, 96>}, {transform_indices = @transform_3, window_bounds = array<i64: 128, 96>}]} {
    %c0_i32 = arith.constant 0 : i32
    %0 = arith.cmpi eq, %arg2, %c0_i32 : i32
    %1 = arith.extui %0 : i1 to i32
    %c0_i32_0 = arith.constant 0 : i32
    %2 = arith.cmpi ne, %1, %c0_i32_0 : i32
    scf.if %2 {
      %cst_10 = arith.constant 0.000000e+00 : f32
      %14 = vector.broadcast %cst_10 : f32 to vector<128x96xf32>
      %c0_11 = arith.constant 0 : index
      %c0_12 = arith.constant 0 : index
      %15 = vector.load %arg7[%c0_11, %c0_12] : memref<128x96xf32, #tpu.memory_space<vmem>>, vector<128x96xf32>
      tpu.vector_store %arg7[%c0_11, %c0_12], %14 {strides = array<i32>} : memref<128x96xf32, #tpu.memory_space<vmem>>, vector<128x96xf32>,
    } else {
    }
    %c0 = arith.constant 0 : index
    %c0_1 = arith.constant 0 : index
    %3 = vector.load %arg7[%c0, %c0_1] : memref<128x96xf32, #tpu.memory_space<vmem>>, vector<128x96xf32>
    %c0_2 = arith.constant 0 : index
    %c0_3 = arith.constant 0 : index
    %4 = vector.load %arg3[%c0_2, %c0_3] : memref<128x32xf32, #tpu.memory_space<vmem>>, vector<128x32xf32>
    %5 = arith.truncf %4 : vector<128x32xf32> to vector<128x32xbf16>
    %c0_4 = arith.constant 0 : index
    %c0_5 = arith.constant 0 : index
    %6 = vector.load %arg4[%c0_4, %c0_5] : memref<32x96xf32, #tpu.memory_space<vmem>>, vector<32x96xf32>
    %7 = arith.truncf %6 : vector<32x96xf32> to vector<32x96xbf16>
    %cst = arith.constant dense<0.000000e+00> : vector<128x96xf32>
    %8 = tpu.matmul %5, %7, %cst {dimension_numbers = #tpu.dot_dimension_numbers<[1], [0], [0], [1], [0, 0, 1, 1], [], []>} : vector<128x32xbf16>, vector<32x96xbf16>, vector<128x96xf32> -> vector<128x96xf32>
    %9 = arith.addf %3, %8 : vector<128x96xf32>
    %c0_6 = arith.constant 0 : index
    %c0_7 = arith.constant 0 : index
    %10 = vector.load %arg7[%c0_6, %c0_7] : memref<128x96xf32, #tpu.memory_space<vmem>>, vector<128x96xf32>
    tpu.vector_store %arg7[%c0_6, %c0_7], %9 {strides = array<i32>} : memref<128x96xf32, #tpu.memory_space<vmem>>, vector<128x96xf32>,
    %c0_i32_8 = arith.constant 0 : i32
    %11 = arith.cmpi eq, %arg2, %c0_i32_8 : i32
    %12 = arith.extui %11 : i1 to i32
    %c0_i32_9 = arith.constant 0 : i32
    %13 = arith.cmpi ne, %12, %c0_i32_9 : i32
    scf.if %13 {
      %c0_10 = arith.constant 0 : index
      %c0_11 = arith.constant 0 : index
      %14 = vector.load %arg7[%c0_10, %c0_11] : memref<128x96xf32, #tpu.memory_space<vmem>>, vector<128x96xf32>
      %c0_12 = arith.constant 0 : index
      %c0_13 = arith.constant 0 : index
      %15 = vector.load %arg5[%c0_12, %c0_13] : memref<1x96xf32, #tpu.memory_space<vmem>>, vector<1x96xf32>
      %16 = vector.broadcast %15 : vector<1x96xf32> to vector<128x96xf32>
      %17 = arith.addf %14, %16 : vector<128x96xf32>
      %c0_14 = arith.constant 0 : index
      %c0_15 = arith.constant 0 : index
      %18 = vector.load %arg6[%c0_14, %c0_15] : memref<128x96xf32, #tpu.memory_space<vmem>>, vector<128x96xf32>
      tpu.vector_store %arg6[%c0_14, %c0_15], %17 {strides = array<i32>} : memref<128x96xf32, #tpu.memory_space<vmem>>, vector<128x96xf32>,
    } else {
    }
    return
  }
  func.func @transform_0(%arg0: i32, %arg1: i32, %arg2: i32) -> (i32, i32) {
    %c0_i32 = arith.constant 0 : i32
    return %arg0, %arg2 : i32, i32
  }
  func.func @transform_1(%arg0: i32, %arg1: i32, %arg2: i32) -> (i32, i32) {
    %c0_i32 = arith.constant 0 : i32
    return %arg2, %arg1 : i32, i32
  }
  func.func @transform_2(%arg0: i32, %arg1: i32, %arg2: i32) -> (i32, i32) {
    %c0_i32 = arith.constant 0 : i32
    %c0_i32_0 = arith.constant 0 : i32
    return %c0_i32, %arg1 : i32, i32
  }
  func.func @transform_3(%arg0: i32, %arg1: i32, %arg2: i32) -> (i32, i32) {
    %c0_i32 = arith.constant 0 : i32
    return %arg0, %arg1 : i32, i32
  }
}

module attributes {stable_mosaic.version = 11 : i64} {
  func.func @_flash_kernel_1mask(%arg0: i32, %arg1: i32, %arg2: i32, %arg3: i32, %arg4: memref<1x1x8x8xf32, #tpu.memory_space<vmem>>, %arg5: memref<1x1x8x8xf32, #tpu.memory_space<vmem>>, %arg6: memref<1x1x8x8xf32, #tpu.memory_space<vmem>>, %arg7: memref<1x8x8xf32, #tpu.memory_space<vmem>>, %arg8: memref<1x1x8x8xf32, #tpu.memory_space<vmem>>, %arg9: memref<8x1xf32, #tpu.memory_space<vmem>>, %arg10: memref<8x1xf32, #tpu.memory_space<vmem>>, %arg11: memref<8x8xf32, #tpu.memory_space<vmem>>) attributes {dimension_semantics = [#tpu.dimension_semantics<parallel>, #tpu.dimension_semantics<parallel>, #tpu.dimension_semantics<parallel>, #tpu.dimension_semantics<arbitrary>], iteration_bounds = array<i64: 2, 4, 1, 1>, scalar_prefetch = 0 : i64, scratch_operands = 3 : i64, tpu.core_type = #tpu.core_type<tc>, window_params = [{transform_indices = @transform_0, window_bounds = array<i64: 1, 1, 8, 8>}, {transform_indices = @transform_1, window_bounds = array<i64: 1, 1, 8, 8>}, {transform_indices = @transform_2, window_bounds = array<i64: 1, 1, 8, 8>}, {transform_indices = @transform_3, window_bounds = array<i64: 1, 8, 8>}, {transform_indices = @transform_4, window_bounds = array<i64: 1, 1, 8, 8>}]} {
    %c0_i32 = arith.constant 0 : i32
    %0 = arith.cmpi eq, %arg3, %c0_i32 : i32
    %1 = arith.extui %0 : i1 to i32
    %c0_i32_0 = arith.constant 0 : i32
    %2 = arith.cmpi ne, %1, %c0_i32_0 : i32
    scf.if %2 {
      %cst_35 = arith.constant 0xFF800000 : f32
      %55 = vector.broadcast %cst_35 : f32 to vector<8x1xf32>
      %c0_36 = arith.constant 0 : index
      %c0_37 = arith.constant 0 : index
      %56 = vector.load %arg9[%c0_36, %c0_37] : memref<8x1xf32, #tpu.memory_space<vmem>>, vector<8x1xf32>
      tpu.vector_store %arg9[%c0_36, %c0_37], %55 {strides = array<i32>} : memref<8x1xf32, #tpu.memory_space<vmem>>, vector<8x1xf32>,
      %cst_38 = arith.constant 0.000000e+00 : f32
      %57 = vector.broadcast %cst_38 : f32 to vector<8x1xf32>
      %c0_39 = arith.constant 0 : index
      %c0_40 = arith.constant 0 : index
      %58 = vector.load %arg10[%c0_39, %c0_40] : memref<8x1xf32, #tpu.memory_space<vmem>>, vector<8x1xf32>
      tpu.vector_store %arg10[%c0_39, %c0_40], %57 {strides = array<i32>} : memref<8x1xf32, #tpu.memory_space<vmem>>, vector<8x1xf32>,
      %cst_41 = arith.constant 0.000000e+00 : f32
      %59 = vector.broadcast %cst_41 : f32 to vector<8x8xf32>
      %c0_42 = arith.constant 0 : index
      %c0_43 = arith.constant 0 : index
      %60 = vector.load %arg11[%c0_42, %c0_43] : memref<8x8xf32, #tpu.memory_space<vmem>>, vector<8x8xf32>
      tpu.vector_store %arg11[%c0_42, %c0_43], %59 {strides = array<i32>} : memref<8x8xf32, #tpu.memory_space<vmem>>, vector<8x8xf32>,
    } else {
    }
    %c0 = arith.constant 0 : index
    %c0_1 = arith.constant 0 : index
    %c0_2 = arith.constant 0 : index
    %c0_3 = arith.constant 0 : index
    %3 = vector.load %arg4[%c0, %c0_1, %c0_2, %c0_3] : memref<1x1x8x8xf32, #tpu.memory_space<vmem>>, vector<1x1x8x8xf32>
    %4 = vector.shape_cast %3 : vector<1x1x8x8xf32> to vector<8x8xf32>
    %cst = arith.constant 0.353553385 : f32
    %5 = vector.broadcast %cst : f32 to vector<8x8xf32>
    %6 = arith.mulf %4, %5 : vector<8x8xf32>
    %7 = arith.truncf %6 : vector<8x8xf32> to vector<8x8xbf16>
    %c0_4 = arith.constant 0 : index
    %c0_5 = arith.constant 0 : index
    %c0_6 = arith.constant 0 : index
    %c0_7 = arith.constant 0 : index
    %8 = vector.load %arg5[%c0_4, %c0_5, %c0_6, %c0_7] : memref<1x1x8x8xf32, #tpu.memory_space<vmem>>, vector<1x1x8x8xf32>
    %9 = vector.shape_cast %8 : vector<1x1x8x8xf32> to vector<8x8xf32>
    %10 = arith.truncf %9 : vector<8x8xf32> to vector<8x8xbf16>
    %cst_8 = arith.constant dense<0.000000e+00> : vector<8x8xf32>
    %11 = tpu.matmul %7, %10, %cst_8 {dimension_numbers = #tpu.dot_dimension_numbers<[1], [1], [0], [0], [0, 0, 1, 0], [], []>} : vector<8x8xbf16>, vector<8x8xbf16>, vector<8x8xf32> -> vector<8x8xf32>
    %c0_9 = arith.constant 0 : index
    %c0_10 = arith.constant 0 : index
    %c0_11 = arith.constant 0 : index
    %12 = vector.load %arg7[%c0_9, %c0_10, %c0_11] : memref<1x8x8xf32, #tpu.memory_space<vmem>>, vector<1x8x8xf32>
    %13 = vector.shape_cast %12 : vector<1x8x8xf32> to vector<8x8xf32>
    %14 = arith.addf %11, %13 : vector<8x8xf32>
    %c8_i32 = arith.constant 8 : i32
    %15 = arith.muli %arg2, %c8_i32 : i32
    %16 = tpu.iota {dimensions = array<i32: 0>} : vector<8x8xi32>
    %17 = vector.broadcast %15 : i32 to vector<8x8xi32>
    %18 = arith.addi %17, %16 : vector<8x8xi32>
    %c8_i32_12 = arith.constant 8 : i32
    %19 = arith.muli %arg3, %c8_i32_12 : i32
    %20 = tpu.iota {dimensions = array<i32: 1>} : vector<8x8xi32>
    %21 = vector.broadcast %19 : i32 to vector<8x8xi32>
    %22 = arith.addi %21, %20 : vector<8x8xi32>
    %23 = arith.cmpi sle, %22, %18 : vector<8x8xi32>
    %cst_13 = arith.constant -1.000000e+09 : f32
    %24 = vector.broadcast %cst_13 : f32 to vector<8x8xf32>
    %25 = arith.select %23, %14, %24 : vector<8x8xi1>, vector<8x8xf32>
    %c0_14 = arith.constant 0 : index
    %c0_15 = arith.constant 0 : index
    %26 = vector.load %arg9[%c0_14, %c0_15] : memref<8x1xf32, #tpu.memory_space<vmem>>, vector<8x1xf32>
    %cst_16 = arith.constant dense<0xFF800000> : vector<8xf32>
    %27 = vector.multi_reduction <maximumf>, %25, %cst_16 [1] : vector<8x8xf32> to vector<8xf32>
    %28 = vector.shape_cast %27 : vector<8xf32> to vector<8x1xf32>
    %29 = arith.maximumf %26, %28 : vector<8x1xf32>
    %30 = arith.subf %26, %29 : vector<8x1xf32>
    %31 = math.exp %30 : vector<8x1xf32>
    %32 = vector.broadcast %29 : vector<8x1xf32> to vector<8x8xf32>
    %33 = arith.subf %25, %32 : vector<8x8xf32>
    %34 = math.exp %33 : vector<8x8xf32>
    %c0_17 = arith.constant 0 : index
    %c0_18 = arith.constant 0 : index
    %35 = vector.load %arg10[%c0_17, %c0_18] : memref<8x1xf32, #tpu.memory_space<vmem>>, vector<8x1xf32>
    %36 = arith.mulf %31, %35 : vector<8x1xf32>
    %cst_19 = arith.constant dense<0.000000e+00> : vector<8xf32>
    %37 = vector.multi_reduction <add>, %34, %cst_19 [1] : vector<8x8xf32> to vector<8xf32>
    %38 = vector.shape_cast %37 : vector<8xf32> to vector<8x1xf32>
    %39 = arith.addf %36, %38 : vector<8x1xf32>
    %c0_20 = arith.constant 0 : index
    %c0_21 = arith.constant 0 : index
    %40 = vector.load %arg10[%c0_20, %c0_21] : memref<8x1xf32, #tpu.memory_space<vmem>>, vector<8x1xf32>
    tpu.vector_store %arg10[%c0_20, %c0_21], %39 {strides = array<i32>} : memref<8x1xf32, #tpu.memory_space<vmem>>, vector<8x1xf32>,
    %c0_22 = arith.constant 0 : index
    %c0_23 = arith.constant 0 : index
    %41 = vector.load %arg11[%c0_22, %c0_23] : memref<8x8xf32, #tpu.memory_space<vmem>>, vector<8x8xf32>
    %42 = vector.broadcast %31 : vector<8x1xf32> to vector<8x8xf32>
    %43 = arith.mulf %42, %41 : vector<8x8xf32>
    %44 = arith.truncf %34 : vector<8x8xf32> to vector<8x8xbf16>
    %c0_24 = arith.constant 0 : index
    %c0_25 = arith.constant 0 : index
    %c0_26 = arith.constant 0 : index
    %c0_27 = arith.constant 0 : index
    %45 = vector.load %arg6[%c0_24, %c0_25, %c0_26, %c0_27] : memref<1x1x8x8xf32, #tpu.memory_space<vmem>>, vector<1x1x8x8xf32>
    %46 = vector.shape_cast %45 : vector<1x1x8x8xf32> to vector<8x8xf32>
    %47 = arith.truncf %46 : vector<8x8xf32> to vector<8x8xbf16>
    %cst_28 = arith.constant dense<0.000000e+00> : vector<8x8xf32>
    %48 = tpu.matmul %44, %47, %cst_28 {dimension_numbers = #tpu.dot_dimension_numbers<[1], [0], [0], [1], [0, 0, 1, 1], [], []>} : vector<8x8xbf16>, vector<8x8xbf16>, vector<8x8xf32> -> vector<8x8xf32>
    %49 = arith.addf %43, %48 : vector<8x8xf32>
    %c0_29 = arith.constant 0 : index
    %c0_30 = arith.constant 0 : index
    %50 = vector.load %arg11[%c0_29, %c0_30] : memref<8x8xf32, #tpu.memory_space<vmem>>, vector<8x8xf32>
    tpu.vector_store %arg11[%c0_29, %c0_30], %49 {strides = array<i32>} : memref<8x8xf32, #tpu.memory_space<vmem>>, vector<8x8xf32>,
    %c0_31 = arith.constant 0 : index
    %c0_32 = arith.constant 0 : index
    %51 = vector.load %arg9[%c0_31, %c0_32] : memref<8x1xf32, #tpu.memory_space<vmem>>, vector<8x1xf32>
    tpu.vector_store %arg9[%c0_31, %c0_32], %29 {strides = array<i32>} : memref<8x1xf32, #tpu.memory_space<vmem>>, vector<8x1xf32>,
    %c0_i32_33 = arith.constant 0 : i32
    %52 = arith.cmpi eq, %arg3, %c0_i32_33 : i32
    %53 = arith.extui %52 : i1 to i32
    %c0_i32_34 = arith.constant 0 : i32
    %54 = arith.cmpi ne, %53, %c0_i32_34 : i32
    scf.if %54 {
      %c0_35 = arith.constant 0 : index
      %c0_36 = arith.constant 0 : index
      %55 = vector.load %arg11[%c0_35, %c0_36] : memref<8x8xf32, #tpu.memory_space<vmem>>, vector<8x8xf32>
      %c0_37 = arith.constant 0 : index
      %c0_38 = arith.constant 0 : index
      %56 = vector.load %arg10[%c0_37, %c0_38] : memref<8x1xf32, #tpu.memory_space<vmem>>, vector<8x1xf32>
      %57 = vector.broadcast %56 : vector<8x1xf32> to vector<8x8xf32>
      %58 = arith.divf %55, %57 : vector<8x8xf32>
      %c0_39 = arith.constant 0 : index
      %c0_40 = arith.constant 0 : index
      %c0_41 = arith.constant 0 : index
      %c0_42 = arith.constant 0 : index
      %59 = vector.load %arg8[%c0_39, %c0_40, %c0_41, %c0_42] : memref<1x1x8x8xf32, #tpu.memory_space<vmem>>, vector<1x1x8x8xf32>
      %60 = vector.shape_cast %59 : vector<1x1x8x8xf32> to vector<8x8xf32>
      %61 = vector.shape_cast %58 : vector<8x8xf32> to vector<1x1x8x8xf32>
      tpu.vector_store %arg8[%c0_39, %c0_40, %c0_41, %c0_42], %61 {strides = array<i32>} : memref<1x1x8x8xf32, #tpu.memory_space<vmem>>, vector<1x1x8x8xf32>,
    } else {
    }
    return
  }
  func.func @transform_0(%arg0: i32, %arg1: i32, %arg2: i32, %arg3: i32) -> (i32, i32, i32, i32) {
    %c0_i32 = arith.constant 0 : i32
    %c0_i32_0 = arith.constant 0 : i32
    return %arg0, %arg1, %arg2, %c0_i32 : i32, i32, i32, i32
  }
  func.func @transform_1(%arg0: i32, %arg1: i32, %arg2: i32, %arg3: i32) -> (i32, i32, i32, i32) {
    %c0_i32 = arith.constant 0 : i32
    %c0_i32_0 = arith.constant 0 : i32
    return %arg0, %arg1, %arg3, %c0_i32 : i32, i32, i32, i32
  }
  func.func @transform_2(%arg0: i32, %arg1: i32, %arg2: i32, %arg3: i32) -> (i32, i32, i32, i32) {
    %c0_i32 = arith.constant 0 : i32
    %c0_i32_0 = arith.constant 0 : i32
    return %arg0, %arg1, %arg3, %c0_i32 : i32, i32, i32, i32
  }
  func.func @transform_3(%arg0: i32, %arg1: i32, %arg2: i32, %arg3: i32) -> (i32, i32, i32) {
    %c0_i32 = arith.constant 0 : i32
    return %arg0, %arg2, %arg3 : i32, i32, i32
  }
  func.func @transform_4(%arg0: i32, %arg1: i32, %arg2: i32, %arg3: i32) -> (i32, i32, i32, i32) {
    %c0_i32 = arith.constant 0 : i32
    %c0_i32_0 = arith.constant 0 : i32
    return %arg0, %arg1, %arg2, %c0_i32 : i32, i32, i32, i32
  }
}

module attributes {stable_mosaic.version = 11 : i64} {
  func.func @_matmul_bias_res_ln_kernel(%arg0: i32, %arg1: i32, %arg2: memref<128x32xf32, #tpu.memory_space<vmem>>, %arg3: memref<32x32xf32, #tpu.memory_space<vmem>>, %arg4: memref<1x32xf32, #tpu.memory_space<vmem>>, %arg5: memref<128x32xf32, #tpu.memory_space<vmem>>, %arg6: memref<1x32xf32, #tpu.memory_space<vmem>>, %arg7: memref<1x32xf32, #tpu.memory_space<vmem>>, %arg8: memref<128x32xf32, #tpu.memory_space<vmem>>, %arg9: memref<128x32xf32, #tpu.memory_space<vmem>>) attributes {dimension_semantics = [#tpu.dimension_semantics<parallel>, #tpu.dimension_semantics<arbitrary>], iteration_bounds = array<i64: 1, 1>, scalar_prefetch = 0 : i64, scratch_operands = 1 : i64, tpu.core_type = #tpu.core_type<tc>, window_params = [{transform_indices = @transform_0, window_bounds = array<i64: 128, 32>}, {transform_indices = @transform_1, window_bounds = array<i64: 32, 32>}, {pipeline_mode = #tpu.pipeline_mode<synchronous>, transform_indices = @transform_2, window_bounds = array<i64: 1, 32>}, {transform_indices = @transform_3, window_bounds = array<i64: 128, 32>}, {pipeline_mode = #tpu.pipeline_mode<synchronous>, transform_indices = @transform_4, window_bounds = array<i64: 1, 32>}, {pipeline_mode = #tpu.pipeline_mode<synchronous>, transform_indices = @transform_5, window_bounds = array<i64: 1, 32>}, {transform_indices = @transform_6, window_bounds = array<i64: 128, 32>}]} {
    %c0_i32 = arith.constant 0 : i32
    %0 = arith.cmpi eq, %arg1, %c0_i32 : i32
    %1 = arith.extui %0 : i1 to i32
    %c0_i32_0 = arith.constant 0 : i32
    %2 = arith.cmpi ne, %1, %c0_i32_0 : i32
    scf.if %2 {
      %cst_10 = arith.constant 0.000000e+00 : f32
      %14 = vector.broadcast %cst_10 : f32 to vector<128x32xf32>
      %c0_11 = arith.constant 0 : index
      %c0_12 = arith.constant 0 : index
      %15 = vector.load %arg9[%c0_11, %c0_12] : memref<128x32xf32, #tpu.memory_space<vmem>>, vector<128x32xf32>
      tpu.vector_store %arg9[%c0_11, %c0_12], %14 {strides = array<i32>} : memref<128x32xf32, #tpu.memory_space<vmem>>, vector<128x32xf32>,
    } else {
    }
    %c0 = arith.constant 0 : index
    %c0_1 = arith.constant 0 : index
    %3 = vector.load %arg9[%c0, %c0_1] : memref<128x32xf32, #tpu.memory_space<vmem>>, vector<128x32xf32>
    %c0_2 = arith.constant 0 : index
    %c0_3 = arith.constant 0 : index
    %4 = vector.load %arg2[%c0_2, %c0_3] : memref<128x32xf32, #tpu.memory_space<vmem>>, vector<128x32xf32>
    %5 = arith.truncf %4 : vector<128x32xf32> to vector<128x32xbf16>
    %c0_4 = arith.constant 0 : index
    %c0_5 = arith.constant 0 : index
    %6 = vector.load %arg3[%c0_4, %c0_5] : memref<32x32xf32, #tpu.memory_space<vmem>>, vector<32x32xf32>
    %7 = arith.truncf %6 : vector<32x32xf32> to vector<32x32xbf16>
    %cst = arith.constant dense<0.000000e+00> : vector<128x32xf32>
    %8 = tpu.matmul %5, %7, %cst {dimension_numbers = #tpu.dot_dimension_numbers<[1], [0], [0], [1], [0, 0, 1, 1], [], []>} : vector<128x32xbf16>, vector<32x32xbf16>, vector<128x32xf32> -> vector<128x32xf32>
    %9 = arith.addf %3, %8 : vector<128x32xf32>
    %c0_6 = arith.constant 0 : index
    %c0_7 = arith.constant 0 : index
    %10 = vector.load %arg9[%c0_6, %c0_7] : memref<128x32xf32, #tpu.memory_space<vmem>>, vector<128x32xf32>
    tpu.vector_store %arg9[%c0_6, %c0_7], %9 {strides = array<i32>} : memref<128x32xf32, #tpu.memory_space<vmem>>, vector<128x32xf32>,
    %c0_i32_8 = arith.constant 0 : i32
    %11 = arith.cmpi eq, %arg1, %c0_i32_8 : i32
    %12 = arith.extui %11 : i1 to i32
    %c0_i32_9 = arith.constant 0 : i32
    %13 = arith.cmpi ne, %12, %c0_i32_9 : i32
    scf.if %13 {
      %c0_10 = arith.constant 0 : index
      %c0_11 = arith.constant 0 : index
      %14 = vector.load %arg9[%c0_10, %c0_11] : memref<128x32xf32, #tpu.memory_space<vmem>>, vector<128x32xf32>
      %c0_12 = arith.constant 0 : index
      %c0_13 = arith.constant 0 : index
      %15 = vector.load %arg4[%c0_12, %c0_13] : memref<1x32xf32, #tpu.memory_space<vmem>>, vector<1x32xf32>
      %16 = vector.broadcast %15 : vector<1x32xf32> to vector<128x32xf32>
      %17 = arith.addf %14, %16 : vector<128x32xf32>
      %c0_14 = arith.constant 0 : index
      %c0_15 = arith.constant 0 : index
      %18 = vector.load %arg5[%c0_14, %c0_15] : memref<128x32xf32, #tpu.memory_space<vmem>>, vector<128x32xf32>
      %19 = arith.addf %17, %18 : vector<128x32xf32>
      %cst_16 = arith.constant dense<0.000000e+00> : vector<128xf32>
      %20 = vector.multi_reduction <add>, %19, %cst_16 [1] : vector<128x32xf32> to vector<128xf32>
      %21 = vector.shape_cast %20 : vector<128xf32> to vector<128x1xf32>
      %cst_17 = arith.constant 3.200000e+01 : f32
      %22 = vector.broadcast %cst_17 : f32 to vector<128x1xf32>
      %23 = arith.divf %21, %22 : vector<128x1xf32>
      %24 = vector.broadcast %23 : vector<128x1xf32> to vector<128x32xf32>
      %25 = arith.subf %19, %24 : vector<128x32xf32>
      %26 = arith.mulf %25, %25 : vector<128x32xf32>
      %cst_18 = arith.constant dense<0.000000e+00> : vector<128xf32>
      %27 = vector.multi_reduction <add>, %26, %cst_18 [1] : vector<128x32xf32> to vector<128xf32>
      %28 = vector.shape_cast %27 : vector<128xf32> to vector<128x1xf32>
      %cst_19 = arith.constant 3.200000e+01 : f32
      %29 = vector.broadcast %cst_19 : f32 to vector<128x1xf32>
      %30 = arith.divf %28, %29 : vector<128x1xf32>
      %31 = vector.broadcast %23 : vector<128x1xf32> to vector<128x32xf32>
      %32 = arith.subf %19, %31 : vector<128x32xf32>
      %cst_20 = arith.constant 9.99999974E-6 : f32
      %33 = vector.broadcast %cst_20 : f32 to vector<128x1xf32>
      %34 = arith.addf %30, %33 : vector<128x1xf32>
      %35 = math.rsqrt %34 : vector<128x1xf32>
      %36 = vector.broadcast %35 : vector<128x1xf32> to vector<128x32xf32>
      %37 = arith.mulf %32, %36 : vector<128x32xf32>
      %c0_21 = arith.constant 0 : index
      %c0_22 = arith.constant 0 : index
      %38 = vector.load %arg6[%c0_21, %c0_22] : memref<1x32xf32, #tpu.memory_space<vmem>>, vector<1x32xf32>
      %39 = vector.broadcast %38 : vector<1x32xf32> to vector<128x32xf32>
      %40 = arith.mulf %37, %39 : vector<128x32xf32>
      %c0_23 = arith.constant 0 : index
      %c0_24 = arith.constant 0 : index
      %41 = vector.load %arg7[%c0_23, %c0_24] : memref<1x32xf32, #tpu.memory_space<vmem>>, vector<1x32xf32>
      %42 = vector.broadcast %41 : vector<1x32xf32> to vector<128x32xf32>
      %43 = arith.addf %40, %42 : vector<128x32xf32>
      %c0_25 = arith.constant 0 : index
      %c0_26 = arith.constant 0 : index
      %44 = vector.load %arg8[%c0_25, %c0_26] : memref<128x32xf32, #tpu.memory_space<vmem>>, vector<128x32xf32>
      tpu.vector_store %arg8[%c0_25, %c0_26], %43 {strides = array<i32>} : memref<128x32xf32, #tpu.memory_space<vmem>>, vector<128x32xf32>,
    } else {
    }
    return
  }
  func.func @transform_0(%arg0: i32, %arg1: i32) -> (i32, i32) {
    %c0_i32 = arith.constant 0 : i32
    return %arg0, %arg1 : i32, i32
  }
  func.func @transform_1(%arg0: i32, %arg1: i32) -> (i32, i32) {
    %c0_i32 = arith.constant 0 : i32
    %c0_i32_0 = arith.constant 0 : i32
    return %arg1, %c0_i32 : i32, i32
  }
  func.func @transform_2(%arg0: i32, %arg1: i32) -> (i32, i32) {
    %c0_i32 = arith.constant 0 : i32
    %c0_i32_0 = arith.constant 0 : i32
    %c0_i32_1 = arith.constant 0 : i32
    return %c0_i32, %c0_i32_0 : i32, i32
  }
  func.func @transform_3(%arg0: i32, %arg1: i32) -> (i32, i32) {
    %c0_i32 = arith.constant 0 : i32
    %c0_i32_0 = arith.constant 0 : i32
    return %arg0, %c0_i32 : i32, i32
  }
  func.func @transform_4(%arg0: i32, %arg1: i32) -> (i32, i32) {
    %c0_i32 = arith.constant 0 : i32
    %c0_i32_0 = arith.constant 0 : i32
    %c0_i32_1 = arith.constant 0 : i32
    return %c0_i32, %c0_i32_0 : i32, i32
  }
  func.func @transform_5(%arg0: i32, %arg1: i32) -> (i32, i32) {
    %c0_i32 = arith.constant 0 : i32
    %c0_i32_0 = arith.constant 0 : i32
    %c0_i32_1 = arith.constant 0 : i32
    return %c0_i32, %c0_i32_0 : i32, i32
  }
  func.func @transform_6(%arg0: i32, %arg1: i32) -> (i32, i32) {
    %c0_i32 = arith.constant 0 : i32
    %c0_i32_0 = arith.constant 0 : i32
    return %arg0, %c0_i32 : i32, i32
  }
}

module attributes {stable_mosaic.version = 11 : i64} {
  func.func @_matmul_bias_kernel(%arg0: i32, %arg1: i32, %arg2: i32, %arg3: memref<128x32xf32, #tpu.memory_space<vmem>>, %arg4: memref<32x32xf32, #tpu.memory_space<vmem>>, %arg5: memref<1x32xf32, #tpu.memory_space<vmem>>, %arg6: memref<128x32xf32, #tpu.memory_space<vmem>>, %arg7: memref<128x32xf32, #tpu.memory_space<vmem>>) attributes {dimension_semantics = [#tpu.dimension_semantics<parallel>, #tpu.dimension_semantics<parallel>, #tpu.dimension_semantics<arbitrary>], iteration_bounds = array<i64: 1, 1, 1>, scalar_prefetch = 0 : i64, scratch_operands = 1 : i64, tpu.core_type = #tpu.core_type<tc>, window_params = [{transform_indices = @transform_0, window_bounds = array<i64: 128, 32>}, {transform_indices = @transform_1, window_bounds = array<i64: 32, 32>}, {transform_indices = @transform_2, window_bounds = array<i64: 1, 32>}, {transform_indices = @transform_3, window_bounds = array<i64: 128, 32>}]} {
    %c0_i32 = arith.constant 0 : i32
    %0 = arith.cmpi eq, %arg2, %c0_i32 : i32
    %1 = arith.extui %0 : i1 to i32
    %c0_i32_0 = arith.constant 0 : i32
    %2 = arith.cmpi ne, %1, %c0_i32_0 : i32
    scf.if %2 {
      %cst_10 = arith.constant 0.000000e+00 : f32
      %14 = vector.broadcast %cst_10 : f32 to vector<128x32xf32>
      %c0_11 = arith.constant 0 : index
      %c0_12 = arith.constant 0 : index
      %15 = vector.load %arg7[%c0_11, %c0_12] : memref<128x32xf32, #tpu.memory_space<vmem>>, vector<128x32xf32>
      tpu.vector_store %arg7[%c0_11, %c0_12], %14 {strides = array<i32>} : memref<128x32xf32, #tpu.memory_space<vmem>>, vector<128x32xf32>,
    } else {
    }
    %c0 = arith.constant 0 : index
    %c0_1 = arith.constant 0 : index
    %3 = vector.load %arg7[%c0, %c0_1] : memref<128x32xf32, #tpu.memory_space<vmem>>, vector<128x32xf32>
    %c0_2 = arith.constant 0 : index
    %c0_3 = arith.constant 0 : index
    %4 = vector.load %arg3[%c0_2, %c0_3] : memref<128x32xf32, #tpu.memory_space<vmem>>, vector<128x32xf32>
    %5 = arith.truncf %4 : vector<128x32xf32> to vector<128x32xbf16>
    %c0_4 = arith.constant 0 : index
    %c0_5 = arith.constant 0 : index
    %6 = vector.load %arg4[%c0_4, %c0_5] : memref<32x32xf32, #tpu.memory_space<vmem>>, vector<32x32xf32>
    %7 = arith.truncf %6 : vector<32x32xf32> to vector<32x32xbf16>
    %cst = arith.constant dense<0.000000e+00> : vector<128x32xf32>
    %8 = tpu.matmul %5, %7, %cst {dimension_numbers = #tpu.dot_dimension_numbers<[1], [0], [0], [1], [0, 0, 1, 1], [], []>} : vector<128x32xbf16>, vector<32x32xbf16>, vector<128x32xf32> -> vector<128x32xf32>
    %9 = arith.addf %3, %8 : vector<128x32xf32>
    %c0_6 = arith.constant 0 : index
    %c0_7 = arith.constant 0 : index
    %10 = vector.load %arg7[%c0_6, %c0_7] : memref<128x32xf32, #tpu.memory_space<vmem>>, vector<128x32xf32>
    tpu.vector_store %arg7[%c0_6, %c0_7], %9 {strides = array<i32>} : memref<128x32xf32, #tpu.memory_space<vmem>>, vector<128x32xf32>,
    %c0_i32_8 = arith.constant 0 : i32
    %11 = arith.cmpi eq, %arg2, %c0_i32_8 : i32
    %12 = arith.extui %11 : i1 to i32
    %c0_i32_9 = arith.constant 0 : i32
    %13 = arith.cmpi ne, %12, %c0_i32_9 : i32
    scf.if %13 {
      %c0_10 = arith.constant 0 : index
      %c0_11 = arith.constant 0 : index
      %14 = vector.load %arg7[%c0_10, %c0_11] : memref<128x32xf32, #tpu.memory_space<vmem>>, vector<128x32xf32>
      %c0_12 = arith.constant 0 : index
      %c0_13 = arith.constant 0 : index
      %15 = vector.load %arg5[%c0_12, %c0_13] : memref<1x32xf32, #tpu.memory_space<vmem>>, vector<1x32xf32>
      %16 = vector.broadcast %15 : vector<1x32xf32> to vector<128x32xf32>
      %17 = arith.addf %14, %16 : vector<128x32xf32>
      %c0_14 = arith.constant 0 : index
      %c0_15 = arith.constant 0 : index
      %18 = vector.load %arg6[%c0_14, %c0_15] : memref<128x32xf32, #tpu.memory_space<vmem>>, vector<128x32xf32>
      tpu.vector_store %arg6[%c0_14, %c0_15], %17 {strides = array<i32>} : memref<128x32xf32, #tpu.memory_space<vmem>>, vector<128x32xf32>,
    } else {
    }
    return
  }
  func.func @transform_0(%arg0: i32, %arg1: i32, %arg2: i32) -> (i32, i32) {
    %c0_i32 = arith.constant 0 : i32
    return %arg0, %arg2 : i32, i32
  }
  func.func @transform_1(%arg0: i32, %arg1: i32, %arg2: i32) -> (i32, i32) {
    %c0_i32 = arith.constant 0 : i32
    return %arg2, %arg1 : i32, i32
  }
  func.func @transform_2(%arg0: i32, %arg1: i32, %arg2: i32) -> (i32, i32) {
    %c0_i32 = arith.constant 0 : i32
    %c0_i32_0 = arith.constant 0 : i32
    return %c0_i32, %arg1 : i32, i32
  }
  func.func @transform_3(%arg0: i32, %arg1: i32, %arg2: i32) -> (i32, i32) {
    %c0_i32 = arith.constant 0 : i32
    return %arg0, %arg1 : i32, i32
  }
}

module attributes {stable_mosaic.version = 11 : i64} {
  func.func @_matmul_bias_kernel(%arg0: i32, %arg1: i32, %arg2: i32, %arg3: memref<128x32xf32, #tpu.memory_space<vmem>>, %arg4: memref<32x64xf32, #tpu.memory_space<vmem>>, %arg5: memref<1x64xf32, #tpu.memory_space<vmem>>, %arg6: memref<128x64xf32, #tpu.memory_space<vmem>>, %arg7: memref<128x64xf32, #tpu.memory_space<vmem>>) attributes {dimension_semantics = [#tpu.dimension_semantics<parallel>, #tpu.dimension_semantics<parallel>, #tpu.dimension_semantics<arbitrary>], iteration_bounds = array<i64: 1, 1, 1>, scalar_prefetch = 0 : i64, scratch_operands = 1 : i64, tpu.core_type = #tpu.core_type<tc>, window_params = [{transform_indices = @transform_0, window_bounds = array<i64: 128, 32>}, {transform_indices = @transform_1, window_bounds = array<i64: 32, 64>}, {transform_indices = @transform_2, window_bounds = array<i64: 1, 64>}, {transform_indices = @transform_3, window_bounds = array<i64: 128, 64>}]} {
    %c0_i32 = arith.constant 0 : i32
    %0 = arith.cmpi eq, %arg2, %c0_i32 : i32
    %1 = arith.extui %0 : i1 to i32
    %c0_i32_0 = arith.constant 0 : i32
    %2 = arith.cmpi ne, %1, %c0_i32_0 : i32
    scf.if %2 {
      %cst_10 = arith.constant 0.000000e+00 : f32
      %14 = vector.broadcast %cst_10 : f32 to vector<128x64xf32>
      %c0_11 = arith.constant 0 : index
      %c0_12 = arith.constant 0 : index
      %15 = vector.load %arg7[%c0_11, %c0_12] : memref<128x64xf32, #tpu.memory_space<vmem>>, vector<128x64xf32>
      tpu.vector_store %arg7[%c0_11, %c0_12], %14 {strides = array<i32>} : memref<128x64xf32, #tpu.memory_space<vmem>>, vector<128x64xf32>,
    } else {
    }
    %c0 = arith.constant 0 : index
    %c0_1 = arith.constant 0 : index
    %3 = vector.load %arg7[%c0, %c0_1] : memref<128x64xf32, #tpu.memory_space<vmem>>, vector<128x64xf32>
    %c0_2 = arith.constant 0 : index
    %c0_3 = arith.constant 0 : index
    %4 = vector.load %arg3[%c0_2, %c0_3] : memref<128x32xf32, #tpu.memory_space<vmem>>, vector<128x32xf32>
    %5 = arith.truncf %4 : vector<128x32xf32> to vector<128x32xbf16>
    %c0_4 = arith.constant 0 : index
    %c0_5 = arith.constant 0 : index
    %6 = vector.load %arg4[%c0_4, %c0_5] : memref<32x64xf32, #tpu.memory_space<vmem>>, vector<32x64xf32>
    %7 = arith.truncf %6 : vector<32x64xf32> to vector<32x64xbf16>
    %cst = arith.constant dense<0.000000e+00> : vector<128x64xf32>
    %8 = tpu.matmul %5, %7, %cst {dimension_numbers = #tpu.dot_dimension_numbers<[1], [0], [0], [1], [0, 0, 1, 1], [], []>} : vector<128x32xbf16>, vector<32x64xbf16>, vector<128x64xf32> -> vector<128x64xf32>
    %9 = arith.addf %3, %8 : vector<128x64xf32>
    %c0_6 = arith.constant 0 : index
    %c0_7 = arith.constant 0 : index
    %10 = vector.load %arg7[%c0_6, %c0_7] : memref<128x64xf32, #tpu.memory_space<vmem>>, vector<128x64xf32>
    tpu.vector_store %arg7[%c0_6, %c0_7], %9 {strides = array<i32>} : memref<128x64xf32, #tpu.memory_space<vmem>>, vector<128x64xf32>,
    %c0_i32_8 = arith.constant 0 : i32
    %11 = arith.cmpi eq, %arg2, %c0_i32_8 : i32
    %12 = arith.extui %11 : i1 to i32
    %c0_i32_9 = arith.constant 0 : i32
    %13 = arith.cmpi ne, %12, %c0_i32_9 : i32
    scf.if %13 {
      %c0_10 = arith.constant 0 : index
      %c0_11 = arith.constant 0 : index
      %14 = vector.load %arg7[%c0_10, %c0_11] : memref<128x64xf32, #tpu.memory_space<vmem>>, vector<128x64xf32>
      %c0_12 = arith.constant 0 : index
      %c0_13 = arith.constant 0 : index
      %15 = vector.load %arg5[%c0_12, %c0_13] : memref<1x64xf32, #tpu.memory_space<vmem>>, vector<1x64xf32>
      %16 = vector.broadcast %15 : vector<1x64xf32> to vector<128x64xf32>
      %17 = arith.addf %14, %16 : vector<128x64xf32>
      %c0_14 = arith.constant 0 : index
      %c0_15 = arith.constant 0 : index
      %18 = vector.load %arg6[%c0_14, %c0_15] : memref<128x64xf32, #tpu.memory_space<vmem>>, vector<128x64xf32>
      tpu.vector_store %arg6[%c0_14, %c0_15], %17 {strides = array<i32>} : memref<128x64xf32, #tpu.memory_space<vmem>>, vector<128x64xf32>,
    } else {
    }
    return
  }
  func.func @transform_0(%arg0: i32, %arg1: i32, %arg2: i32) -> (i32, i32) {
    %c0_i32 = arith.constant 0 : i32
    return %arg0, %arg2 : i32, i32
  }
  func.func @transform_1(%arg0: i32, %arg1: i32, %arg2: i32) -> (i32, i32) {
    %c0_i32 = arith.constant 0 : i32
    return %arg2, %arg1 : i32, i32
  }
  func.func @transform_2(%arg0: i32, %arg1: i32, %arg2: i32) -> (i32, i32) {
    %c0_i32 = arith.constant 0 : i32
    %c0_i32_0 = arith.constant 0 : i32
    return %c0_i32, %arg1 : i32, i32
  }
  func.func @transform_3(%arg0: i32, %arg1: i32, %arg2: i32) -> (i32, i32) {
    %c0_i32 = arith.constant 0 : i32
    return %arg0, %arg1 : i32, i32
  }
}

module attributes {stable_mosaic.version = 11 : i64} {
  func.func @_matmul_bias_kernel(%arg0: i32, %arg1: i32, %arg2: i32, %arg3: memref<128x32xf32, #tpu.memory_space<vmem>>, %arg4: memref<32x64xf32, #tpu.memory_space<vmem>>, %arg5: memref<1x64xf32, #tpu.memory_space<vmem>>, %arg6: memref<128x64xf32, #tpu.memory_space<vmem>>, %arg7: memref<128x64xf32, #tpu.memory_space<vmem>>) attributes {dimension_semantics = [#tpu.dimension_semantics<parallel>, #tpu.dimension_semantics<parallel>, #tpu.dimension_semantics<arbitrary>], iteration_bounds = array<i64: 1, 1, 1>, scalar_prefetch = 0 : i64, scratch_operands = 1 : i64, tpu.core_type = #tpu.core_type<tc>, window_params = [{transform_indices = @transform_0, window_bounds = array<i64: 128, 32>}, {transform_indices = @transform_1, window_bounds = array<i64: 32, 64>}, {transform_indices = @transform_2, window_bounds = array<i64: 1, 64>}, {transform_indices = @transform_3, window_bounds = array<i64: 128, 64>}]} {
    %c0_i32 = arith.constant 0 : i32
    %0 = arith.cmpi eq, %arg2, %c0_i32 : i32
    %1 = arith.extui %0 : i1 to i32
    %c0_i32_0 = arith.constant 0 : i32
    %2 = arith.cmpi ne, %1, %c0_i32_0 : i32
    scf.if %2 {
      %cst_10 = arith.constant 0.000000e+00 : f32
      %14 = vector.broadcast %cst_10 : f32 to vector<128x64xf32>
      %c0_11 = arith.constant 0 : index
      %c0_12 = arith.constant 0 : index
      %15 = vector.load %arg7[%c0_11, %c0_12] : memref<128x64xf32, #tpu.memory_space<vmem>>, vector<128x64xf32>
      tpu.vector_store %arg7[%c0_11, %c0_12], %14 {strides = array<i32>} : memref<128x64xf32, #tpu.memory_space<vmem>>, vector<128x64xf32>,
    } else {
    }
    %c0 = arith.constant 0 : index
    %c0_1 = arith.constant 0 : index
    %3 = vector.load %arg7[%c0, %c0_1] : memref<128x64xf32, #tpu.memory_space<vmem>>, vector<128x64xf32>
    %c0_2 = arith.constant 0 : index
    %c0_3 = arith.constant 0 : index
    %4 = vector.load %arg3[%c0_2, %c0_3] : memref<128x32xf32, #tpu.memory_space<vmem>>, vector<128x32xf32>
    %5 = arith.truncf %4 : vector<128x32xf32> to vector<128x32xbf16>
    %c0_4 = arith.constant 0 : index
    %c0_5 = arith.constant 0 : index
    %6 = vector.load %arg4[%c0_4, %c0_5] : memref<32x64xf32, #tpu.memory_space<vmem>>, vector<32x64xf32>
    %7 = arith.truncf %6 : vector<32x64xf32> to vector<32x64xbf16>
    %cst = arith.constant dense<0.000000e+00> : vector<128x64xf32>
    %8 = tpu.matmul %5, %7, %cst {dimension_numbers = #tpu.dot_dimension_numbers<[1], [0], [0], [1], [0, 0, 1, 1], [], []>} : vector<128x32xbf16>, vector<32x64xbf16>, vector<128x64xf32> -> vector<128x64xf32>
    %9 = arith.addf %3, %8 : vector<128x64xf32>
    %c0_6 = arith.constant 0 : index
    %c0_7 = arith.constant 0 : index
    %10 = vector.load %arg7[%c0_6, %c0_7] : memref<128x64xf32, #tpu.memory_space<vmem>>, vector<128x64xf32>
    tpu.vector_store %arg7[%c0_6, %c0_7], %9 {strides = array<i32>} : memref<128x64xf32, #tpu.memory_space<vmem>>, vector<128x64xf32>,
    %c0_i32_8 = arith.constant 0 : i32
    %11 = arith.cmpi eq, %arg2, %c0_i32_8 : i32
    %12 = arith.extui %11 : i1 to i32
    %c0_i32_9 = arith.constant 0 : i32
    %13 = arith.cmpi ne, %12, %c0_i32_9 : i32
    scf.if %13 {
      %c0_10 = arith.constant 0 : index
      %c0_11 = arith.constant 0 : index
      %14 = vector.load %arg7[%c0_10, %c0_11] : memref<128x64xf32, #tpu.memory_space<vmem>>, vector<128x64xf32>
      %c0_12 = arith.constant 0 : index
      %c0_13 = arith.constant 0 : index
      %15 = vector.load %arg5[%c0_12, %c0_13] : memref<1x64xf32, #tpu.memory_space<vmem>>, vector<1x64xf32>
      %16 = vector.broadcast %15 : vector<1x64xf32> to vector<128x64xf32>
      %17 = arith.addf %14, %16 : vector<128x64xf32>
      %cst_14 = arith.constant 0.000000e+00 : f32
      %18 = vector.broadcast %cst_14 : f32 to vector<128x64xf32>
      %19 = arith.maximumf %17, %18 : vector<128x64xf32>
      %c0_15 = arith.constant 0 : index
      %c0_16 = arith.constant 0 : index
      %20 = vector.load %arg6[%c0_15, %c0_16] : memref<128x64xf32, #tpu.memory_space<vmem>>, vector<128x64xf32>
      tpu.vector_store %arg6[%c0_15, %c0_16], %19 {strides = array<i32>} : memref<128x64xf32, #tpu.memory_space<vmem>>, vector<128x64xf32>,
    } else {
    }
    return
  }
  func.func @transform_0(%arg0: i32, %arg1: i32, %arg2: i32) -> (i32, i32) {
    %c0_i32 = arith.constant 0 : i32
    return %arg0, %arg2 : i32, i32
  }
  func.func @transform_1(%arg0: i32, %arg1: i32, %arg2: i32) -> (i32, i32) {
    %c0_i32 = arith.constant 0 : i32
    return %arg2, %arg1 : i32, i32
  }
  func.func @transform_2(%arg0: i32, %arg1: i32, %arg2: i32) -> (i32, i32) {
    %c0_i32 = arith.constant 0 : i32
    %c0_i32_0 = arith.constant 0 : i32
    return %c0_i32, %arg1 : i32, i32
  }
  func.func @transform_3(%arg0: i32, %arg1: i32, %arg2: i32) -> (i32, i32) {
    %c0_i32 = arith.constant 0 : i32
    return %arg0, %arg1 : i32, i32
  }
}

module attributes {stable_mosaic.version = 11 : i64} {
  func.func @_flash_kernel_1mask(%arg0: i32, %arg1: i32, %arg2: i32, %arg3: i32, %arg4: memref<1x1x8x8xf32, #tpu.memory_space<vmem>>, %arg5: memref<1x1x8x8xf32, #tpu.memory_space<vmem>>, %arg6: memref<1x1x8x8xf32, #tpu.memory_space<vmem>>, %arg7: memref<1x8x8xf32, #tpu.memory_space<vmem>>, %arg8: memref<1x1x8x8xf32, #tpu.memory_space<vmem>>, %arg9: memref<8x1xf32, #tpu.memory_space<vmem>>, %arg10: memref<8x1xf32, #tpu.memory_space<vmem>>, %arg11: memref<8x8xf32, #tpu.memory_space<vmem>>) attributes {dimension_semantics = [#tpu.dimension_semantics<parallel>, #tpu.dimension_semantics<parallel>, #tpu.dimension_semantics<parallel>, #tpu.dimension_semantics<arbitrary>], iteration_bounds = array<i64: 2, 4, 1, 1>, scalar_prefetch = 0 : i64, scratch_operands = 3 : i64, tpu.core_type = #tpu.core_type<tc>, window_params = [{transform_indices = @transform_0, window_bounds = array<i64: 1, 1, 8, 8>}, {transform_indices = @transform_1, window_bounds = array<i64: 1, 1, 8, 8>}, {transform_indices = @transform_2, window_bounds = array<i64: 1, 1, 8, 8>}, {transform_indices = @transform_3, window_bounds = array<i64: 1, 8, 8>}, {transform_indices = @transform_4, window_bounds = array<i64: 1, 1, 8, 8>}]} {
    %c0_i32 = arith.constant 0 : i32
    %0 = arith.cmpi eq, %arg3, %c0_i32 : i32
    %1 = arith.extui %0 : i1 to i32
    %c0_i32_0 = arith.constant 0 : i32
    %2 = arith.cmpi ne, %1, %c0_i32_0 : i32
    scf.if %2 {
      %cst_33 = arith.constant 0xFF800000 : f32
      %44 = vector.broadcast %cst_33 : f32 to vector<8x1xf32>
      %c0_34 = arith.constant 0 : index
      %c0_35 = arith.constant 0 : index
      %45 = vector.load %arg9[%c0_34, %c0_35] : memref<8x1xf32, #tpu.memory_space<vmem>>, vector<8x1xf32>
      tpu.vector_store %arg9[%c0_34, %c0_35], %44 {strides = array<i32>} : memref<8x1xf32, #tpu.memory_space<vmem>>, vector<8x1xf32>,
      %cst_36 = arith.constant 0.000000e+00 : f32
      %46 = vector.broadcast %cst_36 : f32 to vector<8x1xf32>
      %c0_37 = arith.constant 0 : index
      %c0_38 = arith.constant 0 : index
      %47 = vector.load %arg10[%c0_37, %c0_38] : memref<8x1xf32, #tpu.memory_space<vmem>>, vector<8x1xf32>
      tpu.vector_store %arg10[%c0_37, %c0_38], %46 {strides = array<i32>} : memref<8x1xf32, #tpu.memory_space<vmem>>, vector<8x1xf32>,
      %cst_39 = arith.constant 0.000000e+00 : f32
      %48 = vector.broadcast %cst_39 : f32 to vector<8x8xf32>
      %c0_40 = arith.constant 0 : index
      %c0_41 = arith.constant 0 : index
      %49 = vector.load %arg11[%c0_40, %c0_41] : memref<8x8xf32, #tpu.memory_space<vmem>>, vector<8x8xf32>
      tpu.vector_store %arg11[%c0_40, %c0_41], %48 {strides = array<i32>} : memref<8x8xf32, #tpu.memory_space<vmem>>, vector<8x8xf32>,
    } else {
    }
    %c0 = arith.constant 0 : index
    %c0_1 = arith.constant 0 : index
    %c0_2 = arith.constant 0 : index
    %c0_3 = arith.constant 0 : index
    %3 = vector.load %arg4[%c0, %c0_1, %c0_2, %c0_3] : memref<1x1x8x8xf32, #tpu.memory_space<vmem>>, vector<1x1x8x8xf32>
    %4 = vector.shape_cast %3 : vector<1x1x8x8xf32> to vector<8x8xf32>
    %cst = arith.constant 0.353553385 : f32
    %5 = vector.broadcast %cst : f32 to vector<8x8xf32>
    %6 = arith.mulf %4, %5 : vector<8x8xf32>
    %7 = arith.truncf %6 : vector<8x8xf32> to vector<8x8xbf16>
    %c0_4 = arith.constant 0 : index
    %c0_5 = arith.constant 0 : index
    %c0_6 = arith.constant 0 : index
    %c0_7 = arith.constant 0 : index
    %8 = vector.load %arg5[%c0_4, %c0_5, %c0_6, %c0_7] : memref<1x1x8x8xf32, #tpu.memory_space<vmem>>, vector<1x1x8x8xf32>
    %9 = vector.shape_cast %8 : vector<1x1x8x8xf32> to vector<8x8xf32>
    %10 = arith.truncf %9 : vector<8x8xf32> to vector<8x8xbf16>
    %cst_8 = arith.constant dense<0.000000e+00> : vector<8x8xf32>
    %11 = tpu.matmul %7, %10, %cst_8 {dimension_numbers = #tpu.dot_dimension_numbers<[1], [1], [0], [0], [0, 0, 1, 0], [], []>} : vector<8x8xbf16>, vector<8x8xbf16>, vector<8x8xf32> -> vector<8x8xf32>
    %c0_9 = arith.constant 0 : index
    %c0_10 = arith.constant 0 : index
    %c0_11 = arith.constant 0 : index
    %12 = vector.load %arg7[%c0_9, %c0_10, %c0_11] : memref<1x8x8xf32, #tpu.memory_space<vmem>>, vector<1x8x8xf32>
    %13 = vector.shape_cast %12 : vector<1x8x8xf32> to vector<8x8xf32>
    %14 = arith.addf %11, %13 : vector<8x8xf32>
    %c0_12 = arith.constant 0 : index
    %c0_13 = arith.constant 0 : index
    %15 = vector.load %arg9[%c0_12, %c0_13] : memref<8x1xf32, #tpu.memory_space<vmem>>, vector<8x1xf32>
    %cst_14 = arith.constant dense<0xFF800000> : vector<8xf32>
    %16 = vector.multi_reduction <maximumf>, %14, %cst_14 [1] : vector<8x8xf32> to vector<8xf32>
    %17 = vector.shape_cast %16 : vector<8xf32> to vector<8x1xf32>
    %18 = arith.maximumf %15, %17 : vector<8x1xf32>
    %19 = arith.subf %15, %18 : vector<8x1xf32>
    %20 = math.exp %19 : vector<8x1xf32>
    %21 = vector.broadcast %18 : vector<8x1xf32> to vector<8x8xf32>
    %22 = arith.subf %14, %21 : vector<8x8xf32>
    %23 = math.exp %22 : vector<8x8xf32>
    %c0_15 = arith.constant 0 : index
    %c0_16 = arith.constant 0 : index
    %24 = vector.load %arg10[%c0_15, %c0_16] : memref<8x1xf32, #tpu.memory_space<vmem>>, vector<8x1xf32>
    %25 = arith.mulf %20, %24 : vector<8x1xf32>
    %cst_17 = arith.constant dense<0.000000e+00> : vector<8xf32>
    %26 = vector.multi_reduction <add>, %23, %cst_17 [1] : vector<8x8xf32> to vector<8xf32>
    %27 = vector.shape_cast %26 : vector<8xf32> to vector<8x1xf32>
    %28 = arith.addf %25, %27 : vector<8x1xf32>
    %c0_18 = arith.constant 0 : index
    %c0_19 = arith.constant 0 : index
    %29 = vector.load %arg10[%c0_18, %c0_19] : memref<8x1xf32, #tpu.memory_space<vmem>>, vector<8x1xf32>
    tpu.vector_store %arg10[%c0_18, %c0_19], %28 {strides = array<i32>} : memref<8x1xf32, #tpu.memory_space<vmem>>, vector<8x1xf32>,
    %c0_20 = arith.constant 0 : index
    %c0_21 = arith.constant 0 : index
    %30 = vector.load %arg11[%c0_20, %c0_21] : memref<8x8xf32, #tpu.memory_space<vmem>>, vector<8x8xf32>
    %31 = vector.broadcast %20 : vector<8x1xf32> to vector<8x8xf32>
    %32 = arith.mulf %31, %30 : vector<8x8xf32>
    %33 = arith.truncf %23 : vector<8x8xf32> to vector<8x8xbf16>
    %c0_22 = arith.constant 0 : index
    %c0_23 = arith.constant 0 : index
    %c0_24 = arith.constant 0 : index
    %c0_25 = arith.constant 0 : index
    %34 = vector.load %arg6[%c0_22, %c0_23, %c0_24, %c0_25] : memref<1x1x8x8xf32, #tpu.memory_space<vmem>>, vector<1x1x8x8xf32>
    %35 = vector.shape_cast %34 : vector<1x1x8x8xf32> to vector<8x8xf32>
    %36 = arith.truncf %35 : vector<8x8xf32> to vector<8x8xbf16>
    %cst_26 = arith.constant dense<0.000000e+00> : vector<8x8xf32>
    %37 = tpu.matmul %33, %36, %cst_26 {dimension_numbers = #tpu.dot_dimension_numbers<[1], [0], [0], [1], [0, 0, 1, 1], [], []>} : vector<8x8xbf16>, vector<8x8xbf16>, vector<8x8xf32> -> vector<8x8xf32>
    %38 = arith.addf %32, %37 : vector<8x8xf32>
    %c0_27 = arith.constant 0 : index
    %c0_28 = arith.constant 0 : index
    %39 = vector.load %arg11[%c0_27, %c0_28] : memref<8x8xf32, #tpu.memory_space<vmem>>, vector<8x8xf32>
    tpu.vector_store %arg11[%c0_27, %c0_28], %38 {strides = array<i32>} : memref<8x8xf32, #tpu.memory_space<vmem>>, vector<8x8xf32>,
    %c0_29 = arith.constant 0 : index
    %c0_30 = arith.constant 0 : index
    %40 = vector.load %arg9[%c0_29, %c0_30] : memref<8x1xf32, #tpu.memory_space<vmem>>, vector<8x1xf32>
    tpu.vector_store %arg9[%c0_29, %c0_30], %18 {strides = array<i32>} : memref<8x1xf32, #tpu.memory_space<vmem>>, vector<8x1xf32>,
    %c0_i32_31 = arith.constant 0 : i32
    %41 = arith.cmpi eq, %arg3, %c0_i32_31 : i32
    %42 = arith.extui %41 : i1 to i32
    %c0_i32_32 = arith.constant 0 : i32
    %43 = arith.cmpi ne, %42, %c0_i32_32 : i32
    scf.if %43 {
      %c0_33 = arith.constant 0 : index
      %c0_34 = arith.constant 0 : index
      %44 = vector.load %arg11[%c0_33, %c0_34] : memref<8x8xf32, #tpu.memory_space<vmem>>, vector<8x8xf32>
      %c0_35 = arith.constant 0 : index
      %c0_36 = arith.constant 0 : index
      %45 = vector.load %arg10[%c0_35, %c0_36] : memref<8x1xf32, #tpu.memory_space<vmem>>, vector<8x1xf32>
      %46 = vector.broadcast %45 : vector<8x1xf32> to vector<8x8xf32>
      %47 = arith.divf %44, %46 : vector<8x8xf32>
      %c0_37 = arith.constant 0 : index
      %c0_38 = arith.constant 0 : index
      %c0_39 = arith.constant 0 : index
      %c0_40 = arith.constant 0 : index
      %48 = vector.load %arg8[%c0_37, %c0_38, %c0_39, %c0_40] : memref<1x1x8x8xf32, #tpu.memory_space<vmem>>, vector<1x1x8x8xf32>
      %49 = vector.shape_cast %48 : vector<1x1x8x8xf32> to vector<8x8xf32>
      %50 = vector.shape_cast %47 : vector<8x8xf32> to vector<1x1x8x8xf32>
      tpu.vector_store %arg8[%c0_37, %c0_38, %c0_39, %c0_40], %50 {strides = array<i32>} : memref<1x1x8x8xf32, #tpu.memory_space<vmem>>, vector<1x1x8x8xf32>,
    } else {
    }
    return
  }
  func.func @transform_0(%arg0: i32, %arg1: i32, %arg2: i32, %arg3: i32) -> (i32, i32, i32, i32) {
    %c0_i32 = arith.constant 0 : i32
    %c0_i32_0 = arith.constant 0 : i32
    return %arg0, %arg1, %arg2, %c0_i32 : i32, i32, i32, i32
  }
  func.func @transform_1(%arg0: i32, %arg1: i32, %arg2: i32, %arg3: i32) -> (i32, i32, i32, i32) {
    %c0_i32 = arith.constant 0 : i32
    %c0_i32_0 = arith.constant 0 : i32
    return %arg0, %arg1, %arg3, %c0_i32 : i32, i32, i32, i32
  }
  func.func @transform_2(%arg0: i32, %arg1: i32, %arg2: i32, %arg3: i32) -> (i32, i32, i32, i32) {
    %c0_i32 = arith.constant 0 : i32
    %c0_i32_0 = arith.constant 0 : i32
    return %arg0, %arg1, %arg3, %c0_i32 : i32, i32, i32, i32
  }
  func.func @transform_3(%arg0: i32, %arg1: i32, %arg2: i32, %arg3: i32) -> (i32, i32, i32) {
    %c0_i32 = arith.constant 0 : i32
    return %arg0, %arg2, %arg3 : i32, i32, i32
  }
  func.func @transform_4(%arg0: i32, %arg1: i32, %arg2: i32, %arg3: i32) -> (i32, i32, i32, i32) {
    %c0_i32 = arith.constant 0 : i32
    %c0_i32_0 = arith.constant 0 : i32
    return %arg0, %arg1, %arg2, %c0_i32 : i32, i32, i32, i32
  }
}

module attributes {stable_mosaic.version = 11 : i64} {
  func.func @_matmul_bias_res_ln_kernel(%arg0: i32, %arg1: i32, %arg2: memref<128x64xf32, #tpu.memory_space<vmem>>, %arg3: memref<64x32xf32, #tpu.memory_space<vmem>>, %arg4: memref<1x32xf32, #tpu.memory_space<vmem>>, %arg5: memref<128x32xf32, #tpu.memory_space<vmem>>, %arg6: memref<1x32xf32, #tpu.memory_space<vmem>>, %arg7: memref<1x32xf32, #tpu.memory_space<vmem>>, %arg8: memref<128x32xf32, #tpu.memory_space<vmem>>, %arg9: memref<128x32xf32, #tpu.memory_space<vmem>>) attributes {dimension_semantics = [#tpu.dimension_semantics<parallel>, #tpu.dimension_semantics<arbitrary>], iteration_bounds = array<i64: 1, 1>, scalar_prefetch = 0 : i64, scratch_operands = 1 : i64, tpu.core_type = #tpu.core_type<tc>, window_params = [{transform_indices = @transform_0, window_bounds = array<i64: 128, 64>}, {transform_indices = @transform_1, window_bounds = array<i64: 64, 32>}, {pipeline_mode = #tpu.pipeline_mode<synchronous>, transform_indices = @transform_2, window_bounds = array<i64: 1, 32>}, {transform_indices = @transform_3, window_bounds = array<i64: 128, 32>}, {pipeline_mode = #tpu.pipeline_mode<synchronous>, transform_indices = @transform_4, window_bounds = array<i64: 1, 32>}, {pipeline_mode = #tpu.pipeline_mode<synchronous>, transform_indices = @transform_5, window_bounds = array<i64: 1, 32>}, {transform_indices = @transform_6, window_bounds = array<i64: 128, 32>}]} {
    %c0_i32 = arith.constant 0 : i32
    %0 = arith.cmpi eq, %arg1, %c0_i32 : i32
    %1 = arith.extui %0 : i1 to i32
    %c0_i32_0 = arith.constant 0 : i32
    %2 = arith.cmpi ne, %1, %c0_i32_0 : i32
    scf.if %2 {
      %cst_10 = arith.constant 0.000000e+00 : f32
      %14 = vector.broadcast %cst_10 : f32 to vector<128x32xf32>
      %c0_11 = arith.constant 0 : index
      %c0_12 = arith.constant 0 : index
      %15 = vector.load %arg9[%c0_11, %c0_12] : memref<128x32xf32, #tpu.memory_space<vmem>>, vector<128x32xf32>
      tpu.vector_store %arg9[%c0_11, %c0_12], %14 {strides = array<i32>} : memref<128x32xf32, #tpu.memory_space<vmem>>, vector<128x32xf32>,
    } else {
    }
    %c0 = arith.constant 0 : index
    %c0_1 = arith.constant 0 : index
    %3 = vector.load %arg9[%c0, %c0_1] : memref<128x32xf32, #tpu.memory_space<vmem>>, vector<128x32xf32>
    %c0_2 = arith.constant 0 : index
    %c0_3 = arith.constant 0 : index
    %4 = vector.load %arg2[%c0_2, %c0_3] : memref<128x64xf32, #tpu.memory_space<vmem>>, vector<128x64xf32>
    %5 = arith.truncf %4 : vector<128x64xf32> to vector<128x64xbf16>
    %c0_4 = arith.constant 0 : index
    %c0_5 = arith.constant 0 : index
    %6 = vector.load %arg3[%c0_4, %c0_5] : memref<64x32xf32, #tpu.memory_space<vmem>>, vector<64x32xf32>
    %7 = arith.truncf %6 : vector<64x32xf32> to vector<64x32xbf16>
    %cst = arith.constant dense<0.000000e+00> : vector<128x32xf32>
    %8 = tpu.matmul %5, %7, %cst {dimension_numbers = #tpu.dot_dimension_numbers<[1], [0], [0], [1], [0, 0, 1, 1], [], []>} : vector<128x64xbf16>, vector<64x32xbf16>, vector<128x32xf32> -> vector<128x32xf32>
    %9 = arith.addf %3, %8 : vector<128x32xf32>
    %c0_6 = arith.constant 0 : index
    %c0_7 = arith.constant 0 : index
    %10 = vector.load %arg9[%c0_6, %c0_7] : memref<128x32xf32, #tpu.memory_space<vmem>>, vector<128x32xf32>
    tpu.vector_store %arg9[%c0_6, %c0_7], %9 {strides = array<i32>} : memref<128x32xf32, #tpu.memory_space<vmem>>, vector<128x32xf32>,
    %c0_i32_8 = arith.constant 0 : i32
    %11 = arith.cmpi eq, %arg1, %c0_i32_8 : i32
    %12 = arith.extui %11 : i1 to i32
    %c0_i32_9 = arith.constant 0 : i32
    %13 = arith.cmpi ne, %12, %c0_i32_9 : i32
    scf.if %13 {
      %c0_10 = arith.constant 0 : index
      %c0_11 = arith.constant 0 : index
      %14 = vector.load %arg9[%c0_10, %c0_11] : memref<128x32xf32, #tpu.memory_space<vmem>>, vector<128x32xf32>
      %c0_12 = arith.constant 0 : index
      %c0_13 = arith.constant 0 : index
      %15 = vector.load %arg4[%c0_12, %c0_13] : memref<1x32xf32, #tpu.memory_space<vmem>>, vector<1x32xf32>
      %16 = vector.broadcast %15 : vector<1x32xf32> to vector<128x32xf32>
      %17 = arith.addf %14, %16 : vector<128x32xf32>
      %c0_14 = arith.constant 0 : index
      %c0_15 = arith.constant 0 : index
      %18 = vector.load %arg5[%c0_14, %c0_15] : memref<128x32xf32, #tpu.memory_space<vmem>>, vector<128x32xf32>
      %19 = arith.addf %17, %18 : vector<128x32xf32>
      %cst_16 = arith.constant dense<0.000000e+00> : vector<128xf32>
      %20 = vector.multi_reduction <add>, %19, %cst_16 [1] : vector<128x32xf32> to vector<128xf32>
      %21 = vector.shape_cast %20 : vector<128xf32> to vector<128x1xf32>
      %cst_17 = arith.constant 3.200000e+01 : f32
      %22 = vector.broadcast %cst_17 : f32 to vector<128x1xf32>
      %23 = arith.divf %21, %22 : vector<128x1xf32>
      %24 = vector.broadcast %23 : vector<128x1xf32> to vector<128x32xf32>
      %25 = arith.subf %19, %24 : vector<128x32xf32>
      %26 = arith.mulf %25, %25 : vector<128x32xf32>
      %cst_18 = arith.constant dense<0.000000e+00> : vector<128xf32>
      %27 = vector.multi_reduction <add>, %26, %cst_18 [1] : vector<128x32xf32> to vector<128xf32>
      %28 = vector.shape_cast %27 : vector<128xf32> to vector<128x1xf32>
      %cst_19 = arith.constant 3.200000e+01 : f32
      %29 = vector.broadcast %cst_19 : f32 to vector<128x1xf32>
      %30 = arith.divf %28, %29 : vector<128x1xf32>
      %31 = vector.broadcast %23 : vector<128x1xf32> to vector<128x32xf32>
      %32 = arith.subf %19, %31 : vector<128x32xf32>
      %cst_20 = arith.constant 9.99999974E-6 : f32
      %33 = vector.broadcast %cst_20 : f32 to vector<128x1xf32>
      %34 = arith.addf %30, %33 : vector<128x1xf32>
      %35 = math.rsqrt %34 : vector<128x1xf32>
      %36 = vector.broadcast %35 : vector<128x1xf32> to vector<128x32xf32>
      %37 = arith.mulf %32, %36 : vector<128x32xf32>
      %c0_21 = arith.constant 0 : index
      %c0_22 = arith.constant 0 : index
      %38 = vector.load %arg6[%c0_21, %c0_22] : memref<1x32xf32, #tpu.memory_space<vmem>>, vector<1x32xf32>
      %39 = vector.broadcast %38 : vector<1x32xf32> to vector<128x32xf32>
      %40 = arith.mulf %37, %39 : vector<128x32xf32>
      %c0_23 = arith.constant 0 : index
      %c0_24 = arith.constant 0 : index
      %41 = vector.load %arg7[%c0_23, %c0_24] : memref<1x32xf32, #tpu.memory_space<vmem>>, vector<1x32xf32>
      %42 = vector.broadcast %41 : vector<1x32xf32> to vector<128x32xf32>
      %43 = arith.addf %40, %42 : vector<128x32xf32>
      %c0_25 = arith.constant 0 : index
      %c0_26 = arith.constant 0 : index
      %44 = vector.load %arg8[%c0_25, %c0_26] : memref<128x32xf32, #tpu.memory_space<vmem>>, vector<128x32xf32>
      tpu.vector_store %arg8[%c0_25, %c0_26], %43 {strides = array<i32>} : memref<128x32xf32, #tpu.memory_space<vmem>>, vector<128x32xf32>,
    } else {
    }
    return
  }
  func.func @transform_0(%arg0: i32, %arg1: i32) -> (i32, i32) {
    %c0_i32 = arith.constant 0 : i32
    return %arg0, %arg1 : i32, i32
  }
  func.func @transform_1(%arg0: i32, %arg1: i32) -> (i32, i32) {
    %c0_i32 = arith.constant 0 : i32
    %c0_i32_0 = arith.constant 0 : i32
    return %arg1, %c0_i32 : i32, i32
  }
  func.func @transform_2(%arg0: i32, %arg1: i32) -> (i32, i32) {
    %c0_i32 = arith.constant 0 : i32
    %c0_i32_0 = arith.constant 0 : i32
    %c0_i32_1 = arith.constant 0 : i32
    return %c0_i32, %c0_i32_0 : i32, i32
  }
  func.func @transform_3(%arg0: i32, %arg1: i32) -> (i32, i32) {
    %c0_i32 = arith.constant 0 : i32
    %c0_i32_0 = arith.constant 0 : i32
    return %arg0, %c0_i32 : i32, i32
  }
  func.func @transform_4(%arg0: i32, %arg1: i32) -> (i32, i32) {
    %c0_i32 = arith.constant 0 : i32
    %c0_i32_0 = arith.constant 0 : i32
    %c0_i32_1 = arith.constant 0 : i32
    return %c0_i32, %c0_i32_0 : i32, i32
  }
  func.func @transform_5(%arg0: i32, %arg1: i32) -> (i32, i32) {
    %c0_i32 = arith.constant 0 : i32
    %c0_i32_0 = arith.constant 0 : i32
    %c0_i32_1 = arith.constant 0 : i32
    return %c0_i32, %c0_i32_0 : i32, i32
  }
  func.func @transform_6(%arg0: i32, %arg1: i32) -> (i32, i32) {
    %c0_i32 = arith.constant 0 : i32
    %c0_i32_0 = arith.constant 0 : i32
    return %arg0, %c0_i32 : i32, i32
  }
}

</mosaic_0001>

<bundles_post_ra>
// kernel: decoder_forward.18
= control target key start
LH: loop header
LB: loop body
LE: loop exit
PB: predicated region body
PF: predicated region fallthrough
CT: control target
= control target key end

     0   :  { %vm19_vm0 = vcmask 785408   ;;  %v343_v3 = vmov 0.0   ;;  %vm82_vm1 = vcmask 261120   ;;  %s549_s1 = inlined_call_operand.vmem [shape: f32[32,96], index: 1, kind: input, shape index: {}]   ;;  %s550_s0 = inlined_call_operand.vmem [shape: f32[128,32], index: 0, kind: input, shape index: {}]   ;;  %s551_s2 = inlined_call_operand.vmem [shape: f32[1,96], index: 2, kind: input, shape index: {}]   ;;  %s552_s3 = inlined_call_operand.vmem [shape: f32[128,96], index: 3, kind: output, shape index: {}]  }
   0x1   :  { %v76_v0 = vld [vmem:[%s549_s1] sm:$0xff]  ;;  %v77_v1 = vld [vmem:[%s549_s1 + $0x8] sm:$0xff]  ;;  %v78_v2 = vld [vmem:[%s549_s1 + $0x10] sm:$0xff]  ;;  %22 = vst.msk [vmem:[#allocation2 + $0x10] sm:$0xff] %vm19_vm0, %v343_v3 }
   0x2   :  { %20 = vst.msk [vmem:[#allocation2] sm:$0xff] %vm19_vm0, %v343_v3  ;;  %21 = vst.msk [vmem:[#allocation2 + $0x8] sm:$0xff] %vm19_vm0, %v343_v3  ;;  %v80_v4 = vpack.c.bf16 %v77_v1, %v76_v0  ;;  %v79_v5 = vld [vmem:[%s549_s1 + $0x18] sm:$0xff]  ;;  %v52_v6 = vld [vmem:[%s550_s0] sm:$0xff] }
   0x3   :  { %23 = vst.msk [vmem:[#allocation2 + $0x18] sm:$0xff] %vm19_vm0, %v343_v3  ;;  %24 = vst.msk [vmem:[#allocation2 + $0x20] sm:$0xff] %vm19_vm0, %v343_v3  ;;  %v53_v7 = vld [vmem:[%s550_s0 + $0x8] sm:$0xff]  ;;  %v81_v8 = vpack.c.bf16 %v79_v5, %v78_v2  ;;  %v60_v10 = vld [vmem:[%s550_s0 + $0x40] sm:$0xff] }
   0x4   :  { %25 = vst.msk [vmem:[#allocation2 + $0x28] sm:$0xff] %vm19_vm0, %v343_v3  ;;  %26 = vst.msk [vmem:[#allocation2 + $0x30] sm:$0xff] %vm19_vm0, %v343_v3  ;;  %v68_v9 = vpack.c.bf16 %v53_v7, %v52_v6  ;;  %v61_v11 = vld [vmem:[%s550_s0 + $0x48] sm:$0xff]  ;;  %318 = vmatprep.subr.bf16.mxu0 %v80_v4  ;;  %338 = vmatprep.subr.bf16.mxu1 %v80_v4  ;;  %v54_v13 = vld [vmem:[%s550_s0 + $0x10] sm:$0xff] }
   0x5   :  { %27 = vst.msk [vmem:[#allocation2 + $0x38] sm:$0xff] %vm19_vm0, %v343_v3  ;;  %28 = vst.msk [vmem:[#allocation2 + $0x40] sm:$0xff] %vm19_vm0, %v343_v3  ;;  %v72_v12 = vpack.c.bf16 %v61_v11, %v60_v10  ;;  %v55_v14 = vld [vmem:[%s550_s0 + $0x18] sm:$0xff]  ;;  %319 = vmatpush3.bf16.msra.mxu0 %v80_v4  ;;  %340 = vmatpush3.bf16.msra.mxu1 %v80_v4  ;;  %v62_v15 = vld [vmem:[%s550_s0 + $0x50] sm:$0xff] }
   0x6   :  { %29 = vst.msk [vmem:[#allocation2 + $0x48] sm:$0xff] %vm19_vm0, %v343_v3  ;;  %30 = vst.msk [vmem:[#allocation2 + $0x50] sm:$0xff] %vm19_vm0, %v343_v3  ;;  %v63_v16 = vld [vmem:[%s550_s0 + $0x58] sm:$0xff]  ;;  %v56_v17 = vld [vmem:[%s550_s0 + $0x20] sm:$0xff]  ;;  %320 = vmatprep.subr.bf16.mxu0 %v81_v8  ;;  %339 = vmatprep.subr.bf16.mxu1 %v81_v8  ;;  %v69_v21 = vpack.c.bf16 %v55_v14, %v54_v13 }
   0x7   :  { %31 = vst.msk [vmem:[#allocation2 + $0x58] sm:$0xff] %vm19_vm0, %v343_v3  ;;  %32 = vst.msk [vmem:[#allocation2 + $0x60] sm:$0xff] %vm19_vm0, %v343_v3  ;;  %v57_v18 = vld [vmem:[%s550_s0 + $0x28] sm:$0xff]  ;;  %v64_v19 = vld [vmem:[%s550_s0 + $0x60] sm:$0xff]  ;;  %322 = vmatprep.mubr.msk.bf16.mxu0 %vm82_vm1, %v68_v9  ;;  %330 = vmatprep.mubr.msk.bf16.mxu1 %vm82_vm1, %v72_v12  ;;  %v73_v22 = vpack.c.bf16 %v63_v16, %v62_v15 }
   0x8   :  { %33 = vst.msk [vmem:[#allocation2 + $0x68] sm:$0xff] %vm19_vm0, %v343_v3  ;;  %34 = vst.msk [vmem:[#allocation2 + $0x70] sm:$0xff] %vm19_vm0, %v343_v3  ;;  %v65_v20 = vld [vmem:[%s550_s0 + $0x68] sm:$0xff]  ;;  %v70_v23 = vpack.c.bf16 %v57_v18, %v56_v17  ;;  %v58_v25 = vld [vmem:[%s550_s0 + $0x30] sm:$0xff] }
   0x9   :  { %35 = vst.msk [vmem:[#allocation2 + $0x78] sm:$0xff] %vm19_vm0, %v343_v3  ;;  %321 = vmatpush3.bf16.msra.mxu0 %v81_v8  ;;  %341 = vmatpush3.bf16.msra.mxu1 %v81_v8  ;;  %v74_v24 = vpack.c.bf16 %v65_v20, %v64_v19  ;;  %v59_v26 = vld [vmem:[%s550_s0 + $0x38] sm:$0xff]  ;;  %v66_v27 = vld [vmem:[%s550_s0 + $0x70] sm:$0xff]  ;;  %v36_v33 = vld [vmem:[#allocation2] sm:$0xff] }
   0xa   :  { %v67_v28 = vld [vmem:[%s550_s0 + $0x78] sm:$0xff]  ;;  %v71_v29 = vpack.c.bf16 %v59_v26, %v58_v25  ;;  %v38_v31 = vld [vmem:[#allocation2 + $0x10] sm:$0xff]  ;;  %v37_v43 = vld [vmem:[#allocation2 + $0x8] sm:$0xff] }
   0xb   :  { %v75_v30 = vpack.c.bf16 %v67_v28, %v66_v27  ;;  %v39_v37 = vld [vmem:[#allocation2 + $0x18] sm:$0xff]  ;;  %v42_v55 = vld [vmem:[#allocation2 + $0x30] sm:$0xff]  ;;  %v40_v57 = vld [vmem:[#allocation2 + $0x20] sm:$0xff] }
   0xc   :  { %323 = vmatmul.mubr.msk.bf16.vlgmr.msra.gmra.mrb[0].mxu0 %vm82_vm1, %v69_v21  ;;  %331 = vmatmul.mubr.msk.bf16.vlgmr.msra.gmra.mrb[0].mxu1 %vm82_vm1, %v73_v22  ;;  %v44_v34 = vld [vmem:[#allocation2 + $0x40] sm:$0xff]  ;;  %v43_v62 = vld [vmem:[#allocation2 + $0x38] sm:$0xff]  ;;  %v41_v4 = vld [vmem:[#allocation2 + $0x28] sm:$0xff] }
   0xd   :  { %326 = vmatprep.mubr.msk.bf16.mxu0 %vm82_vm1, %v70_v23  ;;  %334 = vmatprep.mubr.msk.bf16.mxu1 %vm82_vm1, %v74_v24  ;;  %v46_v32 = vld [vmem:[#allocation2 + $0x50] sm:$0xff]  ;;  %v45_v44 = vld [vmem:[#allocation2 + $0x48] sm:$0xff]  ;;  %v459_v59 = vld [vmem:[%s551_s2] ss:$0 sm:$0xff] }
   0xe   :  { %v47_v38 = vld [vmem:[#allocation2 + $0x58] sm:$0xff]  ;;  %v48_v58 = vld [vmem:[#allocation2 + $0x60] sm:$0xff] }
   0xf   :  { %v50_v56 = vld [vmem:[#allocation2 + $0x70] sm:$0xff]  ;;  %v49_v5 = vld [vmem:[#allocation2 + $0x68] sm:$0xff] }
  0x10   :  { %v51_v63 = vld [vmem:[#allocation2 + $0x78] sm:$0xff] }
  0x14   :  { %327 = vmatmul.mubr.msk.bf16.gmra.mrb[4].mxu0 %vm82_vm1, %v71_v29  ;;  %335 = vmatmul.mubr.msk.bf16.gmra.mrb[4].mxu1 %vm82_vm1, %v75_v30 }
  0xdf   :  { %v324_v35 = vpop.f32.mrb[0].mxu0  ;;  %v332_v36 = vpop.f32.mrb[0].mxu1 }
  0xe0   :  { %v206_v39 = vadd.f32 %v324_v35, %v38_v31  ;;  %v214_v40 = vadd.f32 %v332_v36, %v46_v32  ;;  %v141_v41 = vpop.f32.mrb[1].mxu0  ;;  %v173_v42 = vpop.f32.mrb[1].mxu1 }
  0xe1   :  { %v204_v45 = vadd.f32 %v141_v41, %v36_v33  ;;  %v212_v46 = vadd.f32 %v173_v42, %v44_v34  ;;  %v325_v47 = vpop.f32.mrb[2].mxu0  ;;  %v333_v48 = vpop.f32.mrb[2].mxu1 }
  0xe2   :  { %223 = vst.msk [vmem:[#allocation2 + $0x10] sm:$0xff] %vm19_vm0, %v206_v39  ;;  %231 = vst.msk [vmem:[#allocation2 + $0x50] sm:$0xff] %vm19_vm0, %v214_v40  ;;  %v207_v49 = vadd.f32 %v325_v47, %v39_v37  ;;  %v215_v50 = vadd.f32 %v333_v48, %v47_v38  ;;  %v144_v51 = vpop.f32.mrb[3].mxu0  ;;  %v176_v52 = vpop.f32.mrb[3].mxu1 }
  0xe3   :  { %221 = vst.msk [vmem:[#allocation2] sm:$0xff] %vm19_vm0, %v204_v45  ;;  %229 = vst.msk [vmem:[#allocation2 + $0x40] sm:$0xff] %vm19_vm0, %v212_v46  ;;  %v205_v53 = vadd.f32 %v144_v51, %v37_v43  ;;  %v213_v54 = vadd.f32 %v176_v52, %v45_v44 }
  0xe4   :  { %224 = vst.msk [vmem:[#allocation2 + $0x18] sm:$0xff] %vm19_vm0, %v207_v49  ;;  %232 = vst.msk [vmem:[#allocation2 + $0x58] sm:$0xff] %vm19_vm0, %v215_v50 }
  0xe5   :  { %222 = vst.msk [vmem:[#allocation2 + $0x8] sm:$0xff] %vm19_vm0, %v205_v53  ;;  %230 = vst.msk [vmem:[#allocation2 + $0x48] sm:$0xff] %vm19_vm0, %v213_v54 }
  0xe7   :  { %v328_v60 = vpop.f32.mrb[4].mxu0  ;;  %v336_v61 = vpop.f32.mrb[4].mxu1 }
  0xe8   :  { %v210_v0 = vadd.f32 %v328_v60, %v42_v55  ;;  %v218_v1 = vadd.f32 %v336_v61, %v50_v56  ;;  %v157_v2 = vpop.f32.mrb[5].mxu0  ;;  %v189_v3 = vpop.f32.mrb[5].mxu1 }
  0xe9   :  { %v242_v6 = vld [vmem:[#allocation2 + $0x10] sm:$0xff]  ;;  %v208_v8 = vadd.f32 %v157_v2, %v40_v57  ;;  %v216_v9 = vadd.f32 %v189_v3, %v48_v58  ;;  %v329_v10 = vpop.f32.mrb[6].mxu0  ;;  %v337_v11 = vpop.f32.mrb[6].mxu1 }
  0xea   :  { %v250_v7 = vld [vmem:[#allocation2 + $0x50] sm:$0xff]  ;;  %v265_v12 = vadd.f32 %v459_v59, %v242_v6  ;;  %v240_v14 = vld [vmem:[#allocation2] sm:$0xff]  ;;  %227 = vst.msk [vmem:[#allocation2 + $0x30] sm:$0xff] %vm19_vm0, %v210_v0  ;;  %235 = vst.msk [vmem:[#allocation2 + $0x70] sm:$0xff] %vm19_vm0, %v218_v1  ;;  %v211_v16 = vadd.f32 %v329_v10, %v43_v62  ;;  %v219_v17 = vadd.f32 %v337_v11, %v51_v63  ;;  %v160_v18 = vpop.f32.mrb[7].mxu0  ;;  %v192_v19 = vpop.f32.mrb[7].mxu1 }
  0xeb   :  { %v273_v13 = vadd.f32 %v459_v59, %v250_v7  ;;  %v248_v15 = vld [vmem:[#allocation2 + $0x40] sm:$0xff]  ;;  %v263_v20 = vadd.f32 %v459_v59, %v240_v14  ;;  %v243_v22 = vld [vmem:[#allocation2 + $0x18] sm:$0xff]  ;;  %225 = vst.msk [vmem:[#allocation2 + $0x20] sm:$0xff] %vm19_vm0, %v208_v8  ;;  %233 = vst.msk [vmem:[#allocation2 + $0x60] sm:$0xff] %vm19_vm0, %v216_v9  ;;  %v209_v24 = vadd.f32 %v160_v18, %v41_v4 }
  0xec   :  { %v271_v21 = vadd.f32 %v459_v59, %v248_v15  ;;  %v251_v23 = vld [vmem:[#allocation2 + $0x58] sm:$0xff]  ;;  %v217_v25 = vadd.f32 %v192_v19, %v49_v5  ;;  %281 = vst.msk [vmem:[%s552_s3 + $0x10] sm:$0xff] %vm19_vm0, %v265_v12  ;;  %v266_v26 = vadd.f32 %v459_v59, %v243_v22  ;;  %v241_v28 = vld [vmem:[#allocation2 + $0x8] sm:$0xff]  ;;  %228 = vst.msk [vmem:[#allocation2 + $0x38] sm:$0xff] %vm19_vm0, %v211_v16 }
  0xed   :  { %289 = vst.msk [vmem:[%s552_s3 + $0x50] sm:$0xff] %vm19_vm0, %v273_v13  ;;  %v274_v27 = vadd.f32 %v459_v59, %v251_v23  ;;  %v249_v29 = vld [vmem:[#allocation2 + $0x48] sm:$0xff]  ;;  %236 = vst.msk [vmem:[#allocation2 + $0x78] sm:$0xff] %vm19_vm0, %v219_v17  ;;  %v264_v30 = vadd.f32 %v459_v59, %v241_v28 }
  0xee   :  { %279 = vst.msk [vmem:[%s552_s3] sm:$0xff] %vm19_vm0, %v263_v20  ;;  %287 = vst.msk [vmem:[%s552_s3 + $0x40] sm:$0xff] %vm19_vm0, %v271_v21  ;;  %v272_v31 = vadd.f32 %v459_v59, %v249_v29 }
  0xef   :  { %226 = vst.msk [vmem:[#allocation2 + $0x28] sm:$0xff] %vm19_vm0, %v209_v24  ;;  %234 = vst.msk [vmem:[#allocation2 + $0x68] sm:$0xff] %vm19_vm0, %v217_v25 }
  0xf0   :  { %282 = vst.msk [vmem:[%s552_s3 + $0x18] sm:$0xff] %vm19_vm0, %v266_v26  ;;  %290 = vst.msk [vmem:[%s552_s3 + $0x58] sm:$0xff] %vm19_vm0, %v274_v27 }
  0xf1   :  { %280 = vst.msk [vmem:[%s552_s3 + $0x8] sm:$0xff] %vm19_vm0, %v264_v30  ;;  %288 = vst.msk [vmem:[%s552_s3 + $0x48] sm:$0xff] %vm19_vm0, %v272_v31  ;;  %v246_v32 = vld [vmem:[#allocation2 + $0x30] sm:$0xff] }
  0xf2   :  { %v254_v33 = vld [vmem:[#allocation2 + $0x70] sm:$0xff]  ;;  %v269_v34 = vadd.f32 %v459_v59, %v246_v32  ;;  %v244_v36 = vld [vmem:[#allocation2 + $0x20] sm:$0xff] }
  0xf3   :  { %v277_v35 = vadd.f32 %v459_v59, %v254_v33  ;;  %v252_v37 = vld [vmem:[#allocation2 + $0x60] sm:$0xff]  ;;  %v267_v38 = vadd.f32 %v459_v59, %v244_v36  ;;  %v247_v40 = vld [vmem:[#allocation2 + $0x38] sm:$0xff] }
  0xf4   :  { %v275_v39 = vadd.f32 %v459_v59, %v252_v37  ;;  %v255_v41 = vld [vmem:[#allocation2 + $0x78] sm:$0xff]  ;;  %285 = vst.msk [vmem:[%s552_s3 + $0x30] sm:$0xff] %vm19_vm0, %v269_v34  ;;  %v270_v42 = vadd.f32 %v459_v59, %v247_v40 }
  0xf5   :  { %293 = vst.msk [vmem:[%s552_s3 + $0x70] sm:$0xff] %vm19_vm0, %v277_v35  ;;  %v278_v43 = vadd.f32 %v459_v59, %v255_v41  ;;  %283 = vst.msk [vmem:[%s552_s3 + $0x20] sm:$0xff] %vm19_vm0, %v267_v38 }
  0xf6   :  { %v245_v44 = vld [vmem:[#allocation2 + $0x28] sm:$0xff]  ;;  %291 = vst.msk [vmem:[%s552_s3 + $0x60] sm:$0xff] %vm19_vm0, %v275_v39  ;;  %286 = vst.msk [vmem:[%s552_s3 + $0x38] sm:$0xff] %vm19_vm0, %v270_v42 }
  0xf7   :  { %v253_v45 = vld [vmem:[#allocation2 + $0x68] sm:$0xff]  ;;  %v268_v46 = vadd.f32 %v459_v59, %v245_v44  ;;  %294 = vst.msk [vmem:[%s552_s3 + $0x78] sm:$0xff] %vm19_vm0, %v278_v43 }
  0xf8   :  { %v276_v47 = vadd.f32 %v459_v59, %v253_v45 }
  0xf9   :  { %284 = vst.msk [vmem:[%s552_s3 + $0x28] sm:$0xff] %vm19_vm0, %v268_v46 }
  0xfa   :  { %292 = vst.msk [vmem:[%s552_s3 + $0x68] sm:$0xff] %vm19_vm0, %v276_v47 }

// kernel: decoder_forward.19
= control target key start
LH: loop header
LB: loop body
LE: loop exit
PB: predicated region body
PF: predicated region fallthrough
CT: control target
= control target key end

     0   :  { %s877_s15 = smov 0   ;;  %s879_s16 = smov 0   ;;  %s955_s0 = inlined_call_operand.vmem [shape: f32[2,4,8,8], index: 0, kind: input, shape index: {}]   ;;  %s956_s1 = inlined_call_operand.vmem [shape: f32[2,4,8,8], index: 1, kind: input, shape index: {}]   ;;  %s957_s2 = inlined_call_operand.vmem [shape: f32[2,4,8,8], index: 2, kind: input, shape index: {}]   ;;  %s958_s3 = inlined_call_operand.vmem [shape: f32[2,8,8], index: 3, kind: input, shape index: {}]   ;;  %s959_s4 = inlined_call_operand.vmem [shape: f32[2,4,8,8], index: 4, kind: output, shape index: {}]  }
   0x1   :  { %s881_s17 = smov 0   ;;  %s883_s18 = smov 0  }
   0x2   :  { %s885_s19 = smov 0  }
   0x3 LB: > { %s36_s20 = sadd.s32 1, %s838_s17  ;;  %s40_s21 = sadd.s32 1, %s842_s18  ;;  %s846_s19 = sphi %s885_s19, %s14_s19   ;;  %s842_s18 = sphi %s883_s18, %s963_s18   ;;  %s838_s17 = sphi %s881_s17, %s962_s17   ;;  %s834_s16 = sphi %s879_s16, %s961_s16   ;;  %s830_s15 = sphi %s877_s15, %s960_s15  }
   0x4   : > { %p38_p0 = scmp.ge.s32.totalorder %s36_s20, 4  ;;  %p726_p1 = scmp.ge.s32.totalorder %s846_s19, 1 }
   0x5   : > { %p261_p2 = scmp.lt.s32.totalorder %s846_s19, 9 }
   0x6   : > { %s965_s20 = smov (%p38_p0, %s36_s20), 0  ;;  %s967_s21 = smov (!%p38_p0, %s40_s21), %s842_s18 }
   0x7   : > { %p262_p3 = pnand %p726_p1, %p261_p2  ;;  %p42_p4 = scmp.ge.s32.totalorder %s967_s21, 2 }
   0x8   : > { %p331_p5 = scmp.lt.s32.totalorder (!%p262_p3), %s834_s16, 1  ;;  %p333_p6 = scmp.lt.s32.totalorder (!%p262_p3), %s830_s15, 3  ;;  %vm393_vm0 = vcmask (!%p262_p3), 64512   ;;  %v848_v0 = vmov (!%p262_p3), 0.0   ;;  %vm849_vm1 = vmmov (!%p262_p3), 0   ;;  %vm390_vm2 = vcmask (!%p262_p3), 7168  }
   0x9   : > { %s969_s21 = smov (%p42_p4, %s967_s21), 0  ;;  %265 = sbr.rel (%p262_p3) target bundleno = 830 (0x33e), region = 36 }
   0xa   : > { %744 = vmatprep.subr.bf16.mxu0 (!%p262_p3), %v848_v0  ;;  %394 = vst.msk [vmem:[#allocation4] sm:$0xff] (!%p262_p3), %vm393_vm0, %v848_v0  ;;  %746 = vmatprep.mubr.msk.bf16.mxu0 (!%p262_p3), %vm849_vm1, %v848_v0  ;;  %v850_v7 = vmov (!%p262_p3), -inf   ;;  %v449_v8 = vlaneseq (!%p262_p3)  ;;  %v851_v19 = vmov (!%p262_p3), 0   ;;  %vm497_vm4 = vcmask (!%p262_p3), 1043456  }
   0xb   : > { %750 = vmatprep.subr.bf16.mxu1 (!%p262_p3), %v848_v0  ;;  %752 = vmatprep.mubr.msk.bf16.mxu1 (!%p262_p3), %vm849_vm1, %v848_v0  ;;  %391 = vst.msk [vmem:[#allocation2] sm:$0xff] (!%p262_p3), %vm390_vm2, %v850_v7  ;;  %392 = vst.msk [vmem:[#allocation3] sm:$0xff] (!%p262_p3), %vm390_vm2, %v848_v0 }
   0xc   : > { %v450_v9 = vshrl.u32 (!%p262_p3), %v449_v8, 7  ;;  %v455_v10 = vand.u32 (!%p262_p3), 127, %v449_v8  ;;  %800 = vset.pattern.permute.xlu0 (!%p262_p3), %v851_v19  ;;  %801 = vset.pattern.permute.xlu1 (!%p262_p3), %v851_v19 }
   0xe   : > { %vm458_vm3 = vcmp.le.s32.totalorder (!%p262_p3), %v455_v10, %v450_v9 }
  0x10   : > { %s971_s16 = smov (!%p331_p5, %s834_s16), 1  ;;  %s973_s15 = smov (!%p333_p6, %s830_s15), 3 }
  0x11   : > { %s727_s22 = sshll.u32 %s971_s16, 2  ;;  %s733_s5 = sshll.u32 %s971_s16, 3  ;;  %v484_v40 = vld [vmem:[#allocation4] sm:$0xff] }
  0x12   : > { %s339_s23 = sadd.s32 %s727_s22, %s973_s15  ;;  %s373_s8 = scalar_lea.vmem %s958_s3, %s733_s5  ;;  %v460_v20 = vld [vmem:[#allocation2] sm:$0xff]  ;;  %v476_v35 = vld [vmem:[#allocation3] sm:$0xff] }
  0x13   : > { %s908_s24 = sshll.u32 %s339_s23, 3  ;;  %v400_v11 = vld [vmem:[%s373_s8] sm:$0xff] }
  0x14   : > { %s352_s27 = scalar_lea.vmem %s956_s1, %s908_s24  ;;  %s341_s30 = scalar_lea.vmem %s955_s0, %s908_s24 }
  0x15   : > { %v398_v1 = vld [vmem:[%s352_s27] sm:$0xff]  ;;  %s363_s11 = scalar_lea.vmem %s957_s2, %s908_s24  ;;  %s384_s14 = scalar_lea.vmem %s959_s4, %s908_s24 }
  0x16   : > { %v399_v2 = vpack.c.bf16 %v398_v1, %v398_v1  ;;  %v395_v3 = vld [vmem:[%s341_s30] sm:$0xff] }
  0x17   : > { %v396_v5 = vmul.f32 0.35355338, %v395_v3  ;;  %v492_v24 = vld [vmem:[%s363_s11] sm:$0xff] }
  0x18   : > { %v406_v4 = vsel %vm393_vm0, %v399_v2, 0  ;;  %v493_v25 = vpack.c.bf16 %v492_v24, %v492_v24 }
  0x19   : > { %745 = vmatpush3.bf16.xpose.msra.mxu0 %v406_v4  ;;  %v397_v6 = vpack.c.bf16 %v396_v5, %v396_v5 }
  0x1a   : > { %v499_v26 = vsel %vm497_vm4, %v493_v25, 0 }
  0x1b   : > { %751 = vmatpush3.bf16.msra.mxu1 %v499_v26 }
  0x20   : > { %747 = vmatmul.mubr.msk.bf16.vlgmr.msra.gmra.mrb[0].mxu0 %vm393_vm0, %v397_v6 }
  0xf3   : > { %v442_v12 = vpop.f32.mrb[0].mxu0 }
  0xf4   : > { %v443_v13 = vadd.f32 %v442_v12, %v400_v11  ;;  %v748_v14 = vpop.f32.mrb[1].mxu0 }
  0xf5   : > { %v445_v15 = vpop.f32.mrb[2].mxu0 }
  0xf6   : > { %v749_v16 = vpop.f32.mrb[3].mxu0  ;;  %v459_v17 = vsel %vm458_vm3, %v443_v13, -1e+09 }
  0xf7   : > { %v461_v18 = vsel %vm393_vm0, %v459_v17, -inf }
  0xf8   : > { %462 = vmax.xlane.f32.xlu0 %v461_v18 }
 0x185   : > { %v463_v21 = vpop.xlane.xlu0 %462 }
 0x186   : > { %v464_v22 = vmax.f32 %v460_v20, %v463_v21 }
 0x188   : > { %v465_v23 = vsub.f32 %v460_v20, %v464_v22  ;;  %543 = vst.msk [vmem:[#allocation2] sm:$0xff] %vm390_vm2, %v464_v22  ;;  %470 = vperm.xlu0 %800, %v464_v22  }
 0x18a   : > { %v466_v33 = vmul.f32 1.442695, %v465_v23 }
 0x207   : > { %v471_v27 = vpop.permute.xlu0 %470 }
 0x208   : > { %v473_v28 = vsub.f32 %v459_v17, %v471_v27 }
 0x20a   : > { %v474_v29 = vmul.f32 1.442695, %v473_v28 }
 0x20c   : > { %802 = vpow2.f32 %v474_v29 }
 0x20d   : > { %804 = vpow2.f32 %v466_v33 }
 0x216   : > { %v803_v30 = vpop.eup %802 }
 0x217   : > { %v478_v31 = vsel %vm393_vm0, %v803_v30, 0.0  ;;  %v491_v32 = vpack.c.bf16 %v803_v30, %v803_v30  ;;  %v805_v34 = vpop.eup %804 }
 0x218   : > { %479 = vadd.xlane.f32.xlu1 %v478_v31  ;;  %v477_v36 = vmul.f32 %v805_v34, %v476_v35 }
 0x219   : > { %753 = vmatmul.mubr.msk.bf16.vlgmr.msra.gmra.mrb[0].mxu1 %vm393_vm0, %v491_v32 }
 0x229   : > { %487 = vperm.xlu1 %801, %v805_v34  }
 0x2a5   : > { %v480_v37 = vpop.xlane.xlu1 %479 }
 0x2a6   : > { %v481_v38 = vadd.f32 %v480_v37, %v477_v36 }
 0x2a8   : > { %483 = vst.msk [vmem:[#allocation3] sm:$0xff] %vm390_vm2, %v481_v38 }
 0x2a9   : > { %v488_v41 = vpop.permute.xlu1 %487 }
 0x2aa   : > { %v490_v42 = vmul.f32 %v488_v41, %v484_v40 }
 0x2af   : > { %v548_v39 = vld [vmem:[#allocation3] sm:$0xff] }
 0x2b0   : > { %551 = vperm.xlu1 %801, %v548_v39  }
 0x2ec   : > { %v535_v43 = vpop.f32.mrb[0].mxu1 }
 0x2ed   : > { %v541_v44 = vadd.f32 %v535_v43, %v490_v42  ;;  %v754_v45 = vpop.f32.mrb[1].mxu1 }
 0x2ee   : > { %v538_v46 = vpop.f32.mrb[2].mxu1 }
 0x2ef   : > { %542 = vst.msk [vmem:[#allocation4] sm:$0xff] %vm393_vm0, %v541_v44  ;;  %v755_v47 = vpop.f32.mrb[3].mxu1 }
 0x2f6   : > { %v547_v50 = vld [vmem:[#allocation4] sm:$0xff] }
 0x32f   : > { %v552_v48 = vpop.permute.xlu1 %551 }
 0x330   : > { %806 = vrcp.f32 %v552_v48 }
 0x33a   : > { %v807_v49 = vpop.eup %806 }
 0x33b   : > { %v555_v51 = vmul.f32 %v807_v49, %v547_v50 }
 0x33d   : > { %556 = vst.msk [vmem:[%s384_s14] sm:$0xff] %vm393_vm0, %v555_v51 }
 0x33e PF: > { %s14_s19 = sadd.s32 1, %s846_s19   ;;  %s960_s15 = smov %s838_s17 }
 0x33f   : > { %p11_p7 = scmp.ge.s32.totalorder %s14_s19, 10   ;;  %s961_s16 = smov %s842_s18 }
 0x340   : > { %s962_s17 = smov %s965_s20  ;;  %s963_s18 = smov %s969_s21 }
 0x341   :  { %13 = sbr.rel (!%p11_p7) target bundleno = 3 (0x3), region = 83 }

// kernel: decoder_forward.20
= control target key start
LH: loop header
LB: loop body
LE: loop exit
PB: predicated region body
PF: predicated region fallthrough
CT: control target
= control target key end

     0   :  { %vm28_vm0 = vcmask 261120   ;;  %v672_v3 = vmov 0.0   ;;  %s1159_s1 = inlined_call_operand.vmem [shape: f32[32,32], index: 1, kind: input, shape index: {}]   ;;  %s1160_s0 = inlined_call_operand.vmem [shape: f32[128,32], index: 0, kind: input, shape index: {}]   ;;  %s1161_s2 = inlined_call_operand.vmem [shape: f32[1,32], index: 2, kind: input, shape index: {}]   ;;  %s1162_s3 = inlined_call_operand.vmem [shape: f32[128,32], index: 3, kind: input, shape index: {}]   ;;  %s1163_s4 = inlined_call_operand.vmem [shape: f32[1,32], index: 4, kind: input, shape index: {}]   ;;  %s1164_s5 = inlined_call_operand.vmem [shape: f32[1,32], index: 5, kind: input, shape index: {}]   ;;  %s1165_s6 = inlined_call_operand.vmem [shape: f32[128,32], index: 6, kind: output, shape index: {}]  }
   0x1   :  { %v85_v0 = vld [vmem:[%s1159_s1] sm:$0xff]  ;;  %v86_v1 = vld [vmem:[%s1159_s1 + $0x8] sm:$0xff]  ;;  %v87_v2 = vld [vmem:[%s1159_s1 + $0x10] sm:$0xff]  ;;  %31 = vst.msk [vmem:[#allocation2 + $0x10] sm:$0xff] %vm28_vm0, %v672_v3 }
   0x2   :  { %29 = vst.msk [vmem:[#allocation2] sm:$0xff] %vm28_vm0, %v672_v3  ;;  %30 = vst.msk [vmem:[#allocation2 + $0x8] sm:$0xff] %vm28_vm0, %v672_v3  ;;  %v89_v4 = vpack.c.bf16 %v86_v1, %v85_v0  ;;  %v88_v5 = vld [vmem:[%s1159_s1 + $0x18] sm:$0xff]  ;;  %v61_v6 = vld [vmem:[%s1160_s0] sm:$0xff] }
   0x3   :  { %32 = vst.msk [vmem:[#allocation2 + $0x18] sm:$0xff] %vm28_vm0, %v672_v3  ;;  %33 = vst.msk [vmem:[#allocation2 + $0x20] sm:$0xff] %vm28_vm0, %v672_v3  ;;  %v62_v7 = vld [vmem:[%s1160_s0 + $0x8] sm:$0xff]  ;;  %v90_v8 = vpack.c.bf16 %v88_v5, %v87_v2  ;;  %v69_v10 = vld [vmem:[%s1160_s0 + $0x40] sm:$0xff] }
   0x4   :  { %34 = vst.msk [vmem:[#allocation2 + $0x28] sm:$0xff] %vm28_vm0, %v672_v3  ;;  %35 = vst.msk [vmem:[#allocation2 + $0x30] sm:$0xff] %vm28_vm0, %v672_v3  ;;  %v77_v9 = vpack.c.bf16 %v62_v7, %v61_v6  ;;  %v70_v11 = vld [vmem:[%s1160_s0 + $0x48] sm:$0xff]  ;;  %615 = vmatprep.subr.bf16.mxu0 %v89_v4  ;;  %635 = vmatprep.subr.bf16.mxu1 %v89_v4  ;;  %v63_v13 = vld [vmem:[%s1160_s0 + $0x10] sm:$0xff] }
   0x5   :  { %36 = vst.msk [vmem:[#allocation2 + $0x38] sm:$0xff] %vm28_vm0, %v672_v3  ;;  %37 = vst.msk [vmem:[#allocation2 + $0x40] sm:$0xff] %vm28_vm0, %v672_v3  ;;  %v81_v12 = vpack.c.bf16 %v70_v11, %v69_v10  ;;  %v64_v14 = vld [vmem:[%s1160_s0 + $0x18] sm:$0xff]  ;;  %616 = vmatpush3.bf16.msra.mxu0 %v89_v4  ;;  %637 = vmatpush3.bf16.msra.mxu1 %v89_v4  ;;  %v71_v15 = vld [vmem:[%s1160_s0 + $0x50] sm:$0xff] }
   0x6   :  { %38 = vst.msk [vmem:[#allocation2 + $0x48] sm:$0xff] %vm28_vm0, %v672_v3  ;;  %39 = vst.msk [vmem:[#allocation2 + $0x50] sm:$0xff] %vm28_vm0, %v672_v3  ;;  %v72_v16 = vld [vmem:[%s1160_s0 + $0x58] sm:$0xff]  ;;  %v65_v17 = vld [vmem:[%s1160_s0 + $0x20] sm:$0xff]  ;;  %617 = vmatprep.subr.bf16.mxu0 %v90_v8  ;;  %636 = vmatprep.subr.bf16.mxu1 %v90_v8  ;;  %v78_v21 = vpack.c.bf16 %v64_v14, %v63_v13 }
   0x7   :  { %40 = vst.msk [vmem:[#allocation2 + $0x58] sm:$0xff] %vm28_vm0, %v672_v3  ;;  %41 = vst.msk [vmem:[#allocation2 + $0x60] sm:$0xff] %vm28_vm0, %v672_v3  ;;  %v66_v18 = vld [vmem:[%s1160_s0 + $0x28] sm:$0xff]  ;;  %v73_v19 = vld [vmem:[%s1160_s0 + $0x60] sm:$0xff]  ;;  %619 = vmatprep.mubr.msk.bf16.mxu0 %vm28_vm0, %v77_v9  ;;  %627 = vmatprep.mubr.msk.bf16.mxu1 %vm28_vm0, %v81_v12  ;;  %v82_v22 = vpack.c.bf16 %v72_v16, %v71_v15 }
   0x8   :  { %42 = vst.msk [vmem:[#allocation2 + $0x68] sm:$0xff] %vm28_vm0, %v672_v3  ;;  %43 = vst.msk [vmem:[#allocation2 + $0x70] sm:$0xff] %vm28_vm0, %v672_v3  ;;  %v74_v20 = vld [vmem:[%s1160_s0 + $0x68] sm:$0xff]  ;;  %v79_v23 = vpack.c.bf16 %v66_v18, %v65_v17  ;;  %v67_v25 = vld [vmem:[%s1160_s0 + $0x30] sm:$0xff] }
   0x9   :  { %44 = vst.msk [vmem:[#allocation2 + $0x78] sm:$0xff] %vm28_vm0, %v672_v3  ;;  %618 = vmatpush3.bf16.msra.mxu0 %v90_v8  ;;  %638 = vmatpush3.bf16.msra.mxu1 %v90_v8  ;;  %v83_v24 = vpack.c.bf16 %v74_v20, %v73_v19  ;;  %v68_v26 = vld [vmem:[%s1160_s0 + $0x38] sm:$0xff]  ;;  %v75_v27 = vld [vmem:[%s1160_s0 + $0x70] sm:$0xff]  ;;  %v45_v33 = vld [vmem:[#allocation2] sm:$0xff] }
   0xa   :  { %v76_v28 = vld [vmem:[%s1160_s0 + $0x78] sm:$0xff]  ;;  %v80_v29 = vpack.c.bf16 %v68_v26, %v67_v25  ;;  %v47_v31 = vld [vmem:[#allocation2 + $0x10] sm:$0xff]  ;;  %v46_v43 = vld [vmem:[#allocation2 + $0x8] sm:$0xff] }
   0xb   :  { %v84_v30 = vpack.c.bf16 %v76_v28, %v75_v27  ;;  %v48_v37 = vld [vmem:[#allocation2 + $0x18] sm:$0xff]  ;;  %v51_v55 = vld [vmem:[#allocation2 + $0x30] sm:$0xff]  ;;  %v49_v57 = vld [vmem:[#allocation2 + $0x20] sm:$0xff] }
   0xc   :  { %620 = vmatmul.mubr.msk.bf16.vlgmr.msra.gmra.mrb[0].mxu0 %vm28_vm0, %v78_v21  ;;  %628 = vmatmul.mubr.msk.bf16.vlgmr.msra.gmra.mrb[0].mxu1 %vm28_vm0, %v82_v22  ;;  %v53_v34 = vld [vmem:[#allocation2 + $0x40] sm:$0xff]  ;;  %v52_v61 = vld [vmem:[#allocation2 + $0x38] sm:$0xff]  ;;  %v297_v2 = vld [vmem:[%s1162_s3 + $0x50] sm:$0xff] }
   0xd   :  { %623 = vmatprep.mubr.msk.bf16.mxu0 %vm28_vm0, %v79_v23  ;;  %631 = vmatprep.mubr.msk.bf16.mxu1 %vm28_vm0, %v83_v24  ;;  %v55_v32 = vld [vmem:[#allocation2 + $0x50] sm:$0xff]  ;;  %v54_v44 = vld [vmem:[#allocation2 + $0x48] sm:$0xff]  ;;  %v803_v60 = vld [vmem:[%s1161_s2] ss:$0 sm:$0xff] }
   0xe   :  { %v56_v38 = vld [vmem:[#allocation2 + $0x58] sm:$0xff]  ;;  %v57_v58 = vld [vmem:[#allocation2 + $0x60] sm:$0xff]  ;;  %v50_v3 = vld [vmem:[#allocation2 + $0x28] sm:$0xff] }
   0xf   :  { %v59_v56 = vld [vmem:[#allocation2 + $0x70] sm:$0xff]  ;;  %v58_v6 = vld [vmem:[#allocation2 + $0x68] sm:$0xff]  ;;  %v287_v19 = vld [vmem:[%s1162_s3] sm:$0xff] }
  0x10   :  { %v60_v63 = vld [vmem:[#allocation2 + $0x78] sm:$0xff]  ;;  %v289_v10 = vld [vmem:[%s1162_s3 + $0x10] sm:$0xff] }
  0x11   :  { %v290_v26 = vld [vmem:[%s1162_s3 + $0x18] sm:$0xff] }
  0x14   :  { %624 = vmatmul.mubr.msk.bf16.gmra.mrb[4].mxu0 %vm28_vm0, %v80_v29  ;;  %632 = vmatmul.mubr.msk.bf16.gmra.mrb[4].mxu1 %vm28_vm0, %v84_v30 }
  0xdf   :  { %v621_v35 = vpop.f32.mrb[0].mxu0  ;;  %v629_v36 = vpop.f32.mrb[0].mxu1 }
  0xe0   :  { %v215_v39 = vadd.f32 %v621_v35, %v47_v31  ;;  %v223_v40 = vadd.f32 %v629_v36, %v55_v32  ;;  %v150_v41 = vpop.f32.mrb[1].mxu0  ;;  %v182_v42 = vpop.f32.mrb[1].mxu1 }
  0xe1   :  { %v213_v45 = vadd.f32 %v150_v41, %v45_v33  ;;  %v221_v46 = vadd.f32 %v182_v42, %v53_v34  ;;  %v622_v47 = vpop.f32.mrb[2].mxu0  ;;  %v630_v48 = vpop.f32.mrb[2].mxu1 }
  0xe2   :  { %231 = vst.msk [vmem:[#allocation2 + $0x10] sm:$0xff] %vm28_vm0, %v215_v39  ;;  %239 = vst.msk [vmem:[#allocation2 + $0x50] sm:$0xff] %vm28_vm0, %v223_v40  ;;  %v216_v49 = vadd.f32 %v622_v47, %v48_v37  ;;  %v224_v50 = vadd.f32 %v630_v48, %v56_v38  ;;  %v153_v51 = vpop.f32.mrb[3].mxu0  ;;  %v185_v52 = vpop.f32.mrb[3].mxu1  ;;  %v295_v38 = vld [vmem:[%s1162_s3 + $0x40] sm:$0xff]  ;;  %v298_v40 = vld [vmem:[%s1162_s3 + $0x58] sm:$0xff] }
  0xe3   :  { %229 = vst.msk [vmem:[#allocation2] sm:$0xff] %vm28_vm0, %v213_v45  ;;  %237 = vst.msk [vmem:[#allocation2 + $0x40] sm:$0xff] %vm28_vm0, %v221_v46  ;;  %v214_v53 = vadd.f32 %v153_v51, %v46_v43  ;;  %v222_v54 = vadd.f32 %v185_v52, %v54_v44 }
  0xe4   :  { %232 = vst.msk [vmem:[#allocation2 + $0x18] sm:$0xff] %vm28_vm0, %v216_v49  ;;  %240 = vst.msk [vmem:[#allocation2 + $0x58] sm:$0xff] %vm28_vm0, %v224_v50  ;;  %v296_v49 = vld [vmem:[%s1162_s3 + $0x48] sm:$0xff] }
  0xe5   :  { %230 = vst.msk [vmem:[#allocation2 + $0x8] sm:$0xff] %vm28_vm0, %v214_v53  ;;  %238 = vst.msk [vmem:[#allocation2 + $0x48] sm:$0xff] %vm28_vm0, %v222_v54  ;;  %v288_v50 = vld [vmem:[%s1162_s3 + $0x8] sm:$0xff]  ;;  %v293_v54 = vld [vmem:[%s1162_s3 + $0x30] sm:$0xff] }
  0xe7   :  { %v625_v59 = vpop.f32.mrb[4].mxu0  ;;  %v633_v62 = vpop.f32.mrb[4].mxu1 }
  0xe8   :  { %v219_v0 = vadd.f32 %v625_v59, %v51_v55  ;;  %v166_v1 = vpop.f32.mrb[5].mxu0  ;;  %v227_v4 = vadd.f32 %v633_v62, %v59_v56  ;;  %v198_v5 = vpop.f32.mrb[5].mxu1  ;;  %v294_v55 = vld [vmem:[%s1162_s3 + $0x38] sm:$0xff] }
  0xe9   :  { %v217_v7 = vadd.f32 %v166_v1, %v49_v57  ;;  %v258_v8 = vld [vmem:[#allocation2 + $0x50] sm:$0xff]  ;;  %v626_v11 = vpop.f32.mrb[6].mxu0  ;;  %v225_v12 = vadd.f32 %v198_v5, %v57_v58  ;;  %v634_v13 = vpop.f32.mrb[6].mxu1 }
  0xea   :  { %v250_v9 = vld [vmem:[#allocation2 + $0x10] sm:$0xff]  ;;  %235 = vst.msk [vmem:[#allocation2 + $0x30] sm:$0xff] %vm28_vm0, %v219_v0  ;;  %v281_v14 = vadd.f32 %v803_v60, %v258_v8  ;;  %v220_v16 = vadd.f32 %v626_v11, %v52_v61  ;;  %v169_v17 = vpop.f32.mrb[7].mxu0  ;;  %v248_v18 = vld [vmem:[#allocation2] sm:$0xff]  ;;  %243 = vst.msk [vmem:[#allocation2 + $0x70] sm:$0xff] %vm28_vm0, %v227_v4  ;;  %v228_v20 = vadd.f32 %v634_v13, %v60_v63  ;;  %v201_v21 = vpop.f32.mrb[7].mxu1 }
  0xeb   :  { %v273_v15 = vadd.f32 %v803_v60, %v250_v9  ;;  %v256_v22 = vld [vmem:[#allocation2 + $0x40] sm:$0xff]  ;;  %233 = vst.msk [vmem:[#allocation2 + $0x20] sm:$0xff] %vm28_vm0, %v217_v7  ;;  %v218_v23 = vadd.f32 %v169_v17, %v50_v3  ;;  %v271_v24 = vadd.f32 %v803_v60, %v248_v18  ;;  %v251_v25 = vld [vmem:[#allocation2 + $0x18] sm:$0xff]  ;;  %241 = vst.msk [vmem:[#allocation2 + $0x60] sm:$0xff] %vm28_vm0, %v225_v12 }
  0xec   :  { %v226_v27 = vadd.f32 %v201_v21, %v58_v6  ;;  %v259_v28 = vld [vmem:[#allocation2 + $0x58] sm:$0xff]  ;;  %v824_v29 = vadd.f32 %v297_v2, %v281_v14  ;;  %236 = vst.msk [vmem:[#allocation2 + $0x38] sm:$0xff] %vm28_vm0, %v220_v16  ;;  %v274_v31 = vadd.f32 %v803_v60, %v251_v25  ;;  %244 = vst.msk [vmem:[#allocation2 + $0x78] sm:$0xff] %vm28_vm0, %v228_v20  ;;  %v257_v39 = vld [vmem:[#allocation2 + $0x48] sm:$0xff] }
  0xed   :  { %v826_v30 = vadd.f32 %v289_v10, %v273_v15  ;;  %234 = vst.msk [vmem:[#allocation2 + $0x28] sm:$0xff] %vm28_vm0, %v218_v23  ;;  %v279_v32 = vadd.f32 %v803_v60, %v256_v22  ;;  %v282_v33 = vadd.f32 %v803_v60, %v259_v28  ;;  %v839_v36 = vadd.f32 %v287_v19, %v271_v24  ;;  %v249_v41 = vld [vmem:[#allocation2 + $0x8] sm:$0xff]  ;;  %v291_v7 = vld [vmem:[%s1162_s3 + $0x20] sm:$0xff]  ;;  %v301_v25 = vld [vmem:[%s1162_s3 + $0x70] sm:$0xff] }
  0xee   :  { %242 = vst.msk [vmem:[#allocation2 + $0x68] sm:$0xff] %vm28_vm0, %v226_v27  ;;  %v349_v34 = vsel %vm28_vm0, %v824_v29, 0.0  ;;  %v841_v37 = vadd.f32 %v290_v26, %v274_v31  ;;  %v280_v43 = vadd.f32 %v803_v60, %v257_v39  ;;  %v272_v48 = vadd.f32 %v803_v60, %v249_v41  ;;  %v292_v8 = vld [vmem:[%s1162_s3 + $0x28] sm:$0xff]  ;;  %v299_v13 = vld [vmem:[%s1162_s3 + $0x60] sm:$0xff]  ;;  %v302_v26 = vld [vmem:[%s1162_s3 + $0x78] sm:$0xff] }
  0xef   :  { %v325_v35 = vsel %vm28_vm0, %v826_v30, 0.0  ;;  %350 = vadd.xlane.f32.xlu0 %v349_v34  ;;  %v849_v42 = vadd.f32 %v295_v38, %v279_v32  ;;  %v319_v45 = vsel %vm28_vm0, %v839_v36, 0.0  ;;  %v856_v47 = vadd.f32 %v298_v40, %v282_v33  ;;  %v300_v14 = vld [vmem:[%s1162_s3 + $0x68] sm:$0xff] }
  0xf0   :  { %326 = vadd.xlane.f32.xlu1 %v325_v35  ;;  %v328_v46 = vsel %vm28_vm0, %v841_v37, 0.0  ;;  %v877_v58 = vadd.f32 %v296_v49, %v280_v43  ;;  %v879_v59 = vadd.f32 %v288_v50, %v272_v48 }
  0xf1   :  { %v254_v44 = vld [vmem:[#allocation2 + $0x30] sm:$0xff]  ;;  %v343_v56 = vsel %vm28_vm0, %v849_v42, 0.0  ;;  %v352_v57 = vsel %vm28_vm0, %v856_v47, 0.0 }
  0xf2   :  { %v277_v52 = vadd.f32 %v803_v60, %v254_v44  ;;  %v252_v61 = vld [vmem:[#allocation2 + $0x20] sm:$0xff]  ;;  %v346_v3 = vsel %vm28_vm0, %v877_v58, 0.0  ;;  %v322_v4 = vsel %vm28_vm0, %v879_v59, 0.0  ;;  %v262_v17 = vld [vmem:[#allocation2 + $0x70] sm:$0xff] }
  0xf3   :  { %320 = vadd.xlane.f32.xlu0 %v319_v45  ;;  %v255_v51 = vld [vmem:[#allocation2 + $0x38] sm:$0xff]  ;;  %v260_v1 = vld [vmem:[#allocation2 + $0x60] sm:$0xff]  ;;  %v275_v5 = vadd.f32 %v803_v60, %v252_v61  ;;  %v285_v23 = vadd.f32 %v803_v60, %v262_v17 }
  0xf4   :  { %329 = vadd.xlane.f32.xlu1 %v328_v46  ;;  %v278_v53 = vadd.f32 %v803_v60, %v255_v51  ;;  %v253_v62 = vld [vmem:[#allocation2 + $0x28] sm:$0xff]  ;;  %v881_v63 = vadd.f32 %v293_v54, %v277_v52  ;;  %v283_v11 = vadd.f32 %v803_v60, %v260_v1  ;;  %v263_v18 = vld [vmem:[#allocation2 + $0x78] sm:$0xff] }
  0xf5   :  { %v261_v2 = vld [vmem:[#allocation2 + $0x68] sm:$0xff]  ;;  %v276_v6 = vadd.f32 %v803_v60, %v253_v62  ;;  %v909_v15 = vadd.f32 %v291_v7, %v275_v5  ;;  %v286_v24 = vadd.f32 %v803_v60, %v263_v18  ;;  %v933_v31 = vadd.f32 %v301_v25, %v285_v23 }
  0xf6   :  { %v883_v0 = vadd.f32 %v294_v55, %v278_v53  ;;  %v337_v9 = vsel %vm28_vm0, %v881_v63, 0.0  ;;  %v284_v12 = vadd.f32 %v803_v60, %v261_v2  ;;  %v913_v19 = vadd.f32 %v299_v13, %v283_v11 }
  0xf7   :  { %344 = vadd.xlane.f32.xlu0 %v343_v56  ;;  %v911_v16 = vadd.f32 %v292_v8, %v276_v6  ;;  %v331_v21 = vsel %vm28_vm0, %v909_v15, 0.0  ;;  %v935_v32 = vadd.f32 %v302_v26, %v286_v24  ;;  %v361_v60 = vsel %vm28_vm0, %v933_v31, 0.0 }
  0xf8   :  { %353 = vadd.xlane.f32.xlu1 %v352_v57  ;;  %v340_v10 = vsel %vm28_vm0, %v883_v0, 0.0  ;;  %v915_v20 = vadd.f32 %v300_v14, %v284_v12  ;;  %v355_v27 = vsel %vm28_vm0, %v913_v19, 0.0 }
  0xf9   :  { %v334_v22 = vsel %vm28_vm0, %v911_v16, 0.0  ;;  %v364_v33 = vsel %vm28_vm0, %v935_v32, 0.0 }
  0xfa   :  { %v358_v28 = vsel %vm28_vm0, %v915_v20, 0.0 }
  0xfb   :  { %323 = vadd.xlane.f32.xlu0 %v322_v4 }
  0xfc   :  { %347 = vadd.xlane.f32.xlu1 %v346_v3 }
  0xff   :  { %338 = vadd.xlane.f32.xlu0 %v337_v9 }
 0x100   :  { %341 = vadd.xlane.f32.xlu1 %v340_v10 }
 0x103   :  { %332 = vadd.xlane.f32.xlu0 %v331_v21 }
 0x104   :  { %335 = vadd.xlane.f32.xlu1 %v334_v22 }
 0x107   :  { %356 = vadd.xlane.f32.xlu0 %v355_v27 }
 0x108   :  { %359 = vadd.xlane.f32.xlu1 %v358_v28 }
 0x10b   :  { %362 = vadd.xlane.f32.xlu0 %v361_v60 }
 0x10c   :  { %365 = vadd.xlane.f32.xlu1 %v364_v33 }
 0x17c   :  { %v351_v34 = vpop.xlane.xlu0 %350 }
 0x17d   :  { %v327_v35 = vpop.xlane.xlu1 %326  ;;  %v378_v38 = vmul.f32 0.03125, %v351_v34 }
 0x17e   :  { %v370_v39 = vmul.f32 0.03125, %v327_v35 }
 0x17f   :  { %v942_v40 = vsub.f32 %v824_v29, %v378_v38 }
 0x180   :  { %v945_v41 = vsub.f32 %v826_v30, %v370_v39  ;;  %v321_v43 = vpop.xlane.xlu0 %320 }
 0x181   :  { %v330_v44 = vpop.xlane.xlu1 %329  ;;  %v368_v45 = vmul.f32 0.03125, %v321_v43  ;;  %v410_v29 = vmul.f32 %v942_v40, %v942_v40 }
 0x182   :  { %v371_v46 = vmul.f32 0.03125, %v330_v44  ;;  %v402_v48 = vmul.f32 %v945_v41, %v945_v41 }
 0x183   :  { %v950_v49 = vsub.f32 %v839_v36, %v368_v45  ;;  %v446_v57 = vsel %vm28_vm0, %v410_v29, 0.0 }
 0x184   :  { %v953_v50 = vsub.f32 %v841_v37, %v371_v46  ;;  %v422_v51 = vsel %vm28_vm0, %v402_v48, 0.0  ;;  %v345_v30 = vpop.xlane.xlu0 %344 }
 0x185   :  { %v354_v52 = vpop.xlane.xlu1 %353  ;;  %423 = vadd.xlane.f32.xlu0 %v422_v51  ;;  %v376_v53 = vmul.f32 0.03125, %v345_v30  ;;  %v400_v36 = vmul.f32 %v950_v49, %v950_v49 }
 0x186   :  { %v379_v54 = vmul.f32 0.03125, %v354_v52  ;;  %v403_v55 = vmul.f32 %v953_v50, %v953_v50 }
 0x187   :  { %v963_v56 = vsub.f32 %v849_v42, %v376_v53  ;;  %v416_v5 = vsel %vm28_vm0, %v400_v36, 0.0 }
 0x188   :  { %v966_v37 = vsub.f32 %v856_v47, %v379_v54  ;;  %v425_v61 = vsel %vm28_vm0, %v403_v55, 0.0  ;;  %v324_v1 = vpop.xlane.xlu0 %323 }
 0x189   :  { %v348_v62 = vpop.xlane.xlu1 %347  ;;  %447 = vadd.xlane.f32.xlu0 %v446_v57  ;;  %426 = vadd.xlane.f32.xlu1 %v425_v61  ;;  %v369_v3 = vmul.f32 0.03125, %v324_v1  ;;  %v408_v7 = vmul.f32 %v963_v56, %v963_v56 }
 0x18a   :  { %v377_v2 = vmul.f32 0.03125, %v348_v62  ;;  %v411_v4 = vmul.f32 %v966_v37, %v966_v37 }
 0x18b   :  { %v977_v47 = vsub.f32 %v879_v59, %v369_v3  ;;  %v440_v14 = vsel %vm28_vm0, %v408_v7, 0.0 }
 0x18c   :  { %v974_v42 = vsub.f32 %v877_v58, %v377_v2  ;;  %v449_v6 = vsel %vm28_vm0, %v411_v4, 0.0  ;;  %v339_v8 = vpop.xlane.xlu0 %338 }
 0x18d   :  { %417 = vadd.xlane.f32.xlu0 %v416_v5  ;;  %v342_v9 = vpop.xlane.xlu1 %341  ;;  %450 = vadd.xlane.f32.xlu1 %v449_v6  ;;  %v374_v10 = vmul.f32 0.03125, %v339_v8  ;;  %v401_v12 = vmul.f32 %v977_v47, %v977_v47 }
 0x18e   :  { %v375_v11 = vmul.f32 0.03125, %v342_v9  ;;  %v409_v58 = vmul.f32 %v974_v42, %v974_v42 }
 0x18f   :  { %v987_v59 = vsub.f32 %v881_v63, %v374_v10  ;;  %v419_v17 = vsel %vm28_vm0, %v401_v12, 0.0 }
 0x190   :  { %v990_v13 = vsub.f32 %v883_v0, %v375_v11  ;;  %v333_v18 = vpop.xlane.xlu0 %332  ;;  %v443_v25 = vsel %vm28_vm0, %v409_v58, 0.0 }
 0x191   :  { %441 = vadd.xlane.f32.xlu0 %v440_v14  ;;  %420 = vadd.xlane.f32.xlu1 %v419_v17  ;;  %v336_v21 = vpop.xlane.xlu1 %335  ;;  %v372_v22 = vmul.f32 0.03125, %v333_v18  ;;  %v406_v24 = vmul.f32 %v987_v59, %v987_v59 }
 0x192   :  { %v373_v23 = vmul.f32 0.03125, %v336_v21  ;;  %v407_v27 = vmul.f32 %v990_v13, %v990_v13  ;;  %v1040_v21 = vld [vmem:[%s1163_s4] ss:$0 sm:$0xff] }
 0x193   :  { %v998_v63 = vsub.f32 %v909_v15, %v372_v22  ;;  %v434_v26 = vsel %vm28_vm0, %v406_v24, 0.0 }
 0x194   :  { %v1001_v0 = vsub.f32 %v911_v16, %v373_v23  ;;  %v357_v28 = vpop.xlane.xlu0 %356  ;;  %v437_v43 = vsel %vm28_vm0, %v407_v27, 0.0  ;;  %v1046_v27 = vld [vmem:[%s1164_s5] ss:$0 sm:$0xff] }
 0x195   :  { %435 = vadd.xlane.f32.xlu0 %v434_v26  ;;  %444 = vadd.xlane.f32.xlu1 %v443_v25  ;;  %v360_v60 = vpop.xlane.xlu1 %359  ;;  %v380_v33 = vmul.f32 0.03125, %v357_v28  ;;  %v404_v35 = vmul.f32 %v998_v63, %v998_v63 }
 0x196   :  { %v381_v34 = vmul.f32 0.03125, %v360_v60  ;;  %v405_v15 = vmul.f32 %v1001_v0, %v1001_v0 }
 0x197   :  { %v1011_v16 = vsub.f32 %v913_v19, %v380_v33  ;;  %v428_v39 = vsel %vm28_vm0, %v404_v35, 0.0 }
 0x198   :  { %v1014_v38 = vsub.f32 %v915_v20, %v381_v34  ;;  %v363_v44 = vpop.xlane.xlu0 %362  ;;  %v431_v29 = vsel %vm28_vm0, %v405_v15, 0.0 }
 0x199   :  { %429 = vadd.xlane.f32.xlu0 %v428_v39  ;;  %438 = vadd.xlane.f32.xlu1 %v437_v43  ;;  %v366_v45 = vpop.xlane.xlu1 %365  ;;  %v382_v46 = vmul.f32 0.03125, %v363_v44  ;;  %v412_v51 = vmul.f32 %v1011_v16, %v1011_v16 }
 0x19a   :  { %v383_v48 = vmul.f32 0.03125, %v366_v45  ;;  %v413_v52 = vmul.f32 %v1014_v38, %v1014_v38 }
 0x19b   :  { %v1022_v19 = vsub.f32 %v933_v31, %v382_v46  ;;  %v452_v30 = vsel %vm28_vm0, %v412_v51, 0.0 }
 0x19c   :  { %v1025_v20 = vsub.f32 %v935_v32, %v383_v48  ;;  %v455_v55 = vsel %vm28_vm0, %v413_v52, 0.0 }
 0x19d   :  { %453 = vadd.xlane.f32.xlu0 %v452_v30  ;;  %432 = vadd.xlane.f32.xlu1 %v431_v29  ;;  %v414_v53 = vmul.f32 %v1022_v19, %v1022_v19 }
 0x19e   :  { %v415_v31 = vmul.f32 %v1025_v20, %v1025_v20 }
 0x19f   :  { %v458_v54 = vsel %vm28_vm0, %v414_v53, 0.0 }
 0x1a0   :  { %v461_v32 = vsel %vm28_vm0, %v415_v31, 0.0 }
 0x1a1   :  { %459 = vadd.xlane.f32.xlu0 %v458_v54  ;;  %456 = vadd.xlane.f32.xlu1 %v455_v55 }
 0x1a5   :  { %462 = vadd.xlane.f32.xlu1 %v461_v32 }
 0x212   :  { %v424_v36 = vpop.xlane.xlu0 %423 }
 0x213   :  { %v466_v57 = vmul.f32 0.03125, %v424_v36 }
 0x215   :  { %v482_v61 = vadd.f32 1e-05, %v466_v57 }
 0x216   :  { %v448_v62 = vpop.xlane.xlu0 %447  ;;  %v427_v1 = vpop.xlane.xlu1 %426 }
 0x217   :  { %640 = vrsqrt.f32 %v482_v61  ;;  %v474_v2 = vmul.f32 0.03125, %v448_v62  ;;  %v467_v3 = vmul.f32 0.03125, %v427_v1 }
 0x219   :  { %v490_v4 = vadd.f32 1e-05, %v474_v2  ;;  %v483_v5 = vadd.f32 1e-05, %v467_v3 }
 0x21a   :  { %v418_v6 = vpop.xlane.xlu0 %417  ;;  %v451_v7 = vpop.xlane.xlu1 %450 }
 0x21b   :  { %642 = vrsqrt.f32 %v490_v4  ;;  %v464_v8 = vmul.f32 0.03125, %v418_v6  ;;  %v475_v9 = vmul.f32 0.03125, %v451_v7 }
 0x21c   :  { %644 = vrsqrt.f32 %v483_v5 }
 0x21d   :  { %v480_v10 = vadd.f32 1e-05, %v464_v8  ;;  %v491_v11 = vadd.f32 1e-05, %v475_v9 }
 0x21e   :  { %v442_v12 = vpop.xlane.xlu0 %441  ;;  %v421_v58 = vpop.xlane.xlu1 %420 }
 0x21f   :  { %646 = vrsqrt.f32 %v480_v10  ;;  %v472_v14 = vmul.f32 0.03125, %v442_v12  ;;  %v465_v17 = vmul.f32 0.03125, %v421_v58 }
 0x220   :  { %648 = vrsqrt.f32 %v491_v11 }
 0x221   :  { %v641_v18 = vpop.eup %640  ;;  %v488_v22 = vadd.f32 1e-05, %v472_v14  ;;  %v481_v23 = vadd.f32 1e-05, %v465_v17 }
 0x222   :  { %v514_v24 = vmul.f32 %v641_v18, %v945_v41  ;;  %v436_v25 = vpop.xlane.xlu0 %435  ;;  %v445_v26 = vpop.xlane.xlu1 %444 }
 0x223   :  { %650 = vrsqrt.f32 %v488_v22  ;;  %v470_v28 = vmul.f32 0.03125, %v436_v25  ;;  %v473_v60 = vmul.f32 0.03125, %v445_v26 }
 0x224   :  { %v537_v33 = vmul.f32 %v1040_v21, %v514_v24  ;;  %652 = vrsqrt.f32 %v481_v23 }
 0x225   :  { %v643_v34 = vpop.eup %642  ;;  %v486_v35 = vadd.f32 1e-05, %v470_v28  ;;  %v489_v15 = vadd.f32 1e-05, %v473_v60 }
 0x226   :  { %v645_v39 = vpop.eup %644  ;;  %v560_v43 = vadd.f32 %v1046_v27, %v537_v33  ;;  %v522_v41 = vmul.f32 %v643_v34, %v942_v40  ;;  %v430_v44 = vpop.xlane.xlu0 %429 }
 0x227   :  { %v439_v45 = vpop.xlane.xlu1 %438  ;;  %v515_v46 = vmul.f32 %v645_v39, %v953_v50  ;;  %654 = vrsqrt.f32 %v486_v35  ;;  %v468_v48 = vmul.f32 0.03125, %v430_v44 }
 0x228   :  { %v471_v51 = vmul.f32 0.03125, %v439_v45  ;;  %576 = vst.msk [vmem:[%s1165_s6 + $0x10] sm:$0xff] %vm28_vm0, %v560_v43  ;;  %v545_v29 = vmul.f32 %v1040_v21, %v522_v41  ;;  %656 = vrsqrt.f32 %v489_v15 }
 0x229   :  { %v647_v30 = vpop.eup %646  ;;  %v538_v52 = vmul.f32 %v1040_v21, %v515_v46  ;;  %v484_v53 = vadd.f32 1e-05, %v468_v48 }
 0x22a   :  { %v487_v40 = vadd.f32 1e-05, %v471_v51  ;;  %v649_v54 = vpop.eup %648  ;;  %v568_v55 = vadd.f32 %v1046_v27, %v545_v29  ;;  %v512_v50 = vmul.f32 %v647_v30, %v950_v49  ;;  %v454_v31 = vpop.xlane.xlu0 %453 }
 0x22b   :  { %v433_v32 = vpop.xlane.xlu1 %432  ;;  %v561_v36 = vadd.f32 %v1046_v27, %v538_v52  ;;  %v523_v57 = vmul.f32 %v649_v54, %v966_v37  ;;  %658 = vrsqrt.f32 %v484_v53  ;;  %v476_v61 = vmul.f32 0.03125, %v454_v31 }
 0x22c   :  { %584 = vst.msk [vmem:[%s1165_s6 + $0x50] sm:$0xff] %vm28_vm0, %v568_v55  ;;  %v535_v62 = vmul.f32 %v1040_v21, %v512_v50  ;;  %660 = vrsqrt.f32 %v487_v40  ;;  %v469_v1 = vmul.f32 0.03125, %v433_v32 }
 0x22d   :  { %v651_v2 = vpop.eup %650  ;;  %577 = vst.msk [vmem:[%s1165_s6 + $0x18] sm:$0xff] %vm28_vm0, %v561_v36  ;;  %v546_v49 = vmul.f32 %v1040_v21, %v523_v57  ;;  %v492_v37 = vadd.f32 1e-05, %v476_v61 }
 0x22e   :  { %v653_v3 = vpop.eup %652  ;;  %v558_v4 = vadd.f32 %v1046_v27, %v535_v62  ;;  %v520_v5 = vmul.f32 %v651_v2, %v963_v56  ;;  %v485_v6 = vadd.f32 1e-05, %v469_v1  ;;  %v460_v7 = vpop.xlane.xlu0 %459 }
 0x22f   :  { %v457_v8 = vpop.xlane.xlu1 %456  ;;  %v569_v9 = vadd.f32 %v1046_v27, %v546_v49  ;;  %v513_v10 = vmul.f32 %v653_v3, %v977_v47  ;;  %662 = vrsqrt.f32 %v492_v37  ;;  %v478_v11 = vmul.f32 0.03125, %v460_v7 }
 0x230   :  { %574 = vst.msk [vmem:[%s1165_s6] sm:$0xff] %vm28_vm0, %v558_v4  ;;  %v543_v12 = vmul.f32 %v1040_v21, %v520_v5  ;;  %664 = vrsqrt.f32 %v485_v6  ;;  %v477_v58 = vmul.f32 0.03125, %v457_v8 }
 0x231   :  { %v655_v14 = vpop.eup %654  ;;  %585 = vst.msk [vmem:[%s1165_s6 + $0x58] sm:$0xff] %vm28_vm0, %v569_v9  ;;  %v536_v56 = vmul.f32 %v1040_v21, %v513_v10  ;;  %v494_v47 = vadd.f32 1e-05, %v478_v11 }
 0x232   :  { %v657_v17 = vpop.eup %656  ;;  %v566_v18 = vadd.f32 %v1046_v27, %v543_v12  ;;  %v518_v22 = vmul.f32 %v655_v14, %v987_v59  ;;  %v493_v23 = vadd.f32 1e-05, %v477_v58 }
 0x233   :  { %v463_v24 = vpop.xlane.xlu1 %462  ;;  %v559_v25 = vadd.f32 %v1046_v27, %v536_v56  ;;  %v521_v26 = vmul.f32 %v657_v17, %v974_v42  ;;  %666 = vrsqrt.f32 %v494_v47 }
 0x234   :  { %v479_v28 = vmul.f32 0.03125, %v463_v24  ;;  %582 = vst.msk [vmem:[%s1165_s6 + $0x40] sm:$0xff] %vm28_vm0, %v566_v18  ;;  %v541_v60 = vmul.f32 %v1040_v21, %v518_v22  ;;  %668 = vrsqrt.f32 %v493_v23 }
 0x235   :  { %v659_v33 = vpop.eup %658  ;;  %575 = vst.msk [vmem:[%s1165_s6 + $0x8] sm:$0xff] %vm28_vm0, %v559_v25  ;;  %v544_v59 = vmul.f32 %v1040_v21, %v521_v26 }
 0x236   :  { %v495_v34 = vadd.f32 1e-05, %v479_v28  ;;  %v661_v42 = vpop.eup %660  ;;  %v564_v35 = vadd.f32 %v1046_v27, %v541_v60  ;;  %v516_v15 = vmul.f32 %v659_v33, %v998_v63 }
 0x237   :  { %v567_v39 = vadd.f32 %v1046_v27, %v544_v59  ;;  %v519_v43 = vmul.f32 %v661_v42, %v990_v13 }
 0x238   :  { %670 = vrsqrt.f32 %v495_v34  ;;  %580 = vst.msk [vmem:[%s1165_s6 + $0x30] sm:$0xff] %vm28_vm0, %v564_v35  ;;  %v539_v41 = vmul.f32 %v1040_v21, %v516_v15 }
 0x239   :  { %v663_v44 = vpop.eup %662  ;;  %583 = vst.msk [vmem:[%s1165_s6 + $0x48] sm:$0xff] %vm28_vm0, %v567_v39  ;;  %v542_v63 = vmul.f32 %v1040_v21, %v519_v43 }
 0x23a   :  { %v665_v45 = vpop.eup %664  ;;  %v562_v46 = vadd.f32 %v1046_v27, %v539_v41  ;;  %v524_v13 = vmul.f32 %v663_v44, %v1011_v16 }
 0x23b   :  { %v565_v48 = vadd.f32 %v1046_v27, %v542_v63  ;;  %v517_v51 = vmul.f32 %v665_v45, %v1001_v0 }
 0x23c   :  { %578 = vst.msk [vmem:[%s1165_s6 + $0x20] sm:$0xff] %vm28_vm0, %v562_v46  ;;  %v547_v29 = vmul.f32 %v1040_v21, %v524_v13 }
 0x23d   :  { %v667_v30 = vpop.eup %666  ;;  %581 = vst.msk [vmem:[%s1165_s6 + $0x38] sm:$0xff] %vm28_vm0, %v565_v48  ;;  %v540_v52 = vmul.f32 %v1040_v21, %v517_v51 }
 0x23e   :  { %v669_v16 = vpop.eup %668  ;;  %v570_v53 = vadd.f32 %v1046_v27, %v547_v29  ;;  %v526_v0 = vmul.f32 %v667_v30, %v1022_v19 }
 0x23f   :  { %v563_v40 = vadd.f32 %v1046_v27, %v540_v52  ;;  %v525_v54 = vmul.f32 %v669_v16, %v1014_v38 }
 0x240   :  { %586 = vst.msk [vmem:[%s1165_s6 + $0x60] sm:$0xff] %vm28_vm0, %v570_v53  ;;  %v549_v55 = vmul.f32 %v1040_v21, %v526_v0 }
 0x241   :  { %579 = vst.msk [vmem:[%s1165_s6 + $0x28] sm:$0xff] %vm28_vm0, %v563_v40  ;;  %v548_v31 = vmul.f32 %v1040_v21, %v525_v54 }
 0x242   :  { %v671_v50 = vpop.eup %670  ;;  %v572_v19 = vadd.f32 %v1046_v27, %v549_v55 }
 0x243   :  { %v527_v32 = vmul.f32 %v671_v50, %v1025_v20  ;;  %v571_v38 = vadd.f32 %v1046_v27, %v548_v31 }
 0x244   :  { %588 = vst.msk [vmem:[%s1165_s6 + $0x70] sm:$0xff] %vm28_vm0, %v572_v19 }
 0x245   :  { %v550_v36 = vmul.f32 %v1040_v21, %v527_v32  ;;  %587 = vst.msk [vmem:[%s1165_s6 + $0x68] sm:$0xff] %vm28_vm0, %v571_v38 }
 0x247   :  { %v573_v57 = vadd.f32 %v1046_v27, %v550_v36 }
 0x249   :  { %589 = vst.msk [vmem:[%s1165_s6 + $0x78] sm:$0xff] %vm28_vm0, %v573_v57 }

// kernel: decoder_forward.21
= control target key start
LH: loop header
LB: loop body
LE: loop exit
PB: predicated region body
PF: predicated region fallthrough
CT: control target
= control target key end

     0   :  { %vm19_vm0 = vcmask 261120   ;;  %v342_v3 = vmov 0.0   ;;  %s548_s1 = inlined_call_operand.vmem [shape: f32[32,32], index: 1, kind: input, shape index: {}]   ;;  %s549_s0 = inlined_call_operand.vmem [shape: f32[128,32], index: 0, kind: input, shape index: {}]   ;;  %s550_s2 = inlined_call_operand.vmem [shape: f32[1,32], index: 2, kind: input, shape index: {}]   ;;  %s551_s3 = inlined_call_operand.vmem [shape: f32[128,32], index: 3, kind: output, shape index: {}]  }
   0x1   :  { %v76_v0 = vld [vmem:[%s548_s1] sm:$0xff]  ;;  %v77_v1 = vld [vmem:[%s548_s1 + $0x8] sm:$0xff]  ;;  %v78_v2 = vld [vmem:[%s548_s1 + $0x10] sm:$0xff]  ;;  %22 = vst.msk [vmem:[#allocation2 + $0x10] sm:$0xff] %vm19_vm0, %v342_v3 }
   0x2   :  { %20 = vst.msk [vmem:[#allocation2] sm:$0xff] %vm19_vm0, %v342_v3  ;;  %21 = vst.msk [vmem:[#allocation2 + $0x8] sm:$0xff] %vm19_vm0, %v342_v3  ;;  %v80_v4 = vpack.c.bf16 %v77_v1, %v76_v0  ;;  %v79_v5 = vld [vmem:[%s548_s1 + $0x18] sm:$0xff]  ;;  %v52_v6 = vld [vmem:[%s549_s0] sm:$0xff] }
   0x3   :  { %23 = vst.msk [vmem:[#allocation2 + $0x18] sm:$0xff] %vm19_vm0, %v342_v3  ;;  %24 = vst.msk [vmem:[#allocation2 + $0x20] sm:$0xff] %vm19_vm0, %v342_v3  ;;  %v53_v7 = vld [vmem:[%s549_s0 + $0x8] sm:$0xff]  ;;  %v81_v8 = vpack.c.bf16 %v79_v5, %v78_v2  ;;  %v60_v10 = vld [vmem:[%s549_s0 + $0x40] sm:$0xff] }
   0x4   :  { %25 = vst.msk [vmem:[#allocation2 + $0x28] sm:$0xff] %vm19_vm0, %v342_v3  ;;  %26 = vst.msk [vmem:[#allocation2 + $0x30] sm:$0xff] %vm19_vm0, %v342_v3  ;;  %v68_v9 = vpack.c.bf16 %v53_v7, %v52_v6  ;;  %v61_v11 = vld [vmem:[%s549_s0 + $0x48] sm:$0xff]  ;;  %317 = vmatprep.subr.bf16.mxu0 %v80_v4  ;;  %337 = vmatprep.subr.bf16.mxu1 %v80_v4  ;;  %v54_v13 = vld [vmem:[%s549_s0 + $0x10] sm:$0xff] }
   0x5   :  { %27 = vst.msk [vmem:[#allocation2 + $0x38] sm:$0xff] %vm19_vm0, %v342_v3  ;;  %28 = vst.msk [vmem:[#allocation2 + $0x40] sm:$0xff] %vm19_vm0, %v342_v3  ;;  %v72_v12 = vpack.c.bf16 %v61_v11, %v60_v10  ;;  %v55_v14 = vld [vmem:[%s549_s0 + $0x18] sm:$0xff]  ;;  %318 = vmatpush3.bf16.msra.mxu0 %v80_v4  ;;  %339 = vmatpush3.bf16.msra.mxu1 %v80_v4  ;;  %v62_v15 = vld [vmem:[%s549_s0 + $0x50] sm:$0xff] }
   0x6   :  { %29 = vst.msk [vmem:[#allocation2 + $0x48] sm:$0xff] %vm19_vm0, %v342_v3  ;;  %30 = vst.msk [vmem:[#allocation2 + $0x50] sm:$0xff] %vm19_vm0, %v342_v3  ;;  %v63_v16 = vld [vmem:[%s549_s0 + $0x58] sm:$0xff]  ;;  %v56_v17 = vld [vmem:[%s549_s0 + $0x20] sm:$0xff]  ;;  %319 = vmatprep.subr.bf16.mxu0 %v81_v8  ;;  %338 = vmatprep.subr.bf16.mxu1 %v81_v8  ;;  %v69_v21 = vpack.c.bf16 %v55_v14, %v54_v13 }
   0x7   :  { %31 = vst.msk [vmem:[#allocation2 + $0x58] sm:$0xff] %vm19_vm0, %v342_v3  ;;  %32 = vst.msk [vmem:[#allocation2 + $0x60] sm:$0xff] %vm19_vm0, %v342_v3  ;;  %v57_v18 = vld [vmem:[%s549_s0 + $0x28] sm:$0xff]  ;;  %v64_v19 = vld [vmem:[%s549_s0 + $0x60] sm:$0xff]  ;;  %321 = vmatprep.mubr.msk.bf16.mxu0 %vm19_vm0, %v68_v9  ;;  %329 = vmatprep.mubr.msk.bf16.mxu1 %vm19_vm0, %v72_v12  ;;  %v73_v22 = vpack.c.bf16 %v63_v16, %v62_v15 }
   0x8   :  { %33 = vst.msk [vmem:[#allocation2 + $0x68] sm:$0xff] %vm19_vm0, %v342_v3  ;;  %34 = vst.msk [vmem:[#allocation2 + $0x70] sm:$0xff] %vm19_vm0, %v342_v3  ;;  %v65_v20 = vld [vmem:[%s549_s0 + $0x68] sm:$0xff]  ;;  %v70_v23 = vpack.c.bf16 %v57_v18, %v56_v17  ;;  %v58_v25 = vld [vmem:[%s549_s0 + $0x30] sm:$0xff] }
   0x9   :  { %35 = vst.msk [vmem:[#allocation2 + $0x78] sm:$0xff] %vm19_vm0, %v342_v3  ;;  %320 = vmatpush3.bf16.msra.mxu0 %v81_v8  ;;  %340 = vmatpush3.bf16.msra.mxu1 %v81_v8  ;;  %v74_v24 = vpack.c.bf16 %v65_v20, %v64_v19  ;;  %v59_v26 = vld [vmem:[%s549_s0 + $0x38] sm:$0xff]  ;;  %v66_v27 = vld [vmem:[%s549_s0 + $0x70] sm:$0xff]  ;;  %v36_v33 = vld [vmem:[#allocation2] sm:$0xff] }
   0xa   :  { %v67_v28 = vld [vmem:[%s549_s0 + $0x78] sm:$0xff]  ;;  %v71_v29 = vpack.c.bf16 %v59_v26, %v58_v25  ;;  %v38_v31 = vld [vmem:[#allocation2 + $0x10] sm:$0xff]  ;;  %v37_v43 = vld [vmem:[#allocation2 + $0x8] sm:$0xff] }
   0xb   :  { %v75_v30 = vpack.c.bf16 %v67_v28, %v66_v27  ;;  %v39_v37 = vld [vmem:[#allocation2 + $0x18] sm:$0xff]  ;;  %v42_v55 = vld [vmem:[#allocation2 + $0x30] sm:$0xff]  ;;  %v40_v57 = vld [vmem:[#allocation2 + $0x20] sm:$0xff] }
   0xc   :  { %322 = vmatmul.mubr.msk.bf16.vlgmr.msra.gmra.mrb[0].mxu0 %vm19_vm0, %v69_v21  ;;  %330 = vmatmul.mubr.msk.bf16.vlgmr.msra.gmra.mrb[0].mxu1 %vm19_vm0, %v73_v22  ;;  %v44_v34 = vld [vmem:[#allocation2 + $0x40] sm:$0xff]  ;;  %v43_v62 = vld [vmem:[#allocation2 + $0x38] sm:$0xff]  ;;  %v41_v4 = vld [vmem:[#allocation2 + $0x28] sm:$0xff] }
   0xd   :  { %325 = vmatprep.mubr.msk.bf16.mxu0 %vm19_vm0, %v70_v23  ;;  %333 = vmatprep.mubr.msk.bf16.mxu1 %vm19_vm0, %v74_v24  ;;  %v46_v32 = vld [vmem:[#allocation2 + $0x50] sm:$0xff]  ;;  %v45_v44 = vld [vmem:[#allocation2 + $0x48] sm:$0xff]  ;;  %v458_v59 = vld [vmem:[%s550_s2] ss:$0 sm:$0xff] }
   0xe   :  { %v47_v38 = vld [vmem:[#allocation2 + $0x58] sm:$0xff]  ;;  %v48_v58 = vld [vmem:[#allocation2 + $0x60] sm:$0xff] }
   0xf   :  { %v50_v56 = vld [vmem:[#allocation2 + $0x70] sm:$0xff]  ;;  %v49_v5 = vld [vmem:[#allocation2 + $0x68] sm:$0xff] }
  0x10   :  { %v51_v63 = vld [vmem:[#allocation2 + $0x78] sm:$0xff] }
  0x14   :  { %326 = vmatmul.mubr.msk.bf16.gmra.mrb[4].mxu0 %vm19_vm0, %v71_v29  ;;  %334 = vmatmul.mubr.msk.bf16.gmra.mrb[4].mxu1 %vm19_vm0, %v75_v30 }
  0xdf   :  { %v323_v35 = vpop.f32.mrb[0].mxu0  ;;  %v331_v36 = vpop.f32.mrb[0].mxu1 }
  0xe0   :  { %v206_v39 = vadd.f32 %v323_v35, %v38_v31  ;;  %v214_v40 = vadd.f32 %v331_v36, %v46_v32  ;;  %v141_v41 = vpop.f32.mrb[1].mxu0  ;;  %v173_v42 = vpop.f32.mrb[1].mxu1 }
  0xe1   :  { %v204_v45 = vadd.f32 %v141_v41, %v36_v33  ;;  %v212_v46 = vadd.f32 %v173_v42, %v44_v34  ;;  %v324_v47 = vpop.f32.mrb[2].mxu0  ;;  %v332_v48 = vpop.f32.mrb[2].mxu1 }
  0xe2   :  { %222 = vst.msk [vmem:[#allocation2 + $0x10] sm:$0xff] %vm19_vm0, %v206_v39  ;;  %230 = vst.msk [vmem:[#allocation2 + $0x50] sm:$0xff] %vm19_vm0, %v214_v40  ;;  %v207_v49 = vadd.f32 %v324_v47, %v39_v37  ;;  %v215_v50 = vadd.f32 %v332_v48, %v47_v38  ;;  %v144_v51 = vpop.f32.mrb[3].mxu0  ;;  %v176_v52 = vpop.f32.mrb[3].mxu1 }
  0xe3   :  { %220 = vst.msk [vmem:[#allocation2] sm:$0xff] %vm19_vm0, %v204_v45  ;;  %228 = vst.msk [vmem:[#allocation2 + $0x40] sm:$0xff] %vm19_vm0, %v212_v46  ;;  %v205_v53 = vadd.f32 %v144_v51, %v37_v43  ;;  %v213_v54 = vadd.f32 %v176_v52, %v45_v44 }
  0xe4   :  { %223 = vst.msk [vmem:[#allocation2 + $0x18] sm:$0xff] %vm19_vm0, %v207_v49  ;;  %231 = vst.msk [vmem:[#allocation2 + $0x58] sm:$0xff] %vm19_vm0, %v215_v50 }
  0xe5   :  { %221 = vst.msk [vmem:[#allocation2 + $0x8] sm:$0xff] %vm19_vm0, %v205_v53  ;;  %229 = vst.msk [vmem:[#allocation2 + $0x48] sm:$0xff] %vm19_vm0, %v213_v54 }
  0xe7   :  { %v327_v60 = vpop.f32.mrb[4].mxu0  ;;  %v335_v61 = vpop.f32.mrb[4].mxu1 }
  0xe8   :  { %v210_v0 = vadd.f32 %v327_v60, %v42_v55  ;;  %v218_v1 = vadd.f32 %v335_v61, %v50_v56  ;;  %v157_v2 = vpop.f32.mrb[5].mxu0  ;;  %v189_v3 = vpop.f32.mrb[5].mxu1 }
  0xe9   :  { %v241_v6 = vld [vmem:[#allocation2 + $0x10] sm:$0xff]  ;;  %v208_v8 = vadd.f32 %v157_v2, %v40_v57  ;;  %v216_v9 = vadd.f32 %v189_v3, %v48_v58  ;;  %v328_v10 = vpop.f32.mrb[6].mxu0  ;;  %v336_v11 = vpop.f32.mrb[6].mxu1 }
  0xea   :  { %v249_v7 = vld [vmem:[#allocation2 + $0x50] sm:$0xff]  ;;  %v264_v12 = vadd.f32 %v458_v59, %v241_v6  ;;  %v239_v14 = vld [vmem:[#allocation2] sm:$0xff]  ;;  %226 = vst.msk [vmem:[#allocation2 + $0x30] sm:$0xff] %vm19_vm0, %v210_v0  ;;  %234 = vst.msk [vmem:[#allocation2 + $0x70] sm:$0xff] %vm19_vm0, %v218_v1  ;;  %v211_v16 = vadd.f32 %v328_v10, %v43_v62  ;;  %v219_v17 = vadd.f32 %v336_v11, %v51_v63  ;;  %v160_v18 = vpop.f32.mrb[7].mxu0  ;;  %v192_v19 = vpop.f32.mrb[7].mxu1 }
  0xeb   :  { %v272_v13 = vadd.f32 %v458_v59, %v249_v7  ;;  %v247_v15 = vld [vmem:[#allocation2 + $0x40] sm:$0xff]  ;;  %v262_v20 = vadd.f32 %v458_v59, %v239_v14  ;;  %v242_v22 = vld [vmem:[#allocation2 + $0x18] sm:$0xff]  ;;  %224 = vst.msk [vmem:[#allocation2 + $0x20] sm:$0xff] %vm19_vm0, %v208_v8  ;;  %232 = vst.msk [vmem:[#allocation2 + $0x60] sm:$0xff] %vm19_vm0, %v216_v9  ;;  %v209_v24 = vadd.f32 %v160_v18, %v41_v4 }
  0xec   :  { %v270_v21 = vadd.f32 %v458_v59, %v247_v15  ;;  %v250_v23 = vld [vmem:[#allocation2 + $0x58] sm:$0xff]  ;;  %v217_v25 = vadd.f32 %v192_v19, %v49_v5  ;;  %280 = vst.msk [vmem:[%s551_s3 + $0x10] sm:$0xff] %vm19_vm0, %v264_v12  ;;  %v265_v26 = vadd.f32 %v458_v59, %v242_v22  ;;  %v240_v28 = vld [vmem:[#allocation2 + $0x8] sm:$0xff]  ;;  %227 = vst.msk [vmem:[#allocation2 + $0x38] sm:$0xff] %vm19_vm0, %v211_v16 }
  0xed   :  { %288 = vst.msk [vmem:[%s551_s3 + $0x50] sm:$0xff] %vm19_vm0, %v272_v13  ;;  %v273_v27 = vadd.f32 %v458_v59, %v250_v23  ;;  %v248_v29 = vld [vmem:[#allocation2 + $0x48] sm:$0xff]  ;;  %235 = vst.msk [vmem:[#allocation2 + $0x78] sm:$0xff] %vm19_vm0, %v219_v17  ;;  %v263_v30 = vadd.f32 %v458_v59, %v240_v28 }
  0xee   :  { %278 = vst.msk [vmem:[%s551_s3] sm:$0xff] %vm19_vm0, %v262_v20  ;;  %286 = vst.msk [vmem:[%s551_s3 + $0x40] sm:$0xff] %vm19_vm0, %v270_v21  ;;  %v271_v31 = vadd.f32 %v458_v59, %v248_v29 }
  0xef   :  { %225 = vst.msk [vmem:[#allocation2 + $0x28] sm:$0xff] %vm19_vm0, %v209_v24  ;;  %233 = vst.msk [vmem:[#allocation2 + $0x68] sm:$0xff] %vm19_vm0, %v217_v25 }
  0xf0   :  { %281 = vst.msk [vmem:[%s551_s3 + $0x18] sm:$0xff] %vm19_vm0, %v265_v26  ;;  %289 = vst.msk [vmem:[%s551_s3 + $0x58] sm:$0xff] %vm19_vm0, %v273_v27 }
  0xf1   :  { %279 = vst.msk [vmem:[%s551_s3 + $0x8] sm:$0xff] %vm19_vm0, %v263_v30  ;;  %287 = vst.msk [vmem:[%s551_s3 + $0x48] sm:$0xff] %vm19_vm0, %v271_v31  ;;  %v245_v32 = vld [vmem:[#allocation2 + $0x30] sm:$0xff] }
  0xf2   :  { %v253_v33 = vld [vmem:[#allocation2 + $0x70] sm:$0xff]  ;;  %v268_v34 = vadd.f32 %v458_v59, %v245_v32  ;;  %v243_v36 = vld [vmem:[#allocation2 + $0x20] sm:$0xff] }
  0xf3   :  { %v276_v35 = vadd.f32 %v458_v59, %v253_v33  ;;  %v251_v37 = vld [vmem:[#allocation2 + $0x60] sm:$0xff]  ;;  %v266_v38 = vadd.f32 %v458_v59, %v243_v36  ;;  %v246_v40 = vld [vmem:[#allocation2 + $0x38] sm:$0xff] }
  0xf4   :  { %v274_v39 = vadd.f32 %v458_v59, %v251_v37  ;;  %v254_v41 = vld [vmem:[#allocation2 + $0x78] sm:$0xff]  ;;  %284 = vst.msk [vmem:[%s551_s3 + $0x30] sm:$0xff] %vm19_vm0, %v268_v34  ;;  %v269_v42 = vadd.f32 %v458_v59, %v246_v40 }
  0xf5   :  { %292 = vst.msk [vmem:[%s551_s3 + $0x70] sm:$0xff] %vm19_vm0, %v276_v35  ;;  %v277_v43 = vadd.f32 %v458_v59, %v254_v41  ;;  %282 = vst.msk [vmem:[%s551_s3 + $0x20] sm:$0xff] %vm19_vm0, %v266_v38 }
  0xf6   :  { %v244_v44 = vld [vmem:[#allocation2 + $0x28] sm:$0xff]  ;;  %290 = vst.msk [vmem:[%s551_s3 + $0x60] sm:$0xff] %vm19_vm0, %v274_v39  ;;  %285 = vst.msk [vmem:[%s551_s3 + $0x38] sm:$0xff] %vm19_vm0, %v269_v42 }
  0xf7   :  { %v252_v45 = vld [vmem:[#allocation2 + $0x68] sm:$0xff]  ;;  %v267_v46 = vadd.f32 %v458_v59, %v244_v44  ;;  %293 = vst.msk [vmem:[%s551_s3 + $0x78] sm:$0xff] %vm19_vm0, %v277_v43 }
  0xf8   :  { %v275_v47 = vadd.f32 %v458_v59, %v252_v45 }
  0xf9   :  { %283 = vst.msk [vmem:[%s551_s3 + $0x28] sm:$0xff] %vm19_vm0, %v267_v46 }
  0xfa   :  { %291 = vst.msk [vmem:[%s551_s3 + $0x68] sm:$0xff] %vm19_vm0, %v275_v47 }

// kernel: decoder_forward.22
= control target key start
LH: loop header
LB: loop body
LE: loop exit
PB: predicated region body
PF: predicated region fallthrough
CT: control target
= control target key end

     0   :  { %vm19_vm0 = vcmask 523264   ;;  %v343_v3 = vmov 0.0   ;;  %vm82_vm1 = vcmask 261120   ;;  %s549_s1 = inlined_call_operand.vmem [shape: f32[32,64], index: 1, kind: input, shape index: {}]   ;;  %s550_s0 = inlined_call_operand.vmem [shape: f32[128,32], index: 0, kind: input, shape index: {}]   ;;  %s551_s2 = inlined_call_operand.vmem [shape: f32[1,64], index: 2, kind: input, shape index: {}]   ;;  %s552_s3 = inlined_call_operand.vmem [shape: f32[128,64], index: 3, kind: output, shape index: {}]  }
   0x1   :  { %v76_v0 = vld [vmem:[%s549_s1] sm:$0xff]  ;;  %v77_v1 = vld [vmem:[%s549_s1 + $0x8] sm:$0xff]  ;;  %v78_v2 = vld [vmem:[%s549_s1 + $0x10] sm:$0xff]  ;;  %22 = vst.msk [vmem:[#allocation2 + $0x10] sm:$0xff] %vm19_vm0, %v343_v3 }
   0x2   :  { %20 = vst.msk [vmem:[#allocation2] sm:$0xff] %vm19_vm0, %v343_v3  ;;  %21 = vst.msk [vmem:[#allocation2 + $0x8] sm:$0xff] %vm19_vm0, %v343_v3  ;;  %v80_v4 = vpack.c.bf16 %v77_v1, %v76_v0  ;;  %v79_v5 = vld [vmem:[%s549_s1 + $0x18] sm:$0xff]  ;;  %v52_v6 = vld [vmem:[%s550_s0] sm:$0xff] }
   0x3   :  { %23 = vst.msk [vmem:[#allocation2 + $0x18] sm:$0xff] %vm19_vm0, %v343_v3  ;;  %24 = vst.msk [vmem:[#allocation2 + $0x20] sm:$0xff] %vm19_vm0, %v343_v3  ;;  %v53_v7 = vld [vmem:[%s550_s0 + $0x8] sm:$0xff]  ;;  %v81_v8 = vpack.c.bf16 %v79_v5, %v78_v2  ;;  %v60_v10 = vld [vmem:[%s550_s0 + $0x40] sm:$0xff] }
   0x4   :  { %25 = vst.msk [vmem:[#allocation2 + $0x28] sm:$0xff] %vm19_vm0, %v343_v3  ;;  %26 = vst.msk [vmem:[#allocation2 + $0x30] sm:$0xff] %vm19_vm0, %v343_v3  ;;  %v68_v9 = vpack.c.bf16 %v53_v7, %v52_v6  ;;  %v61_v11 = vld [vmem:[%s550_s0 + $0x48] sm:$0xff]  ;;  %318 = vmatprep.subr.bf16.mxu0 %v80_v4  ;;  %338 = vmatprep.subr.bf16.mxu1 %v80_v4  ;;  %v54_v13 = vld [vmem:[%s550_s0 + $0x10] sm:$0xff] }
   0x5   :  { %27 = vst.msk [vmem:[#allocation2 + $0x38] sm:$0xff] %vm19_vm0, %v343_v3  ;;  %28 = vst.msk [vmem:[#allocation2 + $0x40] sm:$0xff] %vm19_vm0, %v343_v3  ;;  %v72_v12 = vpack.c.bf16 %v61_v11, %v60_v10  ;;  %v55_v14 = vld [vmem:[%s550_s0 + $0x18] sm:$0xff]  ;;  %319 = vmatpush3.bf16.msra.mxu0 %v80_v4  ;;  %340 = vmatpush3.bf16.msra.mxu1 %v80_v4  ;;  %v62_v15 = vld [vmem:[%s550_s0 + $0x50] sm:$0xff] }
   0x6   :  { %29 = vst.msk [vmem:[#allocation2 + $0x48] sm:$0xff] %vm19_vm0, %v343_v3  ;;  %30 = vst.msk [vmem:[#allocation2 + $0x50] sm:$0xff] %vm19_vm0, %v343_v3  ;;  %v63_v16 = vld [vmem:[%s550_s0 + $0x58] sm:$0xff]  ;;  %v56_v17 = vld [vmem:[%s550_s0 + $0x20] sm:$0xff]  ;;  %320 = vmatprep.subr.bf16.mxu0 %v81_v8  ;;  %339 = vmatprep.subr.bf16.mxu1 %v81_v8  ;;  %v69_v21 = vpack.c.bf16 %v55_v14, %v54_v13 }
   0x7   :  { %31 = vst.msk [vmem:[#allocation2 + $0x58] sm:$0xff] %vm19_vm0, %v343_v3  ;;  %32 = vst.msk [vmem:[#allocation2 + $0x60] sm:$0xff] %vm19_vm0, %v343_v3  ;;  %v57_v18 = vld [vmem:[%s550_s0 + $0x28] sm:$0xff]  ;;  %v64_v19 = vld [vmem:[%s550_s0 + $0x60] sm:$0xff]  ;;  %322 = vmatprep.mubr.msk.bf16.mxu0 %vm82_vm1, %v68_v9  ;;  %330 = vmatprep.mubr.msk.bf16.mxu1 %vm82_vm1, %v72_v12  ;;  %v73_v22 = vpack.c.bf16 %v63_v16, %v62_v15 }
   0x8   :  { %33 = vst.msk [vmem:[#allocation2 + $0x68] sm:$0xff] %vm19_vm0, %v343_v3  ;;  %34 = vst.msk [vmem:[#allocation2 + $0x70] sm:$0xff] %vm19_vm0, %v343_v3  ;;  %v65_v20 = vld [vmem:[%s550_s0 + $0x68] sm:$0xff]  ;;  %v70_v23 = vpack.c.bf16 %v57_v18, %v56_v17  ;;  %v58_v25 = vld [vmem:[%s550_s0 + $0x30] sm:$0xff] }
   0x9   :  { %35 = vst.msk [vmem:[#allocation2 + $0x78] sm:$0xff] %vm19_vm0, %v343_v3  ;;  %321 = vmatpush3.bf16.msra.mxu0 %v81_v8  ;;  %341 = vmatpush3.bf16.msra.mxu1 %v81_v8  ;;  %v74_v24 = vpack.c.bf16 %v65_v20, %v64_v19  ;;  %v59_v26 = vld [vmem:[%s550_s0 + $0x38] sm:$0xff]  ;;  %v66_v27 = vld [vmem:[%s550_s0 + $0x70] sm:$0xff]  ;;  %v36_v33 = vld [vmem:[#allocation2] sm:$0xff] }
   0xa   :  { %v67_v28 = vld [vmem:[%s550_s0 + $0x78] sm:$0xff]  ;;  %v71_v29 = vpack.c.bf16 %v59_v26, %v58_v25  ;;  %v38_v31 = vld [vmem:[#allocation2 + $0x10] sm:$0xff]  ;;  %v37_v43 = vld [vmem:[#allocation2 + $0x8] sm:$0xff] }
   0xb   :  { %v75_v30 = vpack.c.bf16 %v67_v28, %v66_v27  ;;  %v39_v37 = vld [vmem:[#allocation2 + $0x18] sm:$0xff]  ;;  %v42_v55 = vld [vmem:[#allocation2 + $0x30] sm:$0xff]  ;;  %v40_v57 = vld [vmem:[#allocation2 + $0x20] sm:$0xff] }
   0xc   :  { %323 = vmatmul.mubr.msk.bf16.vlgmr.msra.gmra.mrb[0].mxu0 %vm82_vm1, %v69_v21  ;;  %331 = vmatmul.mubr.msk.bf16.vlgmr.msra.gmra.mrb[0].mxu1 %vm82_vm1, %v73_v22  ;;  %v44_v34 = vld [vmem:[#allocation2 + $0x40] sm:$0xff]  ;;  %v43_v62 = vld [vmem:[#allocation2 + $0x38] sm:$0xff]  ;;  %v41_v4 = vld [vmem:[#allocation2 + $0x28] sm:$0xff] }
   0xd   :  { %326 = vmatprep.mubr.msk.bf16.mxu0 %vm82_vm1, %v70_v23  ;;  %334 = vmatprep.mubr.msk.bf16.mxu1 %vm82_vm1, %v74_v24  ;;  %v46_v32 = vld [vmem:[#allocation2 + $0x50] sm:$0xff]  ;;  %v45_v44 = vld [vmem:[#allocation2 + $0x48] sm:$0xff]  ;;  %v459_v59 = vld [vmem:[%s551_s2] ss:$0 sm:$0xff] }
   0xe   :  { %v47_v38 = vld [vmem:[#allocation2 + $0x58] sm:$0xff]  ;;  %v48_v58 = vld [vmem:[#allocation2 + $0x60] sm:$0xff] }
   0xf   :  { %v50_v56 = vld [vmem:[#allocation2 + $0x70] sm:$0xff]  ;;  %v49_v5 = vld [vmem:[#allocation2 + $0x68] sm:$0xff] }
  0x10   :  { %v51_v63 = vld [vmem:[#allocation2 + $0x78] sm:$0xff] }
  0x14   :  { %327 = vmatmul.mubr.msk.bf16.gmra.mrb[4].mxu0 %vm82_vm1, %v71_v29  ;;  %335 = vmatmul.mubr.msk.bf16.gmra.mrb[4].mxu1 %vm82_vm1, %v75_v30 }
  0xdf   :  { %v324_v35 = vpop.f32.mrb[0].mxu0  ;;  %v332_v36 = vpop.f32.mrb[0].mxu1 }
  0xe0   :  { %v206_v39 = vadd.f32 %v324_v35, %v38_v31  ;;  %v214_v40 = vadd.f32 %v332_v36, %v46_v32  ;;  %v141_v41 = vpop.f32.mrb[1].mxu0  ;;  %v173_v42 = vpop.f32.mrb[1].mxu1 }
  0xe1   :  { %v204_v45 = vadd.f32 %v141_v41, %v36_v33  ;;  %v212_v46 = vadd.f32 %v173_v42, %v44_v34  ;;  %v325_v47 = vpop.f32.mrb[2].mxu0  ;;  %v333_v48 = vpop.f32.mrb[2].mxu1 }
  0xe2   :  { %223 = vst.msk [vmem:[#allocation2 + $0x10] sm:$0xff] %vm19_vm0, %v206_v39  ;;  %231 = vst.msk [vmem:[#allocation2 + $0x50] sm:$0xff] %vm19_vm0, %v214_v40  ;;  %v207_v49 = vadd.f32 %v325_v47, %v39_v37  ;;  %v215_v50 = vadd.f32 %v333_v48, %v47_v38  ;;  %v144_v51 = vpop.f32.mrb[3].mxu0  ;;  %v176_v52 = vpop.f32.mrb[3].mxu1 }
  0xe3   :  { %221 = vst.msk [vmem:[#allocation2] sm:$0xff] %vm19_vm0, %v204_v45  ;;  %229 = vst.msk [vmem:[#allocation2 + $0x40] sm:$0xff] %vm19_vm0, %v212_v46  ;;  %v205_v53 = vadd.f32 %v144_v51, %v37_v43  ;;  %v213_v54 = vadd.f32 %v176_v52, %v45_v44 }
  0xe4   :  { %224 = vst.msk [vmem:[#allocation2 + $0x18] sm:$0xff] %vm19_vm0, %v207_v49  ;;  %232 = vst.msk [vmem:[#allocation2 + $0x58] sm:$0xff] %vm19_vm0, %v215_v50 }
  0xe5   :  { %222 = vst.msk [vmem:[#allocation2 + $0x8] sm:$0xff] %vm19_vm0, %v205_v53  ;;  %230 = vst.msk [vmem:[#allocation2 + $0x48] sm:$0xff] %vm19_vm0, %v213_v54 }
  0xe7   :  { %v328_v60 = vpop.f32.mrb[4].mxu0  ;;  %v336_v61 = vpop.f32.mrb[4].mxu1 }
  0xe8   :  { %v210_v0 = vadd.f32 %v328_v60, %v42_v55  ;;  %v218_v1 = vadd.f32 %v336_v61, %v50_v56  ;;  %v157_v2 = vpop.f32.mrb[5].mxu0  ;;  %v189_v3 = vpop.f32.mrb[5].mxu1 }
  0xe9   :  { %v242_v6 = vld [vmem:[#allocation2 + $0x10] sm:$0xff]  ;;  %v208_v8 = vadd.f32 %v157_v2, %v40_v57  ;;  %v216_v9 = vadd.f32 %v189_v3, %v48_v58  ;;  %v329_v10 = vpop.f32.mrb[6].mxu0  ;;  %v337_v11 = vpop.f32.mrb[6].mxu1 }
  0xea   :  { %v250_v7 = vld [vmem:[#allocation2 + $0x50] sm:$0xff]  ;;  %v265_v12 = vadd.f32 %v459_v59, %v242_v6  ;;  %v240_v14 = vld [vmem:[#allocation2] sm:$0xff]  ;;  %227 = vst.msk [vmem:[#allocation2 + $0x30] sm:$0xff] %vm19_vm0, %v210_v0  ;;  %235 = vst.msk [vmem:[#allocation2 + $0x70] sm:$0xff] %vm19_vm0, %v218_v1  ;;  %v211_v16 = vadd.f32 %v329_v10, %v43_v62  ;;  %v219_v17 = vadd.f32 %v337_v11, %v51_v63  ;;  %v160_v18 = vpop.f32.mrb[7].mxu0  ;;  %v192_v19 = vpop.f32.mrb[7].mxu1 }
  0xeb   :  { %v273_v13 = vadd.f32 %v459_v59, %v250_v7  ;;  %v248_v15 = vld [vmem:[#allocation2 + $0x40] sm:$0xff]  ;;  %v263_v20 = vadd.f32 %v459_v59, %v240_v14  ;;  %v243_v22 = vld [vmem:[#allocation2 + $0x18] sm:$0xff]  ;;  %225 = vst.msk [vmem:[#allocation2 + $0x20] sm:$0xff] %vm19_vm0, %v208_v8  ;;  %233 = vst.msk [vmem:[#allocation2 + $0x60] sm:$0xff] %vm19_vm0, %v216_v9  ;;  %v209_v24 = vadd.f32 %v160_v18, %v41_v4 }
  0xec   :  { %v271_v21 = vadd.f32 %v459_v59, %v248_v15  ;;  %v251_v23 = vld [vmem:[#allocation2 + $0x58] sm:$0xff]  ;;  %v217_v25 = vadd.f32 %v192_v19, %v49_v5  ;;  %281 = vst.msk [vmem:[%s552_s3 + $0x10] sm:$0xff] %vm19_vm0, %v265_v12  ;;  %v266_v26 = vadd.f32 %v459_v59, %v243_v22  ;;  %v241_v28 = vld [vmem:[#allocation2 + $0x8] sm:$0xff]  ;;  %228 = vst.msk [vmem:[#allocation2 + $0x38] sm:$0xff] %vm19_vm0, %v211_v16 }
  0xed   :  { %289 = vst.msk [vmem:[%s552_s3 + $0x50] sm:$0xff] %vm19_vm0, %v273_v13  ;;  %v274_v27 = vadd.f32 %v459_v59, %v251_v23  ;;  %v249_v29 = vld [vmem:[#allocation2 + $0x48] sm:$0xff]  ;;  %236 = vst.msk [vmem:[#allocation2 + $0x78] sm:$0xff] %vm19_vm0, %v219_v17  ;;  %v264_v30 = vadd.f32 %v459_v59, %v241_v28 }
  0xee   :  { %279 = vst.msk [vmem:[%s552_s3] sm:$0xff] %vm19_vm0, %v263_v20  ;;  %287 = vst.msk [vmem:[%s552_s3 + $0x40] sm:$0xff] %vm19_vm0, %v271_v21  ;;  %v272_v31 = vadd.f32 %v459_v59, %v249_v29 }
  0xef   :  { %226 = vst.msk [vmem:[#allocation2 + $0x28] sm:$0xff] %vm19_vm0, %v209_v24  ;;  %234 = vst.msk [vmem:[#allocation2 + $0x68] sm:$0xff] %vm19_vm0, %v217_v25 }
  0xf0   :  { %282 = vst.msk [vmem:[%s552_s3 + $0x18] sm:$0xff] %vm19_vm0, %v266_v26  ;;  %290 = vst.msk [vmem:[%s552_s3 + $0x58] sm:$0xff] %vm19_vm0, %v274_v27 }
  0xf1   :  { %280 = vst.msk [vmem:[%s552_s3 + $0x8] sm:$0xff] %vm19_vm0, %v264_v30  ;;  %288 = vst.msk [vmem:[%s552_s3 + $0x48] sm:$0xff] %vm19_vm0, %v272_v31  ;;  %v246_v32 = vld [vmem:[#allocation2 + $0x30] sm:$0xff] }
  0xf2   :  { %v254_v33 = vld [vmem:[#allocation2 + $0x70] sm:$0xff]  ;;  %v269_v34 = vadd.f32 %v459_v59, %v246_v32  ;;  %v244_v36 = vld [vmem:[#allocation2 + $0x20] sm:$0xff] }
  0xf3   :  { %v277_v35 = vadd.f32 %v459_v59, %v254_v33  ;;  %v252_v37 = vld [vmem:[#allocation2 + $0x60] sm:$0xff]  ;;  %v267_v38 = vadd.f32 %v459_v59, %v244_v36  ;;  %v247_v40 = vld [vmem:[#allocation2 + $0x38] sm:$0xff] }
  0xf4   :  { %v275_v39 = vadd.f32 %v459_v59, %v252_v37  ;;  %v255_v41 = vld [vmem:[#allocation2 + $0x78] sm:$0xff]  ;;  %285 = vst.msk [vmem:[%s552_s3 + $0x30] sm:$0xff] %vm19_vm0, %v269_v34  ;;  %v270_v42 = vadd.f32 %v459_v59, %v247_v40 }
  0xf5   :  { %293 = vst.msk [vmem:[%s552_s3 + $0x70] sm:$0xff] %vm19_vm0, %v277_v35  ;;  %v278_v43 = vadd.f32 %v459_v59, %v255_v41  ;;  %283 = vst.msk [vmem:[%s552_s3 + $0x20] sm:$0xff] %vm19_vm0, %v267_v38 }
  0xf6   :  { %v245_v44 = vld [vmem:[#allocation2 + $0x28] sm:$0xff]  ;;  %291 = vst.msk [vmem:[%s552_s3 + $0x60] sm:$0xff] %vm19_vm0, %v275_v39  ;;  %286 = vst.msk [vmem:[%s552_s3 + $0x38] sm:$0xff] %vm19_vm0, %v270_v42 }
  0xf7   :  { %v253_v45 = vld [vmem:[#allocation2 + $0x68] sm:$0xff]  ;;  %v268_v46 = vadd.f32 %v459_v59, %v245_v44  ;;  %294 = vst.msk [vmem:[%s552_s3 + $0x78] sm:$0xff] %vm19_vm0, %v278_v43 }
  0xf8   :  { %v276_v47 = vadd.f32 %v459_v59, %v253_v45 }
  0xf9   :  { %284 = vst.msk [vmem:[%s552_s3 + $0x28] sm:$0xff] %vm19_vm0, %v268_v46 }
  0xfa   :  { %292 = vst.msk [vmem:[%s552_s3 + $0x68] sm:$0xff] %vm19_vm0, %v276_v47 }

// kernel: decoder_forward.25
= control target key start
LH: loop header
LB: loop body
LE: loop exit
PB: predicated region body
PF: predicated region fallthrough
CT: control target
= control target key end

     0   :  { %vm19_vm0 = vcmask 523264   ;;  %v359_v3 = vmov 0.0   ;;  %vm82_vm1 = vcmask 261120   ;;  %s565_s1 = inlined_call_operand.vmem [shape: f32[32,64], index: 1, kind: input, shape index: {}]   ;;  %s566_s0 = inlined_call_operand.vmem [shape: f32[128,32], index: 0, kind: input, shape index: {}]   ;;  %s567_s2 = inlined_call_operand.vmem [shape: f32[1,64], index: 2, kind: input, shape index: {}]   ;;  %s568_s3 = inlined_call_operand.vmem [shape: f32[128,64], index: 3, kind: output, shape index: {}]  }
   0x1   :  { %v76_v0 = vld [vmem:[%s565_s1] sm:$0xff]  ;;  %v77_v1 = vld [vmem:[%s565_s1 + $0x8] sm:$0xff]  ;;  %v78_v2 = vld [vmem:[%s565_s1 + $0x10] sm:$0xff]  ;;  %22 = vst.msk [vmem:[#allocation2 + $0x10] sm:$0xff] %vm19_vm0, %v359_v3 }
   0x2   :  { %20 = vst.msk [vmem:[#allocation2] sm:$0xff] %vm19_vm0, %v359_v3  ;;  %21 = vst.msk [vmem:[#allocation2 + $0x8] sm:$0xff] %vm19_vm0, %v359_v3  ;;  %v80_v4 = vpack.c.bf16 %v77_v1, %v76_v0  ;;  %v79_v5 = vld [vmem:[%s565_s1 + $0x18] sm:$0xff]  ;;  %v52_v6 = vld [vmem:[%s566_s0] sm:$0xff] }
   0x3   :  { %23 = vst.msk [vmem:[#allocation2 + $0x18] sm:$0xff] %vm19_vm0, %v359_v3  ;;  %24 = vst.msk [vmem:[#allocation2 + $0x20] sm:$0xff] %vm19_vm0, %v359_v3  ;;  %v53_v7 = vld [vmem:[%s566_s0 + $0x8] sm:$0xff]  ;;  %v81_v8 = vpack.c.bf16 %v79_v5, %v78_v2  ;;  %v60_v10 = vld [vmem:[%s566_s0 + $0x40] sm:$0xff] }
   0x4   :  { %25 = vst.msk [vmem:[#allocation2 + $0x28] sm:$0xff] %vm19_vm0, %v359_v3  ;;  %26 = vst.msk [vmem:[#allocation2 + $0x30] sm:$0xff] %vm19_vm0, %v359_v3  ;;  %v68_v9 = vpack.c.bf16 %v53_v7, %v52_v6  ;;  %v61_v11 = vld [vmem:[%s566_s0 + $0x48] sm:$0xff]  ;;  %334 = vmatprep.subr.bf16.mxu0 %v80_v4  ;;  %354 = vmatprep.subr.bf16.mxu1 %v80_v4  ;;  %v54_v13 = vld [vmem:[%s566_s0 + $0x10] sm:$0xff] }
   0x5   :  { %27 = vst.msk [vmem:[#allocation2 + $0x38] sm:$0xff] %vm19_vm0, %v359_v3  ;;  %28 = vst.msk [vmem:[#allocation2 + $0x40] sm:$0xff] %vm19_vm0, %v359_v3  ;;  %v72_v12 = vpack.c.bf16 %v61_v11, %v60_v10  ;;  %v55_v14 = vld [vmem:[%s566_s0 + $0x18] sm:$0xff]  ;;  %335 = vmatpush3.bf16.msra.mxu0 %v80_v4  ;;  %356 = vmatpush3.bf16.msra.mxu1 %v80_v4  ;;  %v62_v15 = vld [vmem:[%s566_s0 + $0x50] sm:$0xff] }
   0x6   :  { %29 = vst.msk [vmem:[#allocation2 + $0x48] sm:$0xff] %vm19_vm0, %v359_v3  ;;  %30 = vst.msk [vmem:[#allocation2 + $0x50] sm:$0xff] %vm19_vm0, %v359_v3  ;;  %v63_v16 = vld [vmem:[%s566_s0 + $0x58] sm:$0xff]  ;;  %v56_v17 = vld [vmem:[%s566_s0 + $0x20] sm:$0xff]  ;;  %336 = vmatprep.subr.bf16.mxu0 %v81_v8  ;;  %355 = vmatprep.subr.bf16.mxu1 %v81_v8  ;;  %v69_v21 = vpack.c.bf16 %v55_v14, %v54_v13 }
   0x7   :  { %31 = vst.msk [vmem:[#allocation2 + $0x58] sm:$0xff] %vm19_vm0, %v359_v3  ;;  %32 = vst.msk [vmem:[#allocation2 + $0x60] sm:$0xff] %vm19_vm0, %v359_v3  ;;  %v57_v18 = vld [vmem:[%s566_s0 + $0x28] sm:$0xff]  ;;  %v64_v19 = vld [vmem:[%s566_s0 + $0x60] sm:$0xff]  ;;  %338 = vmatprep.mubr.msk.bf16.mxu0 %vm82_vm1, %v68_v9  ;;  %346 = vmatprep.mubr.msk.bf16.mxu1 %vm82_vm1, %v72_v12  ;;  %v73_v22 = vpack.c.bf16 %v63_v16, %v62_v15 }
   0x8   :  { %33 = vst.msk [vmem:[#allocation2 + $0x68] sm:$0xff] %vm19_vm0, %v359_v3  ;;  %34 = vst.msk [vmem:[#allocation2 + $0x70] sm:$0xff] %vm19_vm0, %v359_v3  ;;  %v65_v20 = vld [vmem:[%s566_s0 + $0x68] sm:$0xff]  ;;  %v70_v23 = vpack.c.bf16 %v57_v18, %v56_v17  ;;  %v58_v25 = vld [vmem:[%s566_s0 + $0x30] sm:$0xff] }
   0x9   :  { %35 = vst.msk [vmem:[#allocation2 + $0x78] sm:$0xff] %vm19_vm0, %v359_v3  ;;  %337 = vmatpush3.bf16.msra.mxu0 %v81_v8  ;;  %357 = vmatpush3.bf16.msra.mxu1 %v81_v8  ;;  %v74_v24 = vpack.c.bf16 %v65_v20, %v64_v19  ;;  %v59_v26 = vld [vmem:[%s566_s0 + $0x38] sm:$0xff]  ;;  %v66_v27 = vld [vmem:[%s566_s0 + $0x70] sm:$0xff]  ;;  %v36_v33 = vld [vmem:[#allocation2] sm:$0xff] }
   0xa   :  { %v67_v28 = vld [vmem:[%s566_s0 + $0x78] sm:$0xff]  ;;  %v71_v29 = vpack.c.bf16 %v59_v26, %v58_v25  ;;  %v38_v31 = vld [vmem:[#allocation2 + $0x10] sm:$0xff]  ;;  %v37_v43 = vld [vmem:[#allocation2 + $0x8] sm:$0xff] }
   0xb   :  { %v75_v30 = vpack.c.bf16 %v67_v28, %v66_v27  ;;  %v39_v37 = vld [vmem:[#allocation2 + $0x18] sm:$0xff]  ;;  %v42_v55 = vld [vmem:[#allocation2 + $0x30] sm:$0xff]  ;;  %v40_v57 = vld [vmem:[#allocation2 + $0x20] sm:$0xff] }
   0xc   :  { %339 = vmatmul.mubr.msk.bf16.vlgmr.msra.gmra.mrb[0].mxu0 %vm82_vm1, %v69_v21  ;;  %347 = vmatmul.mubr.msk.bf16.vlgmr.msra.gmra.mrb[0].mxu1 %vm82_vm1, %v73_v22  ;;  %v44_v34 = vld [vmem:[#allocation2 + $0x40] sm:$0xff]  ;;  %v43_v62 = vld [vmem:[#allocation2 + $0x38] sm:$0xff]  ;;  %v41_v4 = vld [vmem:[#allocation2 + $0x28] sm:$0xff] }
   0xd   :  { %342 = vmatprep.mubr.msk.bf16.mxu0 %vm82_vm1, %v70_v23  ;;  %350 = vmatprep.mubr.msk.bf16.mxu1 %vm82_vm1, %v74_v24  ;;  %v46_v32 = vld [vmem:[#allocation2 + $0x50] sm:$0xff]  ;;  %v45_v44 = vld [vmem:[#allocation2 + $0x48] sm:$0xff]  ;;  %v475_v59 = vld [vmem:[%s567_s2] ss:$0 sm:$0xff] }
   0xe   :  { %v47_v38 = vld [vmem:[#allocation2 + $0x58] sm:$0xff]  ;;  %v48_v58 = vld [vmem:[#allocation2 + $0x60] sm:$0xff] }
   0xf   :  { %v50_v56 = vld [vmem:[#allocation2 + $0x70] sm:$0xff]  ;;  %v49_v5 = vld [vmem:[#allocation2 + $0x68] sm:$0xff] }
  0x10   :  { %v51_v63 = vld [vmem:[#allocation2 + $0x78] sm:$0xff] }
  0x14   :  { %343 = vmatmul.mubr.msk.bf16.gmra.mrb[4].mxu0 %vm82_vm1, %v71_v29  ;;  %351 = vmatmul.mubr.msk.bf16.gmra.mrb[4].mxu1 %vm82_vm1, %v75_v30 }
  0xdf   :  { %v340_v35 = vpop.f32.mrb[0].mxu0  ;;  %v348_v36 = vpop.f32.mrb[0].mxu1 }
  0xe0   :  { %v206_v39 = vadd.f32 %v340_v35, %v38_v31  ;;  %v214_v40 = vadd.f32 %v348_v36, %v46_v32  ;;  %v141_v41 = vpop.f32.mrb[1].mxu0  ;;  %v173_v42 = vpop.f32.mrb[1].mxu1 }
  0xe1   :  { %v204_v45 = vadd.f32 %v141_v41, %v36_v33  ;;  %v212_v46 = vadd.f32 %v173_v42, %v44_v34  ;;  %v341_v47 = vpop.f32.mrb[2].mxu0  ;;  %v349_v48 = vpop.f32.mrb[2].mxu1 }
  0xe2   :  { %223 = vst.msk [vmem:[#allocation2 + $0x10] sm:$0xff] %vm19_vm0, %v206_v39  ;;  %231 = vst.msk [vmem:[#allocation2 + $0x50] sm:$0xff] %vm19_vm0, %v214_v40  ;;  %v207_v49 = vadd.f32 %v341_v47, %v39_v37  ;;  %v215_v50 = vadd.f32 %v349_v48, %v47_v38  ;;  %v144_v51 = vpop.f32.mrb[3].mxu0  ;;  %v176_v52 = vpop.f32.mrb[3].mxu1 }
  0xe3   :  { %221 = vst.msk [vmem:[#allocation2] sm:$0xff] %vm19_vm0, %v204_v45  ;;  %229 = vst.msk [vmem:[#allocation2 + $0x40] sm:$0xff] %vm19_vm0, %v212_v46  ;;  %v205_v53 = vadd.f32 %v144_v51, %v37_v43  ;;  %v213_v54 = vadd.f32 %v176_v52, %v45_v44 }
  0xe4   :  { %224 = vst.msk [vmem:[#allocation2 + $0x18] sm:$0xff] %vm19_vm0, %v207_v49  ;;  %232 = vst.msk [vmem:[#allocation2 + $0x58] sm:$0xff] %vm19_vm0, %v215_v50 }
  0xe5   :  { %222 = vst.msk [vmem:[#allocation2 + $0x8] sm:$0xff] %vm19_vm0, %v205_v53  ;;  %230 = vst.msk [vmem:[#allocation2 + $0x48] sm:$0xff] %vm19_vm0, %v213_v54 }
  0xe7   :  { %v344_v60 = vpop.f32.mrb[4].mxu0  ;;  %v352_v61 = vpop.f32.mrb[4].mxu1 }
  0xe8   :  { %v210_v0 = vadd.f32 %v344_v60, %v42_v55  ;;  %v218_v1 = vadd.f32 %v352_v61, %v50_v56  ;;  %v157_v2 = vpop.f32.mrb[5].mxu0  ;;  %v189_v3 = vpop.f32.mrb[5].mxu1 }
  0xe9   :  { %v242_v6 = vld [vmem:[#allocation2 + $0x10] sm:$0xff]  ;;  %v208_v8 = vadd.f32 %v157_v2, %v40_v57  ;;  %v216_v9 = vadd.f32 %v189_v3, %v48_v58  ;;  %v345_v10 = vpop.f32.mrb[6].mxu0  ;;  %v353_v11 = vpop.f32.mrb[6].mxu1 }
  0xea   :  { %v250_v7 = vld [vmem:[#allocation2 + $0x50] sm:$0xff]  ;;  %v265_v12 = vadd.f32 %v475_v59, %v242_v6  ;;  %v240_v14 = vld [vmem:[#allocation2] sm:$0xff]  ;;  %227 = vst.msk [vmem:[#allocation2 + $0x30] sm:$0xff] %vm19_vm0, %v210_v0  ;;  %235 = vst.msk [vmem:[#allocation2 + $0x70] sm:$0xff] %vm19_vm0, %v218_v1  ;;  %v211_v16 = vadd.f32 %v345_v10, %v43_v62  ;;  %v219_v17 = vadd.f32 %v353_v11, %v51_v63  ;;  %v160_v18 = vpop.f32.mrb[7].mxu0  ;;  %v192_v19 = vpop.f32.mrb[7].mxu1 }
  0xeb   :  { %v273_v13 = vadd.f32 %v475_v59, %v250_v7  ;;  %v248_v15 = vld [vmem:[#allocation2 + $0x40] sm:$0xff]  ;;  %v263_v20 = vadd.f32 %v475_v59, %v240_v14  ;;  %v243_v22 = vld [vmem:[#allocation2 + $0x18] sm:$0xff]  ;;  %225 = vst.msk [vmem:[#allocation2 + $0x20] sm:$0xff] %vm19_vm0, %v208_v8  ;;  %233 = vst.msk [vmem:[#allocation2 + $0x60] sm:$0xff] %vm19_vm0, %v216_v9  ;;  %v209_v24 = vadd.f32 %v160_v18, %v41_v4 }
  0xec   :  { %v271_v21 = vadd.f32 %v475_v59, %v248_v15  ;;  %v251_v23 = vld [vmem:[#allocation2 + $0x58] sm:$0xff]  ;;  %v217_v25 = vadd.f32 %v192_v19, %v49_v5  ;;  %v281_v26 = vmax.f32 %v265_v12, 0.0  ;;  %v266_v28 = vadd.f32 %v475_v59, %v243_v22  ;;  %v241_v30 = vld [vmem:[#allocation2 + $0x8] sm:$0xff]  ;;  %228 = vst.msk [vmem:[#allocation2 + $0x38] sm:$0xff] %vm19_vm0, %v211_v16  ;;  %236 = vst.msk [vmem:[#allocation2 + $0x78] sm:$0xff] %vm19_vm0, %v219_v17 }
  0xed   :  { %v289_v27 = vmax.f32 %v273_v13, 0.0  ;;  %v274_v29 = vadd.f32 %v475_v59, %v251_v23  ;;  %v249_v31 = vld [vmem:[#allocation2 + $0x48] sm:$0xff]  ;;  %v279_v32 = vmax.f32 %v263_v20, 0.0  ;;  %v264_v34 = vadd.f32 %v475_v59, %v241_v30  ;;  %226 = vst.msk [vmem:[#allocation2 + $0x28] sm:$0xff] %vm19_vm0, %v209_v24 }
  0xee   :  { %v287_v33 = vmax.f32 %v271_v21, 0.0  ;;  %v272_v35 = vadd.f32 %v475_v59, %v249_v31  ;;  %234 = vst.msk [vmem:[#allocation2 + $0x68] sm:$0xff] %vm19_vm0, %v217_v25  ;;  %297 = vst.msk [vmem:[%s568_s3 + $0x10] sm:$0xff] %vm19_vm0, %v281_v26  ;;  %v282_v36 = vmax.f32 %v266_v28, 0.0 }
  0xef   :  { %305 = vst.msk [vmem:[%s568_s3 + $0x50] sm:$0xff] %vm19_vm0, %v289_v27  ;;  %v290_v37 = vmax.f32 %v274_v29, 0.0  ;;  %295 = vst.msk [vmem:[%s568_s3] sm:$0xff] %vm19_vm0, %v279_v32  ;;  %v280_v38 = vmax.f32 %v264_v34, 0.0 }
  0xf0   :  { %303 = vst.msk [vmem:[%s568_s3 + $0x40] sm:$0xff] %vm19_vm0, %v287_v33  ;;  %v288_v39 = vmax.f32 %v272_v35, 0.0  ;;  %298 = vst.msk [vmem:[%s568_s3 + $0x18] sm:$0xff] %vm19_vm0, %v282_v36 }
  0xf1   :  { %306 = vst.msk [vmem:[%s568_s3 + $0x58] sm:$0xff] %vm19_vm0, %v290_v37  ;;  %296 = vst.msk [vmem:[%s568_s3 + $0x8] sm:$0xff] %vm19_vm0, %v280_v38  ;;  %v246_v40 = vld [vmem:[#allocation2 + $0x30] sm:$0xff] }
  0xf2   :  { %304 = vst.msk [vmem:[%s568_s3 + $0x48] sm:$0xff] %vm19_vm0, %v288_v39  ;;  %v254_v41 = vld [vmem:[#allocation2 + $0x70] sm:$0xff]  ;;  %v269_v42 = vadd.f32 %v475_v59, %v246_v40  ;;  %v244_v44 = vld [vmem:[#allocation2 + $0x20] sm:$0xff] }
  0xf3   :  { %v277_v43 = vadd.f32 %v475_v59, %v254_v41  ;;  %v252_v45 = vld [vmem:[#allocation2 + $0x60] sm:$0xff]  ;;  %v267_v46 = vadd.f32 %v475_v59, %v244_v44  ;;  %v247_v48 = vld [vmem:[#allocation2 + $0x38] sm:$0xff] }
  0xf4   :  { %v275_v47 = vadd.f32 %v475_v59, %v252_v45  ;;  %v255_v49 = vld [vmem:[#allocation2 + $0x78] sm:$0xff]  ;;  %v285_v50 = vmax.f32 %v269_v42, 0.0  ;;  %v270_v52 = vadd.f32 %v475_v59, %v247_v48  ;;  %v245_v54 = vld [vmem:[#allocation2 + $0x28] sm:$0xff] }
  0xf5   :  { %v293_v51 = vmax.f32 %v277_v43, 0.0  ;;  %v278_v53 = vadd.f32 %v475_v59, %v255_v49  ;;  %v253_v55 = vld [vmem:[#allocation2 + $0x68] sm:$0xff]  ;;  %v283_v56 = vmax.f32 %v267_v46, 0.0  ;;  %v268_v58 = vadd.f32 %v475_v59, %v245_v54 }
  0xf6   :  { %v291_v57 = vmax.f32 %v275_v47, 0.0  ;;  %v276_v60 = vadd.f32 %v475_v59, %v253_v55  ;;  %301 = vst.msk [vmem:[%s568_s3 + $0x30] sm:$0xff] %vm19_vm0, %v285_v50  ;;  %v286_v61 = vmax.f32 %v270_v52, 0.0 }
  0xf7   :  { %309 = vst.msk [vmem:[%s568_s3 + $0x70] sm:$0xff] %vm19_vm0, %v293_v51  ;;  %v294_v62 = vmax.f32 %v278_v53, 0.0  ;;  %299 = vst.msk [vmem:[%s568_s3 + $0x20] sm:$0xff] %vm19_vm0, %v283_v56  ;;  %v284_v59 = vmax.f32 %v268_v58, 0.0 }
  0xf8   :  { %307 = vst.msk [vmem:[%s568_s3 + $0x60] sm:$0xff] %vm19_vm0, %v291_v57  ;;  %v292_v63 = vmax.f32 %v276_v60, 0.0  ;;  %302 = vst.msk [vmem:[%s568_s3 + $0x38] sm:$0xff] %vm19_vm0, %v286_v61 }
  0xf9   :  { %310 = vst.msk [vmem:[%s568_s3 + $0x78] sm:$0xff] %vm19_vm0, %v294_v62  ;;  %300 = vst.msk [vmem:[%s568_s3 + $0x28] sm:$0xff] %vm19_vm0, %v284_v59 }
  0xfa   :  { %308 = vst.msk [vmem:[%s568_s3 + $0x68] sm:$0xff] %vm19_vm0, %v292_v63 }

// kernel: decoder_forward.23
= control target key start
LH: loop header
LB: loop body
LE: loop exit
PB: predicated region body
PF: predicated region fallthrough
CT: control target
= control target key end

     0   :  { %s865_s15 = smov 0   ;;  %s867_s16 = smov 0   ;;  %s943_s0 = inlined_call_operand.vmem [shape: f32[2,4,8,8], index: 0, kind: input, shape index: {}]   ;;  %s944_s1 = inlined_call_operand.vmem [shape: f32[2,4,8,8], index: 1, kind: input, shape index: {}]   ;;  %s945_s2 = inlined_call_operand.vmem [shape: f32[2,4,8,8], index: 2, kind: input, shape index: {}]   ;;  %s946_s3 = inlined_call_operand.vmem [shape: f32[2,8,8], index: 3, kind: input, shape index: {}]   ;;  %s947_s4 = inlined_call_operand.vmem [shape: f32[2,4,8,8], index: 4, kind: output, shape index: {}]  }
   0x1   :  { %s869_s17 = smov 0   ;;  %s871_s18 = smov 0  }
   0x2   :  { %s873_s19 = smov 0  }
   0x3 LB: > { %s36_s20 = sadd.s32 1, %s826_s17  ;;  %s40_s21 = sadd.s32 1, %s830_s18  ;;  %s834_s19 = sphi %s873_s19, %s14_s19   ;;  %s830_s18 = sphi %s871_s18, %s951_s18   ;;  %s826_s17 = sphi %s869_s17, %s950_s17   ;;  %s822_s16 = sphi %s867_s16, %s949_s16   ;;  %s818_s15 = sphi %s865_s15, %s948_s15  }
   0x4   : > { %p38_p0 = scmp.ge.s32.totalorder %s36_s20, 4  ;;  %p714_p1 = scmp.ge.s32.totalorder %s834_s19, 1 }
   0x5   : > { %p261_p2 = scmp.lt.s32.totalorder %s834_s19, 9 }
   0x6   : > { %s953_s20 = smov (%p38_p0, %s36_s20), 0  ;;  %s955_s21 = smov (!%p38_p0, %s40_s21), %s830_s18 }
   0x7   : > { %p262_p3 = pnand %p714_p1, %p261_p2  ;;  %p42_p4 = scmp.ge.s32.totalorder %s955_s21, 2 }
   0x8   : > { %p331_p5 = scmp.lt.s32.totalorder (!%p262_p3), %s822_s16, 1  ;;  %p333_p6 = scmp.lt.s32.totalorder (!%p262_p3), %s818_s15, 3  ;;  %vm393_vm0 = vcmask (!%p262_p3), 64512   ;;  %v836_v0 = vmov (!%p262_p3), 0.0   ;;  %vm837_vm1 = vmmov (!%p262_p3), 0   ;;  %vm390_vm2 = vcmask (!%p262_p3), 7168  }
   0x9   : > { %s957_s21 = smov (%p42_p4, %s955_s21), 0  ;;  %265 = sbr.rel (%p262_p3) target bundleno = 829 (0x33d), region = 36 }
   0xa   : > { %732 = vmatprep.subr.bf16.mxu0 (!%p262_p3), %v836_v0  ;;  %394 = vst.msk [vmem:[#allocation4] sm:$0xff] (!%p262_p3), %vm393_vm0, %v836_v0  ;;  %734 = vmatprep.mubr.msk.bf16.mxu0 (!%p262_p3), %vm837_vm1, %v836_v0  ;;  %v838_v7 = vmov (!%p262_p3), -inf   ;;  %v839_v15 = vmov (!%p262_p3), 0   ;;  %vm485_vm3 = vcmask (!%p262_p3), 1043456  }
   0xb   : > { %738 = vmatprep.subr.bf16.mxu1 (!%p262_p3), %v836_v0  ;;  %740 = vmatprep.mubr.msk.bf16.mxu1 (!%p262_p3), %vm837_vm1, %v836_v0  ;;  %391 = vst.msk [vmem:[#allocation2] sm:$0xff] (!%p262_p3), %vm390_vm2, %v838_v7  ;;  %392 = vst.msk [vmem:[#allocation3] sm:$0xff] (!%p262_p3), %vm390_vm2, %v836_v0 }
   0xc   : > { %788 = vset.pattern.permute.xlu0 (!%p262_p3), %v839_v15  ;;  %789 = vset.pattern.permute.xlu1 (!%p262_p3), %v839_v15 }
  0x10   : > { %s959_s16 = smov (!%p331_p5, %s822_s16), 1  ;;  %s961_s15 = smov (!%p333_p6, %s818_s15), 3 }
  0x11   : > { %s715_s22 = sshll.u32 %s959_s16, 2  ;;  %s721_s5 = sshll.u32 %s959_s16, 3  ;;  %v472_v36 = vld [vmem:[#allocation4] sm:$0xff] }
  0x12   : > { %s339_s23 = sadd.s32 %s715_s22, %s961_s15  ;;  %s373_s8 = scalar_lea.vmem %s946_s3, %s721_s5  ;;  %v448_v16 = vld [vmem:[#allocation2] sm:$0xff]  ;;  %v464_v31 = vld [vmem:[#allocation3] sm:$0xff] }
  0x13   : > { %s896_s24 = sshll.u32 %s339_s23, 3  ;;  %v400_v8 = vld [vmem:[%s373_s8] sm:$0xff] }
  0x14   : > { %s352_s27 = scalar_lea.vmem %s944_s1, %s896_s24  ;;  %s341_s30 = scalar_lea.vmem %s943_s0, %s896_s24 }
  0x15   : > { %v398_v1 = vld [vmem:[%s352_s27] sm:$0xff]  ;;  %s363_s11 = scalar_lea.vmem %s945_s2, %s896_s24  ;;  %s384_s14 = scalar_lea.vmem %s947_s4, %s896_s24 }
  0x16   : > { %v399_v2 = vpack.c.bf16 %v398_v1, %v398_v1  ;;  %v395_v3 = vld [vmem:[%s341_s30] sm:$0xff] }
  0x17   : > { %v396_v5 = vmul.f32 0.35355338, %v395_v3  ;;  %v480_v20 = vld [vmem:[%s363_s11] sm:$0xff] }
  0x18   : > { %v406_v4 = vsel %vm393_vm0, %v399_v2, 0  ;;  %v481_v21 = vpack.c.bf16 %v480_v20, %v480_v20 }
  0x19   : > { %733 = vmatpush3.bf16.xpose.msra.mxu0 %v406_v4  ;;  %v397_v6 = vpack.c.bf16 %v396_v5, %v396_v5 }
  0x1a   : > { %v487_v22 = vsel %vm485_vm3, %v481_v21, 0 }
  0x1b   : > { %739 = vmatpush3.bf16.msra.mxu1 %v487_v22 }
  0x20   : > { %735 = vmatmul.mubr.msk.bf16.vlgmr.msra.gmra.mrb[0].mxu0 %vm393_vm0, %v397_v6 }
  0xf3   : > { %v442_v9 = vpop.f32.mrb[0].mxu0 }
  0xf4   : > { %v443_v10 = vadd.f32 %v442_v9, %v400_v8  ;;  %v736_v11 = vpop.f32.mrb[1].mxu0 }
  0xf5   : > { %v445_v12 = vpop.f32.mrb[2].mxu0 }
  0xf6   : > { %v737_v13 = vpop.f32.mrb[3].mxu0  ;;  %v449_v14 = vsel %vm393_vm0, %v443_v10, -inf }
  0xf7   : > { %450 = vmax.xlane.f32.xlu0 %v449_v14 }
 0x184   : > { %v451_v17 = vpop.xlane.xlu0 %450 }
 0x185   : > { %v452_v18 = vmax.f32 %v448_v16, %v451_v17 }
 0x187   : > { %v453_v19 = vsub.f32 %v448_v16, %v452_v18  ;;  %531 = vst.msk [vmem:[#allocation2] sm:$0xff] %vm390_vm2, %v452_v18  ;;  %458 = vperm.xlu0 %788, %v452_v18  }
 0x189   : > { %v454_v29 = vmul.f32 1.442695, %v453_v19 }
 0x206   : > { %v459_v23 = vpop.permute.xlu0 %458 }
 0x207   : > { %v461_v24 = vsub.f32 %v443_v10, %v459_v23 }
 0x209   : > { %v462_v25 = vmul.f32 1.442695, %v461_v24 }
 0x20b   : > { %790 = vpow2.f32 %v462_v25 }
 0x20c   : > { %792 = vpow2.f32 %v454_v29 }
 0x215   : > { %v791_v26 = vpop.eup %790 }
 0x216   : > { %v466_v27 = vsel %vm393_vm0, %v791_v26, 0.0  ;;  %v479_v28 = vpack.c.bf16 %v791_v26, %v791_v26  ;;  %v793_v30 = vpop.eup %792 }
 0x217   : > { %467 = vadd.xlane.f32.xlu1 %v466_v27  ;;  %v465_v32 = vmul.f32 %v793_v30, %v464_v31 }
 0x218   : > { %741 = vmatmul.mubr.msk.bf16.vlgmr.msra.gmra.mrb[0].mxu1 %vm393_vm0, %v479_v28 }
 0x228   : > { %475 = vperm.xlu1 %789, %v793_v30  }
 0x2a4   : > { %v468_v33 = vpop.xlane.xlu1 %467 }
 0x2a5   : > { %v469_v34 = vadd.f32 %v468_v33, %v465_v32 }
 0x2a7   : > { %471 = vst.msk [vmem:[#allocation3] sm:$0xff] %vm390_vm2, %v469_v34 }
 0x2a8   : > { %v476_v37 = vpop.permute.xlu1 %475 }
 0x2a9   : > { %v478_v38 = vmul.f32 %v476_v37, %v472_v36 }
 0x2ae   : > { %v536_v35 = vld [vmem:[#allocation3] sm:$0xff] }
 0x2af   : > { %539 = vperm.xlu1 %789, %v536_v35  }
 0x2eb   : > { %v523_v39 = vpop.f32.mrb[0].mxu1 }
 0x2ec   : > { %v529_v40 = vadd.f32 %v523_v39, %v478_v38  ;;  %v742_v41 = vpop.f32.mrb[1].mxu1 }
 0x2ed   : > { %v526_v42 = vpop.f32.mrb[2].mxu1 }
 0x2ee   : > { %530 = vst.msk [vmem:[#allocation4] sm:$0xff] %vm393_vm0, %v529_v40  ;;  %v743_v43 = vpop.f32.mrb[3].mxu1 }
 0x2f5   : > { %v535_v46 = vld [vmem:[#allocation4] sm:$0xff] }
 0x32e   : > { %v540_v44 = vpop.permute.xlu1 %539 }
 0x32f   : > { %794 = vrcp.f32 %v540_v44 }
 0x339   : > { %v795_v45 = vpop.eup %794 }
 0x33a   : > { %v543_v47 = vmul.f32 %v795_v45, %v535_v46 }
 0x33c   : > { %544 = vst.msk [vmem:[%s384_s14] sm:$0xff] %vm393_vm0, %v543_v47 }
 0x33d PF: > { %s14_s19 = sadd.s32 1, %s834_s19   ;;  %s948_s15 = smov %s826_s17 }
 0x33e   : > { %p11_p7 = scmp.ge.s32.totalorder %s14_s19, 10   ;;  %s949_s16 = smov %s830_s18 }
 0x33f   : > { %s950_s17 = smov %s953_s20  ;;  %s951_s18 = smov %s957_s21 }
 0x340   :  { %13 = sbr.rel (!%p11_p7) target bundleno = 3 (0x3), region = 83 }

// kernel: decoder_forward.26
= control target key start
LH: loop header
LB: loop body
LE: loop exit
PB: predicated region body
PF: predicated region fallthrough
CT: control target
= control target key end

     0   :  { %vm28_vm0 = vcmask 261120   ;;  %v689_v3 = vmov 0.0   ;;  %vm97_vm1 = vcmask 523264   ;;  %s1188_s1 = inlined_call_operand.vmem [shape: f32[64,32], index: 1, kind: input, shape index: {}]   ;;  %s1189_s0 = inlined_call_operand.vmem [shape: f32[128,64], index: 0, kind: input, shape index: {}]   ;;  %s1190_s2 = inlined_call_operand.vmem [shape: f32[1,32], index: 2, kind: input, shape index: {}]   ;;  %s1191_s3 = inlined_call_operand.vmem [shape: f32[128,32], index: 3, kind: input, shape index: {}]   ;;  %s1192_s4 = inlined_call_operand.vmem [shape: f32[1,32], index: 4, kind: input, shape index: {}]   ;;  %s1193_s5 = inlined_call_operand.vmem [shape: f32[1,32], index: 5, kind: input, shape index: {}]   ;;  %s1194_s6 = inlined_call_operand.vmem [shape: f32[128,32], index: 6, kind: output, shape index: {}]  }
   0x1   :  { %v85_v0 = vld [vmem:[%s1188_s1] sm:$0xff]  ;;  %v86_v1 = vld [vmem:[%s1188_s1 + $0x8] sm:$0xff]  ;;  %v87_v2 = vld [vmem:[%s1188_s1 + $0x10] sm:$0xff]  ;;  %31 = vst.msk [vmem:[#allocation2 + $0x10] sm:$0xff] %vm28_vm0, %v689_v3 }
   0x2   :  { %29 = vst.msk [vmem:[#allocation2] sm:$0xff] %vm28_vm0, %v689_v3  ;;  %30 = vst.msk [vmem:[#allocation2 + $0x8] sm:$0xff] %vm28_vm0, %v689_v3  ;;  %v93_v4 = vpack.c.bf16 %v86_v1, %v85_v0  ;;  %v88_v5 = vld [vmem:[%s1188_s1 + $0x18] sm:$0xff]  ;;  %v89_v7 = vld [vmem:[%s1188_s1 + $0x20] sm:$0xff] }
   0x3   :  { %32 = vst.msk [vmem:[#allocation2 + $0x18] sm:$0xff] %vm28_vm0, %v689_v3  ;;  %33 = vst.msk [vmem:[#allocation2 + $0x20] sm:$0xff] %vm28_vm0, %v689_v3  ;;  %v94_v6 = vpack.c.bf16 %v88_v5, %v87_v2  ;;  %v90_v8 = vld [vmem:[%s1188_s1 + $0x28] sm:$0xff]  ;;  %v61_v9 = vld [vmem:[%s1189_s0] sm:$0xff] }
   0x4   :  { %34 = vst.msk [vmem:[#allocation2 + $0x28] sm:$0xff] %vm28_vm0, %v689_v3  ;;  %35 = vst.msk [vmem:[#allocation2 + $0x30] sm:$0xff] %vm28_vm0, %v689_v3  ;;  %624 = vmatprep.subr.bf16.mxu0 %v93_v4  ;;  %648 = vmatprep.subr.bf16.mxu1 %v93_v4  ;;  %v62_v10 = vld [vmem:[%s1189_s0 + $0x8] sm:$0xff]  ;;  %v69_v11 = vld [vmem:[%s1189_s0 + $0x40] sm:$0xff]  ;;  %v95_v15 = vpack.c.bf16 %v90_v8, %v89_v7 }
   0x5   :  { %36 = vst.msk [vmem:[#allocation2 + $0x38] sm:$0xff] %vm28_vm0, %v689_v3  ;;  %37 = vst.msk [vmem:[#allocation2 + $0x40] sm:$0xff] %vm28_vm0, %v689_v3  ;;  %v70_v12 = vld [vmem:[%s1189_s0 + $0x48] sm:$0xff]  ;;  %625 = vmatpush3.bf16.msra.mxu0 %v93_v4  ;;  %652 = vmatpush3.bf16.msra.mxu1 %v93_v4  ;;  %v77_v13 = vpack.c.bf16 %v62_v10, %v61_v9  ;;  %v91_v16 = vld [vmem:[%s1188_s1 + $0x30] sm:$0xff] }
   0x6   :  { %38 = vst.msk [vmem:[#allocation2 + $0x48] sm:$0xff] %vm28_vm0, %v689_v3  ;;  %39 = vst.msk [vmem:[#allocation2 + $0x50] sm:$0xff] %vm28_vm0, %v689_v3  ;;  %v81_v14 = vpack.c.bf16 %v70_v12, %v69_v11  ;;  %626 = vmatprep.subr.bf16.mxu0 %v94_v6  ;;  %649 = vmatprep.subr.bf16.mxu1 %v94_v6  ;;  %v92_v17 = vld [vmem:[%s1188_s1 + $0x38] sm:$0xff]  ;;  %v63_v19 = vld [vmem:[%s1189_s0 + $0x10] sm:$0xff] }
   0x7   :  { %40 = vst.msk [vmem:[#allocation2 + $0x58] sm:$0xff] %vm28_vm0, %v689_v3  ;;  %41 = vst.msk [vmem:[#allocation2 + $0x60] sm:$0xff] %vm28_vm0, %v689_v3  ;;  %632 = vmatprep.mubr.msk.bf16.mxu0 %vm97_vm1, %v77_v13  ;;  %v96_v18 = vpack.c.bf16 %v92_v17, %v91_v16  ;;  %v64_v20 = vld [vmem:[%s1189_s0 + $0x18] sm:$0xff]  ;;  %v71_v21 = vld [vmem:[%s1189_s0 + $0x50] sm:$0xff] }
   0x8   :  { %42 = vst.msk [vmem:[#allocation2 + $0x68] sm:$0xff] %vm28_vm0, %v689_v3  ;;  %43 = vst.msk [vmem:[#allocation2 + $0x70] sm:$0xff] %vm28_vm0, %v689_v3  ;;  %640 = vmatprep.mubr.msk.bf16.mxu1 %vm97_vm1, %v81_v14  ;;  %v72_v22 = vld [vmem:[%s1189_s0 + $0x58] sm:$0xff]  ;;  %v65_v23 = vld [vmem:[%s1189_s0 + $0x20] sm:$0xff]  ;;  %v78_v27 = vpack.c.bf16 %v64_v20, %v63_v19 }
   0x9   :  { %44 = vst.msk [vmem:[#allocation2 + $0x78] sm:$0xff] %vm28_vm0, %v689_v3  ;;  %627 = vmatpush3.bf16.msra.mxu0 %v94_v6  ;;  %653 = vmatpush3.bf16.msra.mxu1 %v94_v6  ;;  %v66_v24 = vld [vmem:[%s1189_s0 + $0x28] sm:$0xff]  ;;  %v73_v25 = vld [vmem:[%s1189_s0 + $0x60] sm:$0xff]  ;;  %v82_v28 = vpack.c.bf16 %v72_v22, %v71_v21  ;;  %v67_v31 = vld [vmem:[%s1189_s0 + $0x30] sm:$0xff] }
   0xa   :  { %628 = vmatprep.subr.bf16.mxu0 %v95_v15  ;;  %650 = vmatprep.subr.bf16.mxu1 %v95_v15  ;;  %v74_v26 = vld [vmem:[%s1189_s0 + $0x68] sm:$0xff]  ;;  %v79_v29 = vpack.c.bf16 %v66_v24, %v65_v23  ;;  %v68_v32 = vld [vmem:[%s1189_s0 + $0x38] sm:$0xff]  ;;  %v75_v33 = vld [vmem:[%s1189_s0 + $0x70] sm:$0xff] }
   0xb   :  { %v83_v30 = vpack.c.bf16 %v74_v26, %v73_v25  ;;  %v76_v34 = vld [vmem:[%s1189_s0 + $0x78] sm:$0xff]  ;;  %v80_v35 = vpack.c.bf16 %v68_v32, %v67_v31  ;;  %v47_v37 = vld [vmem:[#allocation2 + $0x10] sm:$0xff]  ;;  %v45_v39 = vld [vmem:[#allocation2] sm:$0xff] }
   0xc   :  { %v84_v36 = vpack.c.bf16 %v76_v34, %v75_v33  ;;  %v53_v40 = vld [vmem:[#allocation2 + $0x40] sm:$0xff]  ;;  %v48_v43 = vld [vmem:[#allocation2 + $0x18] sm:$0xff]  ;;  %v46_v49 = vld [vmem:[#allocation2 + $0x8] sm:$0xff] }
   0xd   :  { %629 = vmatpush3.bf16.msra.mxu0 %v95_v15  ;;  %654 = vmatpush3.bf16.msra.mxu1 %v95_v15  ;;  %v55_v38 = vld [vmem:[#allocation2 + $0x50] sm:$0xff]  ;;  %v54_v50 = vld [vmem:[#allocation2 + $0x48] sm:$0xff]  ;;  %v49_v63 = vld [vmem:[#allocation2 + $0x20] sm:$0xff] }
   0xe   :  { %630 = vmatprep.subr.bf16.mxu0 %v96_v18  ;;  %651 = vmatprep.subr.bf16.mxu1 %v96_v18  ;;  %v56_v44 = vld [vmem:[#allocation2 + $0x58] sm:$0xff]  ;;  %v51_v61 = vld [vmem:[#allocation2 + $0x30] sm:$0xff]  ;;  %v57_v0 = vld [vmem:[#allocation2 + $0x60] sm:$0xff] }
   0xf   :  { %v59_v62 = vld [vmem:[#allocation2 + $0x70] sm:$0xff]  ;;  %v832_v2 = vld [vmem:[%s1190_s2] ss:$0 sm:$0xff]  ;;  %v52_v3 = vld [vmem:[#allocation2 + $0x38] sm:$0xff] }
  0x10   :  { %v60_v5 = vld [vmem:[#allocation2 + $0x78] sm:$0xff]  ;;  %v304_v8 = vld [vmem:[%s1191_s3 + $0x50] sm:$0xff]  ;;  %v50_v9 = vld [vmem:[#allocation2 + $0x28] sm:$0xff] }
  0x11   :  { %631 = vmatpush3.bf16.msra.mxu0 %v96_v18  ;;  %655 = vmatpush3.bf16.msra.mxu1 %v96_v18  ;;  %v58_v12 = vld [vmem:[#allocation2 + $0x68] sm:$0xff]  ;;  %v296_v16 = vld [vmem:[%s1191_s3 + $0x10] sm:$0xff]  ;;  %v294_v25 = vld [vmem:[%s1191_s3] sm:$0xff] }
  0x12   :  { %v297_v32 = vld [vmem:[%s1191_s3 + $0x18] sm:$0xff] }
  0x14   :  { %633 = vmatmul.mubr.msk.bf16.vlgmr.msra.gmra.mrb[0].mxu0 %vm97_vm1, %v78_v27  ;;  %641 = vmatmul.mubr.msk.bf16.vlgmr.msra.gmra.mrb[0].mxu1 %vm97_vm1, %v82_v28 }
  0x15   :  { %636 = vmatprep.mubr.msk.bf16.mxu0 %vm97_vm1, %v79_v29  ;;  %644 = vmatprep.mubr.msk.bf16.mxu1 %vm97_vm1, %v83_v30 }
  0x1c   :  { %637 = vmatmul.mubr.msk.bf16.gmra.mrb[4].mxu0 %vm97_vm1, %v80_v35  ;;  %645 = vmatmul.mubr.msk.bf16.gmra.mrb[4].mxu1 %vm97_vm1, %v84_v36 }
  0xe7   :  { %v634_v41 = vpop.f32.mrb[0].mxu0  ;;  %v642_v42 = vpop.f32.mrb[0].mxu1 }
  0xe8   :  { %v221_v45 = vadd.f32 %v634_v41, %v47_v37  ;;  %v229_v46 = vadd.f32 %v642_v42, %v55_v38  ;;  %v156_v47 = vpop.f32.mrb[1].mxu0  ;;  %v188_v48 = vpop.f32.mrb[1].mxu1 }
  0xe9   :  { %v219_v51 = vadd.f32 %v156_v47, %v45_v39  ;;  %v227_v52 = vadd.f32 %v188_v48, %v53_v40  ;;  %v635_v53 = vpop.f32.mrb[2].mxu0  ;;  %v643_v54 = vpop.f32.mrb[2].mxu1 }
  0xea   :  { %238 = vst.msk [vmem:[#allocation2 + $0x10] sm:$0xff] %vm28_vm0, %v221_v45  ;;  %246 = vst.msk [vmem:[#allocation2 + $0x50] sm:$0xff] %vm28_vm0, %v229_v46  ;;  %v222_v55 = vadd.f32 %v635_v53, %v48_v43  ;;  %v230_v56 = vadd.f32 %v643_v54, %v56_v44  ;;  %v159_v57 = vpop.f32.mrb[3].mxu0  ;;  %v191_v58 = vpop.f32.mrb[3].mxu1  ;;  %v302_v44 = vld [vmem:[%s1191_s3 + $0x40] sm:$0xff]  ;;  %v305_v46 = vld [vmem:[%s1191_s3 + $0x58] sm:$0xff] }
  0xeb   :  { %236 = vst.msk [vmem:[#allocation2] sm:$0xff] %vm28_vm0, %v219_v51  ;;  %244 = vst.msk [vmem:[#allocation2 + $0x40] sm:$0xff] %vm28_vm0, %v227_v52  ;;  %v220_v59 = vadd.f32 %v159_v57, %v46_v49  ;;  %v228_v60 = vadd.f32 %v191_v58, %v54_v50 }
  0xec   :  { %239 = vst.msk [vmem:[#allocation2 + $0x18] sm:$0xff] %vm28_vm0, %v222_v55  ;;  %247 = vst.msk [vmem:[#allocation2 + $0x58] sm:$0xff] %vm28_vm0, %v230_v56  ;;  %v303_v55 = vld [vmem:[%s1191_s3 + $0x48] sm:$0xff] }
  0xed   :  { %237 = vst.msk [vmem:[#allocation2 + $0x8] sm:$0xff] %vm28_vm0, %v220_v59  ;;  %245 = vst.msk [vmem:[#allocation2 + $0x48] sm:$0xff] %vm28_vm0, %v228_v60  ;;  %v295_v56 = vld [vmem:[%s1191_s3 + $0x8] sm:$0xff]  ;;  %v300_v60 = vld [vmem:[%s1191_s3 + $0x30] sm:$0xff] }
  0xef   :  { %v638_v1 = vpop.f32.mrb[4].mxu0  ;;  %v646_v4 = vpop.f32.mrb[4].mxu1 }
  0xf0   :  { %v225_v6 = vadd.f32 %v638_v1, %v51_v61  ;;  %v172_v7 = vpop.f32.mrb[5].mxu0  ;;  %v233_v10 = vadd.f32 %v646_v4, %v59_v62  ;;  %v204_v11 = vpop.f32.mrb[5].mxu1  ;;  %v301_v61 = vld [vmem:[%s1191_s3 + $0x38] sm:$0xff] }
  0xf1   :  { %v223_v13 = vadd.f32 %v172_v7, %v49_v63  ;;  %v265_v14 = vld [vmem:[#allocation2 + $0x50] sm:$0xff]  ;;  %v639_v17 = vpop.f32.mrb[6].mxu0  ;;  %v231_v18 = vadd.f32 %v204_v11, %v57_v0  ;;  %v647_v19 = vpop.f32.mrb[6].mxu1 }
  0xf2   :  { %v257_v15 = vld [vmem:[#allocation2 + $0x10] sm:$0xff]  ;;  %242 = vst.msk [vmem:[#allocation2 + $0x30] sm:$0xff] %vm28_vm0, %v225_v6  ;;  %v288_v20 = vadd.f32 %v832_v2, %v265_v14  ;;  %v226_v22 = vadd.f32 %v639_v17, %v52_v3  ;;  %v175_v23 = vpop.f32.mrb[7].mxu0  ;;  %v255_v24 = vld [vmem:[#allocation2] sm:$0xff]  ;;  %250 = vst.msk [vmem:[#allocation2 + $0x70] sm:$0xff] %vm28_vm0, %v233_v10  ;;  %v234_v26 = vadd.f32 %v647_v19, %v60_v5  ;;  %v207_v27 = vpop.f32.mrb[7].mxu1 }
  0xf3   :  { %v280_v21 = vadd.f32 %v832_v2, %v257_v15  ;;  %v263_v28 = vld [vmem:[#allocation2 + $0x40] sm:$0xff]  ;;  %240 = vst.msk [vmem:[#allocation2 + $0x20] sm:$0xff] %vm28_vm0, %v223_v13  ;;  %v224_v29 = vadd.f32 %v175_v23, %v50_v9  ;;  %v278_v30 = vadd.f32 %v832_v2, %v255_v24  ;;  %v258_v31 = vld [vmem:[#allocation2 + $0x18] sm:$0xff]  ;;  %248 = vst.msk [vmem:[#allocation2 + $0x60] sm:$0xff] %vm28_vm0, %v231_v18 }
  0xf4   :  { %v232_v33 = vadd.f32 %v207_v27, %v58_v12  ;;  %v266_v34 = vld [vmem:[#allocation2 + $0x58] sm:$0xff]  ;;  %v853_v35 = vadd.f32 %v304_v8, %v288_v20  ;;  %243 = vst.msk [vmem:[#allocation2 + $0x38] sm:$0xff] %vm28_vm0, %v226_v22  ;;  %v281_v37 = vadd.f32 %v832_v2, %v258_v31  ;;  %251 = vst.msk [vmem:[#allocation2 + $0x78] sm:$0xff] %vm28_vm0, %v234_v26  ;;  %v264_v45 = vld [vmem:[#allocation2 + $0x48] sm:$0xff] }
  0xf5   :  { %v855_v36 = vadd.f32 %v296_v16, %v280_v21  ;;  %241 = vst.msk [vmem:[#allocation2 + $0x28] sm:$0xff] %vm28_vm0, %v224_v29  ;;  %v286_v38 = vadd.f32 %v832_v2, %v263_v28  ;;  %v289_v39 = vadd.f32 %v832_v2, %v266_v34  ;;  %v868_v42 = vadd.f32 %v294_v25, %v278_v30  ;;  %v256_v47 = vld [vmem:[#allocation2 + $0x8] sm:$0xff]  ;;  %v298_v13 = vld [vmem:[%s1191_s3 + $0x20] sm:$0xff]  ;;  %v308_v31 = vld [vmem:[%s1191_s3 + $0x70] sm:$0xff] }
  0xf6   :  { %249 = vst.msk [vmem:[#allocation2 + $0x68] sm:$0xff] %vm28_vm0, %v232_v33  ;;  %v356_v40 = vsel %vm28_vm0, %v853_v35, 0.0  ;;  %v870_v43 = vadd.f32 %v297_v32, %v281_v37  ;;  %v287_v49 = vadd.f32 %v832_v2, %v264_v45  ;;  %v279_v54 = vadd.f32 %v832_v2, %v256_v47  ;;  %v299_v14 = vld [vmem:[%s1191_s3 + $0x28] sm:$0xff]  ;;  %v306_v19 = vld [vmem:[%s1191_s3 + $0x60] sm:$0xff]  ;;  %v309_v32 = vld [vmem:[%s1191_s3 + $0x78] sm:$0xff] }
  0xf7   :  { %v332_v41 = vsel %vm28_vm0, %v855_v36, 0.0  ;;  %357 = vadd.xlane.f32.xlu0 %v356_v40  ;;  %v878_v48 = vadd.f32 %v302_v44, %v286_v38  ;;  %v326_v51 = vsel %vm28_vm0, %v868_v42, 0.0  ;;  %v885_v53 = vadd.f32 %v305_v46, %v289_v39  ;;  %v307_v20 = vld [vmem:[%s1191_s3 + $0x68] sm:$0xff] }
  0xf8   :  { %333 = vadd.xlane.f32.xlu1 %v332_v41  ;;  %v335_v52 = vsel %vm28_vm0, %v870_v43, 0.0  ;;  %v906_v0 = vadd.f32 %v303_v55, %v287_v49  ;;  %v908_v1 = vadd.f32 %v295_v56, %v279_v54 }
  0xf9   :  { %v261_v50 = vld [vmem:[#allocation2 + $0x30] sm:$0xff]  ;;  %v350_v62 = vsel %vm28_vm0, %v878_v48, 0.0  ;;  %v359_v63 = vsel %vm28_vm0, %v885_v53, 0.0 }
  0xfa   :  { %v284_v58 = vadd.f32 %v832_v2, %v261_v50  ;;  %v259_v3 = vld [vmem:[#allocation2 + $0x20] sm:$0xff]  ;;  %v353_v9 = vsel %vm28_vm0, %v906_v0, 0.0  ;;  %v329_v10 = vsel %vm28_vm0, %v908_v1, 0.0  ;;  %v269_v23 = vld [vmem:[#allocation2 + $0x70] sm:$0xff] }
  0xfb   :  { %327 = vadd.xlane.f32.xlu0 %v326_v51  ;;  %v262_v57 = vld [vmem:[#allocation2 + $0x38] sm:$0xff]  ;;  %v267_v7 = vld [vmem:[#allocation2 + $0x60] sm:$0xff]  ;;  %v282_v11 = vadd.f32 %v832_v2, %v259_v3  ;;  %v292_v29 = vadd.f32 %v832_v2, %v269_v23 }
  0xfc   :  { %336 = vadd.xlane.f32.xlu1 %v335_v52  ;;  %v285_v59 = vadd.f32 %v832_v2, %v262_v57  ;;  %v260_v4 = vld [vmem:[#allocation2 + $0x28] sm:$0xff]  ;;  %v910_v5 = vadd.f32 %v300_v60, %v284_v58  ;;  %v290_v17 = vadd.f32 %v832_v2, %v267_v7  ;;  %v270_v24 = vld [vmem:[#allocation2 + $0x78] sm:$0xff] }
  0xfd   :  { %v268_v8 = vld [vmem:[#allocation2 + $0x68] sm:$0xff]  ;;  %v283_v12 = vadd.f32 %v832_v2, %v260_v4  ;;  %v938_v21 = vadd.f32 %v298_v13, %v282_v11  ;;  %v293_v30 = vadd.f32 %v832_v2, %v270_v24  ;;  %v962_v37 = vadd.f32 %v308_v31, %v292_v29 }
  0xfe   :  { %v912_v6 = vadd.f32 %v301_v61, %v285_v59  ;;  %v344_v15 = vsel %vm28_vm0, %v910_v5, 0.0  ;;  %v291_v18 = vadd.f32 %v832_v2, %v268_v8  ;;  %v942_v25 = vadd.f32 %v306_v19, %v290_v17 }
  0xff   :  { %351 = vadd.xlane.f32.xlu0 %v350_v62  ;;  %v940_v22 = vadd.f32 %v299_v14, %v283_v12  ;;  %v338_v27 = vsel %vm28_vm0, %v938_v21, 0.0  ;;  %v964_v38 = vadd.f32 %v309_v32, %v293_v30  ;;  %v368_v2 = vsel %vm28_vm0, %v962_v37, 0.0 }
 0x100   :  { %360 = vadd.xlane.f32.xlu1 %v359_v63  ;;  %v347_v16 = vsel %vm28_vm0, %v912_v6, 0.0  ;;  %v944_v26 = vadd.f32 %v307_v20, %v291_v18  ;;  %v362_v33 = vsel %vm28_vm0, %v942_v25, 0.0 }
 0x101   :  { %v341_v28 = vsel %vm28_vm0, %v940_v22, 0.0  ;;  %v371_v39 = vsel %vm28_vm0, %v964_v38, 0.0 }
 0x102   :  { %v365_v34 = vsel %vm28_vm0, %v944_v26, 0.0 }
 0x103   :  { %330 = vadd.xlane.f32.xlu0 %v329_v10 }
 0x104   :  { %354 = vadd.xlane.f32.xlu1 %v353_v9 }
 0x107   :  { %345 = vadd.xlane.f32.xlu0 %v344_v15 }
 0x108   :  { %348 = vadd.xlane.f32.xlu1 %v347_v16 }
 0x10b   :  { %339 = vadd.xlane.f32.xlu0 %v338_v27 }
 0x10c   :  { %342 = vadd.xlane.f32.xlu1 %v341_v28 }
 0x10f   :  { %363 = vadd.xlane.f32.xlu0 %v362_v33 }
 0x110   :  { %366 = vadd.xlane.f32.xlu1 %v365_v34 }
 0x113   :  { %369 = vadd.xlane.f32.xlu0 %v368_v2 }
 0x114   :  { %372 = vadd.xlane.f32.xlu1 %v371_v39 }
 0x184   :  { %v358_v40 = vpop.xlane.xlu0 %357 }
 0x185   :  { %v334_v41 = vpop.xlane.xlu1 %333  ;;  %v385_v44 = vmul.f32 0.03125, %v358_v40 }
 0x186   :  { %v377_v45 = vmul.f32 0.03125, %v334_v41 }
 0x187   :  { %v971_v46 = vsub.f32 %v853_v35, %v385_v44 }
 0x188   :  { %v974_v47 = vsub.f32 %v855_v36, %v377_v45  ;;  %v328_v49 = vpop.xlane.xlu0 %327 }
 0x189   :  { %v337_v50 = vpop.xlane.xlu1 %336  ;;  %v375_v51 = vmul.f32 0.03125, %v328_v49  ;;  %v417_v35 = vmul.f32 %v971_v46, %v971_v46 }
 0x18a   :  { %v378_v52 = vmul.f32 0.03125, %v337_v50  ;;  %v409_v54 = vmul.f32 %v974_v47, %v974_v47 }
 0x18b   :  { %v979_v55 = vsub.f32 %v868_v42, %v375_v51  ;;  %v453_v63 = vsel %vm28_vm0, %v417_v35, 0.0 }
 0x18c   :  { %v982_v56 = vsub.f32 %v870_v43, %v378_v52  ;;  %v429_v57 = vsel %vm28_vm0, %v409_v54, 0.0  ;;  %v352_v36 = vpop.xlane.xlu0 %351 }
 0x18d   :  { %v361_v58 = vpop.xlane.xlu1 %360  ;;  %430 = vadd.xlane.f32.xlu0 %v429_v57  ;;  %v383_v59 = vmul.f32 0.03125, %v352_v36  ;;  %v407_v42 = vmul.f32 %v979_v55, %v979_v55 }
 0x18e   :  { %v386_v60 = vmul.f32 0.03125, %v361_v58  ;;  %v410_v61 = vmul.f32 %v982_v56, %v982_v56 }
 0x18f   :  { %v992_v62 = vsub.f32 %v878_v48, %v383_v59  ;;  %v423_v11 = vsel %vm28_vm0, %v407_v42, 0.0 }
 0x190   :  { %v995_v43 = vsub.f32 %v885_v53, %v386_v60  ;;  %v432_v3 = vsel %vm28_vm0, %v410_v61, 0.0  ;;  %v331_v7 = vpop.xlane.xlu0 %330 }
 0x191   :  { %v355_v4 = vpop.xlane.xlu1 %354  ;;  %454 = vadd.xlane.f32.xlu0 %v453_v63  ;;  %433 = vadd.xlane.f32.xlu1 %v432_v3  ;;  %v376_v9 = vmul.f32 0.03125, %v331_v7  ;;  %v415_v13 = vmul.f32 %v992_v62, %v992_v62 }
 0x192   :  { %v384_v8 = vmul.f32 0.03125, %v355_v4  ;;  %v418_v10 = vmul.f32 %v995_v43, %v995_v43 }
 0x193   :  { %v1006_v53 = vsub.f32 %v908_v1, %v376_v9  ;;  %v447_v20 = vsel %vm28_vm0, %v415_v13, 0.0 }
 0x194   :  { %v1003_v48 = vsub.f32 %v906_v0, %v384_v8  ;;  %v456_v12 = vsel %vm28_vm0, %v418_v10, 0.0  ;;  %v346_v14 = vpop.xlane.xlu0 %345 }
 0x195   :  { %424 = vadd.xlane.f32.xlu0 %v423_v11  ;;  %v349_v15 = vpop.xlane.xlu1 %348  ;;  %457 = vadd.xlane.f32.xlu1 %v456_v12  ;;  %v381_v16 = vmul.f32 0.03125, %v346_v14  ;;  %v408_v18 = vmul.f32 %v1006_v53, %v1006_v53 }
 0x196   :  { %v382_v17 = vmul.f32 0.03125, %v349_v15  ;;  %v416_v0 = vmul.f32 %v1003_v48, %v1003_v48 }
 0x197   :  { %v1016_v1 = vsub.f32 %v910_v5, %v381_v16  ;;  %v426_v23 = vsel %vm28_vm0, %v408_v18, 0.0 }
 0x198   :  { %v1019_v19 = vsub.f32 %v912_v6, %v382_v17  ;;  %v340_v24 = vpop.xlane.xlu0 %339  ;;  %v450_v31 = vsel %vm28_vm0, %v416_v0, 0.0 }
 0x199   :  { %448 = vadd.xlane.f32.xlu0 %v447_v20  ;;  %427 = vadd.xlane.f32.xlu1 %v426_v23  ;;  %v343_v27 = vpop.xlane.xlu1 %342  ;;  %v379_v28 = vmul.f32 0.03125, %v340_v24  ;;  %v413_v30 = vmul.f32 %v1016_v1, %v1016_v1 }
 0x19a   :  { %v380_v29 = vmul.f32 0.03125, %v343_v27  ;;  %v414_v33 = vmul.f32 %v1019_v19, %v1019_v19  ;;  %v1069_v27 = vld [vmem:[%s1192_s4] ss:$0 sm:$0xff] }
 0x19b   :  { %v1027_v5 = vsub.f32 %v938_v21, %v379_v28  ;;  %v441_v32 = vsel %vm28_vm0, %v413_v30, 0.0 }
 0x19c   :  { %v1030_v6 = vsub.f32 %v940_v22, %v380_v29  ;;  %v364_v34 = vpop.xlane.xlu0 %363  ;;  %v444_v49 = vsel %vm28_vm0, %v414_v33, 0.0  ;;  %v1075_v33 = vld [vmem:[%s1193_s5] ss:$0 sm:$0xff] }
 0x19d   :  { %442 = vadd.xlane.f32.xlu0 %v441_v32  ;;  %451 = vadd.xlane.f32.xlu1 %v450_v31  ;;  %v367_v2 = vpop.xlane.xlu1 %366  ;;  %v387_v39 = vmul.f32 0.03125, %v364_v34  ;;  %v411_v41 = vmul.f32 %v1027_v5, %v1027_v5 }
 0x19e   :  { %v388_v40 = vmul.f32 0.03125, %v367_v2  ;;  %v412_v21 = vmul.f32 %v1030_v6, %v1030_v6 }
 0x19f   :  { %v1040_v22 = vsub.f32 %v942_v25, %v387_v39  ;;  %v435_v45 = vsel %vm28_vm0, %v411_v41, 0.0 }
 0x1a0   :  { %v1043_v44 = vsub.f32 %v944_v26, %v388_v40  ;;  %v370_v50 = vpop.xlane.xlu0 %369  ;;  %v438_v35 = vsel %vm28_vm0, %v412_v21, 0.0 }
 0x1a1   :  { %436 = vadd.xlane.f32.xlu0 %v435_v45  ;;  %445 = vadd.xlane.f32.xlu1 %v444_v49  ;;  %v373_v51 = vpop.xlane.xlu1 %372  ;;  %v389_v52 = vmul.f32 0.03125, %v370_v50  ;;  %v419_v57 = vmul.f32 %v1040_v22, %v1040_v22 }
 0x1a2   :  { %v390_v54 = vmul.f32 0.03125, %v373_v51  ;;  %v420_v58 = vmul.f32 %v1043_v44, %v1043_v44 }
 0x1a3   :  { %v1051_v25 = vsub.f32 %v962_v37, %v389_v52  ;;  %v459_v36 = vsel %vm28_vm0, %v419_v57, 0.0 }
 0x1a4   :  { %v1054_v26 = vsub.f32 %v964_v38, %v390_v54  ;;  %v462_v61 = vsel %vm28_vm0, %v420_v58, 0.0 }
 0x1a5   :  { %460 = vadd.xlane.f32.xlu0 %v459_v36  ;;  %439 = vadd.xlane.f32.xlu1 %v438_v35  ;;  %v421_v59 = vmul.f32 %v1051_v25, %v1051_v25 }
 0x1a6   :  { %v422_v37 = vmul.f32 %v1054_v26, %v1054_v26 }
 0x1a7   :  { %v465_v60 = vsel %vm28_vm0, %v421_v59, 0.0 }
 0x1a8   :  { %v468_v38 = vsel %vm28_vm0, %v422_v37, 0.0 }
 0x1a9   :  { %466 = vadd.xlane.f32.xlu0 %v465_v60  ;;  %463 = vadd.xlane.f32.xlu1 %v462_v61 }
 0x1ad   :  { %469 = vadd.xlane.f32.xlu1 %v468_v38 }
 0x21a   :  { %v431_v42 = vpop.xlane.xlu0 %430 }
 0x21b   :  { %v473_v63 = vmul.f32 0.03125, %v431_v42 }
 0x21d   :  { %v489_v3 = vadd.f32 1e-05, %v473_v63 }
 0x21e   :  { %v455_v4 = vpop.xlane.xlu0 %454  ;;  %v434_v7 = vpop.xlane.xlu1 %433 }
 0x21f   :  { %657 = vrsqrt.f32 %v489_v3  ;;  %v481_v8 = vmul.f32 0.03125, %v455_v4  ;;  %v474_v9 = vmul.f32 0.03125, %v434_v7 }
 0x221   :  { %v497_v10 = vadd.f32 1e-05, %v481_v8  ;;  %v490_v11 = vadd.f32 1e-05, %v474_v9 }
 0x222   :  { %v425_v12 = vpop.xlane.xlu0 %424  ;;  %v458_v13 = vpop.xlane.xlu1 %457 }
 0x223   :  { %659 = vrsqrt.f32 %v497_v10  ;;  %v471_v14 = vmul.f32 0.03125, %v425_v12  ;;  %v482_v15 = vmul.f32 0.03125, %v458_v13 }
 0x224   :  { %661 = vrsqrt.f32 %v490_v11 }
 0x225   :  { %v487_v16 = vadd.f32 1e-05, %v471_v14  ;;  %v498_v17 = vadd.f32 1e-05, %v482_v15 }
 0x226   :  { %v449_v18 = vpop.xlane.xlu0 %448  ;;  %v428_v0 = vpop.xlane.xlu1 %427 }
 0x227   :  { %663 = vrsqrt.f32 %v487_v16  ;;  %v479_v20 = vmul.f32 0.03125, %v449_v18  ;;  %v472_v23 = vmul.f32 0.03125, %v428_v0 }
 0x228   :  { %665 = vrsqrt.f32 %v498_v17 }
 0x229   :  { %v658_v24 = vpop.eup %657  ;;  %v495_v28 = vadd.f32 1e-05, %v479_v20  ;;  %v488_v29 = vadd.f32 1e-05, %v472_v23 }
 0x22a   :  { %v521_v30 = vmul.f32 %v658_v24, %v974_v47  ;;  %v443_v31 = vpop.xlane.xlu0 %442  ;;  %v452_v32 = vpop.xlane.xlu1 %451 }
 0x22b   :  { %667 = vrsqrt.f32 %v495_v28  ;;  %v477_v34 = vmul.f32 0.03125, %v443_v31  ;;  %v480_v2 = vmul.f32 0.03125, %v452_v32 }
 0x22c   :  { %v544_v39 = vmul.f32 %v1069_v27, %v521_v30  ;;  %669 = vrsqrt.f32 %v488_v29 }
 0x22d   :  { %v660_v40 = vpop.eup %659  ;;  %v493_v41 = vadd.f32 1e-05, %v477_v34  ;;  %v496_v21 = vadd.f32 1e-05, %v480_v2 }
 0x22e   :  { %v662_v45 = vpop.eup %661  ;;  %v567_v49 = vadd.f32 %v1075_v33, %v544_v39  ;;  %v529_v47 = vmul.f32 %v660_v40, %v971_v46  ;;  %v437_v50 = vpop.xlane.xlu0 %436 }
 0x22f   :  { %v446_v51 = vpop.xlane.xlu1 %445  ;;  %v522_v52 = vmul.f32 %v662_v45, %v982_v56  ;;  %671 = vrsqrt.f32 %v493_v41  ;;  %v475_v54 = vmul.f32 0.03125, %v437_v50 }
 0x230   :  { %v478_v57 = vmul.f32 0.03125, %v446_v51  ;;  %583 = vst.msk [vmem:[%s1194_s6 + $0x10] sm:$0xff] %vm28_vm0, %v567_v49  ;;  %v552_v35 = vmul.f32 %v1069_v27, %v529_v47  ;;  %673 = vrsqrt.f32 %v496_v21 }
 0x231   :  { %v664_v36 = vpop.eup %663  ;;  %v545_v58 = vmul.f32 %v1069_v27, %v522_v52  ;;  %v491_v59 = vadd.f32 1e-05, %v475_v54 }
 0x232   :  { %v494_v46 = vadd.f32 1e-05, %v478_v57  ;;  %v666_v60 = vpop.eup %665  ;;  %v575_v61 = vadd.f32 %v1075_v33, %v552_v35  ;;  %v519_v56 = vmul.f32 %v664_v36, %v979_v55  ;;  %v461_v37 = vpop.xlane.xlu0 %460 }
 0x233   :  { %v440_v38 = vpop.xlane.xlu1 %439  ;;  %v568_v42 = vadd.f32 %v1075_v33, %v545_v58  ;;  %v530_v63 = vmul.f32 %v666_v60, %v995_v43  ;;  %675 = vrsqrt.f32 %v491_v59  ;;  %v483_v3 = vmul.f32 0.03125, %v461_v37 }
 0x234   :  { %591 = vst.msk [vmem:[%s1194_s6 + $0x50] sm:$0xff] %vm28_vm0, %v575_v61  ;;  %v542_v4 = vmul.f32 %v1069_v27, %v519_v56  ;;  %677 = vrsqrt.f32 %v494_v46  ;;  %v476_v7 = vmul.f32 0.03125, %v440_v38 }
 0x235   :  { %v668_v8 = vpop.eup %667  ;;  %584 = vst.msk [vmem:[%s1194_s6 + $0x18] sm:$0xff] %vm28_vm0, %v568_v42  ;;  %v553_v55 = vmul.f32 %v1069_v27, %v530_v63  ;;  %v499_v43 = vadd.f32 1e-05, %v483_v3 }
 0x236   :  { %v670_v9 = vpop.eup %669  ;;  %v565_v10 = vadd.f32 %v1075_v33, %v542_v4  ;;  %v527_v11 = vmul.f32 %v668_v8, %v992_v62  ;;  %v492_v12 = vadd.f32 1e-05, %v476_v7  ;;  %v467_v13 = vpop.xlane.xlu0 %466 }
 0x237   :  { %v464_v14 = vpop.xlane.xlu1 %463  ;;  %v576_v15 = vadd.f32 %v1075_v33, %v553_v55  ;;  %v520_v16 = vmul.f32 %v670_v9, %v1006_v53  ;;  %679 = vrsqrt.f32 %v499_v43  ;;  %v485_v17 = vmul.f32 0.03125, %v467_v13 }
 0x238   :  { %581 = vst.msk [vmem:[%s1194_s6] sm:$0xff] %vm28_vm0, %v565_v10  ;;  %v550_v18 = vmul.f32 %v1069_v27, %v527_v11  ;;  %681 = vrsqrt.f32 %v492_v12  ;;  %v484_v0 = vmul.f32 0.03125, %v464_v14 }
 0x239   :  { %v672_v20 = vpop.eup %671  ;;  %592 = vst.msk [vmem:[%s1194_s6 + $0x58] sm:$0xff] %vm28_vm0, %v576_v15  ;;  %v543_v62 = vmul.f32 %v1069_v27, %v520_v16  ;;  %v501_v53 = vadd.f32 1e-05, %v485_v17 }
 0x23a   :  { %v674_v23 = vpop.eup %673  ;;  %v573_v24 = vadd.f32 %v1075_v33, %v550_v18  ;;  %v525_v28 = vmul.f32 %v672_v20, %v1016_v1  ;;  %v500_v29 = vadd.f32 1e-05, %v484_v0 }
 0x23b   :  { %v470_v30 = vpop.xlane.xlu1 %469  ;;  %v566_v31 = vadd.f32 %v1075_v33, %v543_v62  ;;  %v528_v32 = vmul.f32 %v674_v23, %v1003_v48  ;;  %683 = vrsqrt.f32 %v501_v53 }
 0x23c   :  { %v486_v34 = vmul.f32 0.03125, %v470_v30  ;;  %589 = vst.msk [vmem:[%s1194_s6 + $0x40] sm:$0xff] %vm28_vm0, %v573_v24  ;;  %v548_v2 = vmul.f32 %v1069_v27, %v525_v28  ;;  %685 = vrsqrt.f32 %v500_v29 }
 0x23d   :  { %v676_v39 = vpop.eup %675  ;;  %582 = vst.msk [vmem:[%s1194_s6 + $0x8] sm:$0xff] %vm28_vm0, %v566_v31  ;;  %v551_v1 = vmul.f32 %v1069_v27, %v528_v32 }
 0x23e   :  { %v502_v40 = vadd.f32 1e-05, %v486_v34  ;;  %v678_v48 = vpop.eup %677  ;;  %v571_v41 = vadd.f32 %v1075_v33, %v548_v2  ;;  %v523_v21 = vmul.f32 %v676_v39, %v1027_v5 }
 0x23f   :  { %v574_v45 = vadd.f32 %v1075_v33, %v551_v1  ;;  %v526_v49 = vmul.f32 %v678_v48, %v1019_v19 }
 0x240   :  { %687 = vrsqrt.f32 %v502_v40  ;;  %587 = vst.msk [vmem:[%s1194_s6 + $0x30] sm:$0xff] %vm28_vm0, %v571_v41  ;;  %v546_v47 = vmul.f32 %v1069_v27, %v523_v21 }
 0x241   :  { %v680_v50 = vpop.eup %679  ;;  %590 = vst.msk [vmem:[%s1194_s6 + $0x48] sm:$0xff] %vm28_vm0, %v574_v45  ;;  %v549_v5 = vmul.f32 %v1069_v27, %v526_v49 }
 0x242   :  { %v682_v51 = vpop.eup %681  ;;  %v569_v52 = vadd.f32 %v1075_v33, %v546_v47  ;;  %v531_v19 = vmul.f32 %v680_v50, %v1040_v22 }
 0x243   :  { %v572_v54 = vadd.f32 %v1075_v33, %v549_v5  ;;  %v524_v57 = vmul.f32 %v682_v51, %v1030_v6 }
 0x244   :  { %585 = vst.msk [vmem:[%s1194_s6 + $0x20] sm:$0xff] %vm28_vm0, %v569_v52  ;;  %v554_v35 = vmul.f32 %v1069_v27, %v531_v19 }
 0x245   :  { %v684_v36 = vpop.eup %683  ;;  %588 = vst.msk [vmem:[%s1194_s6 + $0x38] sm:$0xff] %vm28_vm0, %v572_v54  ;;  %v547_v58 = vmul.f32 %v1069_v27, %v524_v57 }
 0x246   :  { %v686_v22 = vpop.eup %685  ;;  %v577_v59 = vadd.f32 %v1075_v33, %v554_v35  ;;  %v533_v6 = vmul.f32 %v684_v36, %v1051_v25 }
 0x247   :  { %v570_v46 = vadd.f32 %v1075_v33, %v547_v58  ;;  %v532_v60 = vmul.f32 %v686_v22, %v1043_v44 }
 0x248   :  { %593 = vst.msk [vmem:[%s1194_s6 + $0x60] sm:$0xff] %vm28_vm0, %v577_v59  ;;  %v556_v61 = vmul.f32 %v1069_v27, %v533_v6 }
 0x249   :  { %586 = vst.msk [vmem:[%s1194_s6 + $0x28] sm:$0xff] %vm28_vm0, %v570_v46  ;;  %v555_v37 = vmul.f32 %v1069_v27, %v532_v60 }
 0x24a   :  { %v688_v56 = vpop.eup %687  ;;  %v579_v25 = vadd.f32 %v1075_v33, %v556_v61 }
 0x24b   :  { %v534_v38 = vmul.f32 %v688_v56, %v1054_v26  ;;  %v578_v44 = vadd.f32 %v1075_v33, %v555_v37 }
 0x24c   :  { %595 = vst.msk [vmem:[%s1194_s6 + $0x70] sm:$0xff] %vm28_vm0, %v579_v25 }
 0x24d   :  { %v557_v42 = vmul.f32 %v1069_v27, %v534_v38  ;;  %594 = vst.msk [vmem:[%s1194_s6 + $0x68] sm:$0xff] %vm28_vm0, %v578_v44 }
 0x24f   :  { %v580_v63 = vadd.f32 %v1075_v33, %v557_v42 }
 0x251   :  { %596 = vst.msk [vmem:[%s1194_s6 + $0x78] sm:$0xff] %vm28_vm0, %v580_v63 }

</bundles_post_ra>
